<compile_context>
chip_gen: v7x
topology: tpu7x:2x2x1
jax: 0.10.0
libtpu: 0.0.40
codegen_flags: <defaults>
</compile_context>

<pallas_src>
import jax
import jax.numpy as jnp
from jax import lax
from jax.experimental import pallas as pl
from jax.experimental.pallas import tpu as pltpu

# Static (small) model hyper-parameters consistent with the module's forward.
DIM = 16               # args.char_dim
CONV = 8               # args.conv
C4 = CONV * 4
DRUG_LEN = 32          # drug_MAX_LENGTH (scaled down from 100)
PROT_LEN = 48          # protein_MAX_LENGTH (scaled down from 1000)
DRUG_KERNEL = (3, 3, 3)
PROTEIN_KERNEL = (3, 3, 3)
DRUG_AFTER = DRUG_LEN - sum(DRUG_KERNEL) + 3     # drug_dim_afterCNNs  = 26
PROT_AFTER = PROT_LEN - sum(PROTEIN_KERNEL) + 3  # protein_dim_afterCNNs = 42
DRUG_VOCAB = 65
PROT_VOCAB = 26


# -----------------------------------------------------------------------------
# Kernel 1: fully fused "pair" kernel
#   embedding gather + 3x(Conv1d+bias+ReLU) + WeightNetwork + both max-pools,
#   for BOTH branches, emitting the (1, 64) pair row per batch element.
# -----------------------------------------------------------------------------
def _conv_relu(h, w_ref, b_ref):
    """h: (L, C_in) f32; w_ref: (K, C_in, C_out); returns (L-K+1, C_out).
    Tap-wise accumulating dots — no in-kernel im2col lane-concat."""
    K = w_ref.shape[0]
    L_out = h.shape[0] - K + 1
    acc = jnp.dot(h[0:L_out, :], w_ref[0], preferred_element_type=jnp.float32)
    for k in range(1, K):
        acc = acc + jnp.dot(h[k:k + L_out, :], w_ref[k],
                            preferred_element_type=jnp.float32)
    return jnp.maximum(acc + b_ref[...], 0.0)


def _branch(tok_ref, emb_ref, w1, b1, w2, b2, w3, b3, wn1, wn2, vocab):
    # Embedding gather as a one-hot matmul (vocab <= 65, trivially cheap);
    # padding_idx=0 handled by the zeroed table row.
    tok = tok_ref[0]                                             # (L, 1) int32
    L = tok.shape[0]
    onehot = (tok == lax.broadcasted_iota(jnp.int32, (L, vocab), 1)
              ).astype(jnp.float32)                              # (L, vocab)
    h = jnp.dot(onehot, emb_ref[...], preferred_element_type=jnp.float32)

    h = _conv_relu(h, w1, b1)
    h = _conv_relu(h, w2, b2)
    h = _conv_relu(h, w3, b3)                                    # (L3, 4*conv)

    # WeightNetwork: Z = mean over channels (per-position scalar), A =
    # ReLU(W2 @ ReLU(W1 @ Z)) (bias-free), V = h * A.  Weights kept in the
    # PyTorch (out, in) layout so no in-kernel transpose is needed.
    z = jnp.mean(h, axis=-1, keepdims=True)                      # (L3, 1)
    e = jnp.maximum(jnp.dot(wn1[...], z,
                            preferred_element_type=jnp.float32), 0.0)
    a = jnp.maximum(jnp.dot(wn2[...], e,
                            preferred_element_type=jnp.float32), 0.0)

    # MaxPool over positions of h and of V=h*a, summed = this branch's slice
    # of (feats + re_feats).
    return (jnp.max(h, axis=0, keepdims=True)
            + jnp.max(h * a, axis=0, keepdims=True))             # (1, 4*conv)


def _pair_kernel(dtok_ref, ptok_ref, demb_ref, pemb_ref,
                 dw1, db1, dw2, db2, dw3, db3, dwn1, dwn2,
                 pw1, pb1, pw2, pb2, pw3, pb3, pwn1, pwn2,
                 pair_ref):
    d = _branch(dtok_ref, demb_ref, dw1, db1, dw2, db2, dw3, db3,
                dwn1, dwn2, DRUG_VOCAB)
    p = _branch(ptok_ref, pemb_ref, pw1, pb1, pw2, pb2, pw3, pb3,
                pwn1, pwn2, PROT_VOCAB)
    # Lane-contiguous 64-wide pair row: drug -> 0..31, protein -> 32..63.
    pair_ref[0] = jnp.concatenate([d, p], axis=1).astype(pair_ref.dtype)


def fused_pair(drug_tokens, protein_tokens, params):
    """drug/protein tokens: (B, L) int32.  Returns pair: (B, 2*4*conv) f32."""
    B = drug_tokens.shape[0]
    dtok = drug_tokens.reshape(B, DRUG_LEN, 1)
    ptok = protein_tokens.reshape(B, PROT_LEN, 1)

    def const(a):
        return pl.BlockSpec(a.shape, lambda b, n=a.ndim: (0,) * n)

    weights = [
        params["drug_embed"], params["protein_embed"],
        params["d_conv1_w"], params["d_conv1_b"],
        params["d_conv2_w"], params["d_conv2_b"],
        params["d_conv3_w"], params["d_conv3_b"],
        params["d_wn1"], params["d_wn2"],
        params["p_conv1_w"], params["p_conv1_b"],
        params["p_conv2_w"], params["p_conv2_b"],
        params["p_conv3_w"], params["p_conv3_b"],
        params["p_wn1"], params["p_wn2"],
    ]
    pair3 = pl.pallas_call(
        _pair_kernel,
        out_shape=jax.ShapeDtypeStruct((B, 1, 2 * C4), jnp.float32),
        grid=(B,),
        in_specs=[pl.BlockSpec((1, DRUG_LEN, 1), lambda b: (b, 0, 0)),
                  pl.BlockSpec((1, PROT_LEN, 1), lambda b: (b, 0, 0))]
                 + [const(a) for a in weights],
        out_specs=pl.BlockSpec((1, 1, 2 * C4), lambda b: (b, 0, 0)),
        compiler_params=pltpu.CompilerParams(
            dimension_semantics=("parallel",)),   # v7x: one batch row per TC
    )(dtok, ptok, *weights)
    return pair3.reshape(B, 2 * C4)


# -----------------------------------------------------------------------------
# Kernel 2: pipelined MLP head (fc1 -> fc2 -> fc3 -> out), bf16 weights.
# Grid iterates over fc2 output-column tiles (= fc3 contraction-row tiles) so
# the dominant weight DMA is double-buffered; fc3 pre-activation accumulates
# in VMEM scratch and the epilogue runs at the last step.
# -----------------------------------------------------------------------------
MLP_TILE = 256


def _mlp_kernel(pair_ref, w1_ref, b1_ref, w2_ref, b2_ref, w3_ref, b3_ref,
                wo_ref, bo_ref, out_ref, h1_scr, acc_scr):
    j = pl.program_id(0)

    def leaky(x):
        return jnp.where(x > 0, x, 0.01 * x)          # nn.LeakyReLU default

    @pl.when(j == 0)
    def _():
        h1 = jnp.dot(pair_ref[...].astype(jnp.bfloat16), w1_ref[...],
                     preferred_element_type=jnp.float32) + b1_ref[...]
        h1_scr[...] = leaky(h1)
        acc_scr[...] = jnp.zeros_like(acc_scr)

    # fc2 column tile j and its fc3 partial sum.
    h2 = leaky(jnp.dot(h1_scr[...].astype(jnp.bfloat16), w2_ref[...],
                       preferred_element_type=jnp.float32) + b2_ref[...])
    acc_scr[...] += jnp.dot(h2.astype(jnp.bfloat16), w3_ref[...],
                            preferred_element_type=jnp.float32)

    @pl.when(j == pl.num_programs(0) - 1)
    def _():
        h3 = leaky(acc_scr[...] + b3_ref[...])
        out_ref[...] = (jnp.dot(h3.astype(jnp.bfloat16), wo_ref[...],
                                preferred_element_type=jnp.float32)
                        + bo_ref[...]).astype(out_ref.dtype)


def mlp_head(pair, w1, b1, w2, b2, w3, b3, wo, bo, *, tile=MLP_TILE):
    B = pair.shape[0]
    H2 = w2.shape[1]

    def const(a):
        return pl.BlockSpec(a.shape, lambda j, n=a.ndim: (0,) * n)

    return pl.pallas_call(
        _mlp_kernel,
        out_shape=jax.ShapeDtypeStruct((B, wo.shape[1]), jnp.float32),
        grid=(H2 // tile,),
        in_specs=[const(pair),
                  const(w1), const(b1),
                  pl.BlockSpec((w2.shape[0], tile), lambda j: (0, j)),
                  pl.BlockSpec((1, tile), lambda j: (0, j)),
                  pl.BlockSpec((tile, w3.shape[1]), lambda j: (j, 0)),
                  const(b3), const(wo), const(bo)],
        out_specs=pl.BlockSpec((B, wo.shape[1]), lambda j: (0, 0)),
        scratch_shapes=[pltpu.VMEM((B, w1.shape[1]), jnp.float32),   # h1
                        pltpu.VMEM((B, w3.shape[1]), jnp.float32)],  # fc3 acc
        compiler_params=pltpu.CompilerParams(
            dimension_semantics=("arbitrary",),
            vmem_limit_bytes=32 * 1024 * 1024),
    )(pair, w1, b1, w2, b2, w3, b3, wo, bo)


# -----------------------------------------------------------------------------
# Parameters (deterministic synthetic init) and forward wrapper
# -----------------------------------------------------------------------------
def make_params(key):
    d_r = max(1, DRUG_AFTER // 3)    # WeightNetwork reduction_ratio = 3
    p_r = max(1, PROT_AFTER // 3)

    keys = jax.random.split(key, 40)
    ki = iter(keys)

    def w(shape, scale=0.1, dtype=jnp.float32):
        return (scale * jax.random.normal(next(ki), shape)).astype(dtype)

    return {
        # embeddings; padding_idx=0 -> zero row
        "drug_embed": w((DRUG_VOCAB, DIM)).at[0].set(0.0),
        "protein_embed": w((PROT_VOCAB, DIM)).at[0].set(0.0),
        # Conv1d weights in tap-major layout for tap-wise dots:
        #   PyTorch (C_out, C_in, K) -> transpose(2, 1, 0) = (K, C_in, C_out)
        # Biases (1, C_out) (Conv1d default bias=True).
        "d_conv1_w": w((DRUG_KERNEL[0], DIM, CONV)),           "d_conv1_b": w((1, CONV)),
        "d_conv2_w": w((DRUG_KERNEL[1], CONV, CONV * 2)),      "d_conv2_b": w((1, CONV * 2)),
        "d_conv3_w": w((DRUG_KERNEL[2], CONV * 2, CONV * 4)),  "d_conv3_b": w((1, CONV * 4)),
        "p_conv1_w": w((PROTEIN_KERNEL[0], DIM, CONV)),           "p_conv1_b": w((1, CONV)),
        "p_conv2_w": w((PROTEIN_KERNEL[1], CONV, CONV * 2)),      "p_conv2_b": w((1, CONV * 2)),
        "p_conv3_w": w((PROTEIN_KERNEL[2], CONV * 2, CONV * 4)),  "p_conv3_b": w((1, CONV * 4)),
        # WeightNetwork linears: PyTorch (out, in) layout, bias=False
        "d_wn1": w((d_r, DRUG_AFTER)),  "d_wn2": w((DRUG_AFTER, d_r)),
        "p_wn1": w((p_r, PROT_AFTER)),  "p_wn2": w((PROT_AFTER, p_r)),
        # MLP head: weights (in, out) bf16 (halves weight DMA), biases f32.
        "fc1_w": w((CONV * 8, 1024), dtype=jnp.bfloat16), "fc1_b": w((1, 1024)),
        "fc2_w": w((1024, 1024), dtype=jnp.bfloat16),     "fc2_b": w((1, 1024)),
        "fc3_w": w((1024, 512), dtype=jnp.bfloat16),      "fc3_b": w((1, 512)),
        "out_w": w((512, 2), dtype=jnp.bfloat16),         "out_b": w((1, 2)),
    }


@jax.jit
def eadtn_forward(params, drug_tokens, protein_tokens):
    # Single fused kernel: gathers, both CNN branches, WeightNetworks, pools,
    # concat and feats+re_feats add -> (B, 64) pair.  dropout1: eval identity.
    pair = fused_pair(drug_tokens, protein_tokens, params)
    # dropout2/3: eval-mode identity
    return mlp_head(pair,
                    params["fc1_w"], params["fc1_b"],
                    params["fc2_w"], params["fc2_b"],
                    params["fc3_w"], params["fc3_b"],
                    params["out_w"], params["out_b"])


if __name__ == "__main__":
    B = 2
    key = jax.random.PRNGKey(0)
    pkey, dkey, tkey = jax.random.split(key, 3)
    params = make_params(pkey)

    drug_tokens = jax.random.randint(dkey, (B, DRUG_LEN), 0, DRUG_VOCAB,
                                     dtype=jnp.int32)
    protein_tokens = jax.random.randint(tkey, (B, PROT_LEN), 0, PROT_VOCAB,
                                        dtype=jnp.int32)

    out = eadtn_forward(params, drug_tokens, protein_tokens)
    jax.block_until_ready(out)
    assert out.shape == (B, 2), out.shape
    print("KERNEL_OK")
</pallas_src>

<mosaic_0001>
module attributes {stable_mosaic.version = 11 : i64} {
  func.func @_mlp_kernel(%arg0: i32, %arg1: memref<2x64xf32, #tpu.memory_space<vmem>>, %arg2: memref<64x1024xbf16, #tpu.memory_space<vmem>>, %arg3: memref<1x1024xf32, #tpu.memory_space<vmem>>, %arg4: memref<1024x256xbf16, #tpu.memory_space<vmem>>, %arg5: memref<1x256xf32, #tpu.memory_space<vmem>>, %arg6: memref<256x512xbf16, #tpu.memory_space<vmem>>, %arg7: memref<1x512xf32, #tpu.memory_space<vmem>>, %arg8: memref<512x2xbf16, #tpu.memory_space<vmem>>, %arg9: memref<1x2xf32, #tpu.memory_space<vmem>>, %arg10: memref<2x2xf32, #tpu.memory_space<vmem>>, %arg11: memref<2x1024xf32, #tpu.memory_space<vmem>>, %arg12: memref<2x512xf32, #tpu.memory_space<vmem>>) attributes {dimension_semantics = [#tpu.dimension_semantics<arbitrary>], iteration_bounds = array<i64: 4>, scalar_prefetch = 0 : i64, scratch_operands = 2 : i64, tpu.core_type = #tpu.core_type<tc>, window_params = [{pipeline_mode = #tpu.pipeline_mode<synchronous>, transform_indices = @transform_0, window_bounds = array<i64: 2, 64>}, {pipeline_mode = #tpu.pipeline_mode<synchronous>, transform_indices = @transform_1, window_bounds = array<i64: 64, 1024>}, {pipeline_mode = #tpu.pipeline_mode<synchronous>, transform_indices = @transform_2, window_bounds = array<i64: 1, 1024>}, {transform_indices = @transform_3, window_bounds = array<i64: 1024, 256>}, {transform_indices = @transform_4, window_bounds = array<i64: 1, 256>}, {transform_indices = @transform_5, window_bounds = array<i64: 256, 512>}, {pipeline_mode = #tpu.pipeline_mode<synchronous>, transform_indices = @transform_6, window_bounds = array<i64: 1, 512>}, {pipeline_mode = #tpu.pipeline_mode<synchronous>, transform_indices = @transform_7, window_bounds = array<i64: 512, 2>}, {pipeline_mode = #tpu.pipeline_mode<synchronous>, transform_indices = @transform_8, window_bounds = array<i64: 1, 2>}, {pipeline_mode = #tpu.pipeline_mode<synchronous>, transform_indices = @transform_9, window_bounds = array<i64: 2, 2>}]} {
    %c0_i32 = arith.constant 0 : i32
    %0 = arith.cmpi eq, %arg0, %c0_i32 : i32
    %1 = arith.extui %0 : i1 to i32
    %c0_i32_0 = arith.constant 0 : i32
    %2 = arith.cmpi ne, %1, %c0_i32_0 : i32
    scf.if %2 {
      %c0_16 = arith.constant 0 : index
      %c0_17 = arith.constant 0 : index
      %24 = vector.load %arg1[%c0_16, %c0_17] : memref<2x64xf32, #tpu.memory_space<vmem>>, vector<2x64xf32>
      %25 = arith.truncf %24 : vector<2x64xf32> to vector<2x64xbf16>
      %c0_18 = arith.constant 0 : index
      %c0_19 = arith.constant 0 : index
      %26 = vector.load %arg2[%c0_18, %c0_19] : memref<64x1024xbf16, #tpu.memory_space<vmem>>, vector<64x1024xbf16>
      %cst_20 = arith.constant dense<0.000000e+00> : vector<2x1024xf32>
      %27 = tpu.matmul %25, %26, %cst_20 {dimension_numbers = #tpu.dot_dimension_numbers<[1], [0], [0], [1], [0, 0, 1, 1], [], []>} : vector<2x64xbf16>, vector<64x1024xbf16>, vector<2x1024xf32> -> vector<2x1024xf32>
      %c0_21 = arith.constant 0 : index
      %c0_22 = arith.constant 0 : index
      %28 = vector.load %arg3[%c0_21, %c0_22] : memref<1x1024xf32, #tpu.memory_space<vmem>>, vector<1x1024xf32>
      %29 = vector.broadcast %28 : vector<1x1024xf32> to vector<2x1024xf32>
      %30 = arith.addf %27, %29 : vector<2x1024xf32>
      %cst_23 = arith.constant 0.000000e+00 : f32
      %31 = vector.broadcast %cst_23 : f32 to vector<2x1024xf32>
      %32 = arith.cmpf ogt, %30, %31 : vector<2x1024xf32>
      %cst_24 = arith.constant 0.00999999977 : f32
      %33 = vector.broadcast %cst_24 : f32 to vector<2x1024xf32>
      %34 = arith.mulf %33, %30 : vector<2x1024xf32>
      %35 = arith.select %32, %30, %34 : vector<2x1024xi1>, vector<2x1024xf32>
      %c0_25 = arith.constant 0 : index
      %c0_26 = arith.constant 0 : index
      %36 = vector.load %arg11[%c0_25, %c0_26] : memref<2x1024xf32, #tpu.memory_space<vmem>>, vector<2x1024xf32>
      tpu.vector_store %arg11[%c0_25, %c0_26], %35 {strides = array<i32>} : memref<2x1024xf32, #tpu.memory_space<vmem>>, vector<2x1024xf32>,
      %cst_27 = arith.constant 0.000000e+00 : f32
      %37 = vector.broadcast %cst_27 : f32 to vector<2x512xf32>
      %c0_28 = arith.constant 0 : index
      %c0_29 = arith.constant 0 : index
      %38 = vector.load %arg12[%c0_28, %c0_29] : memref<2x512xf32, #tpu.memory_space<vmem>>, vector<2x512xf32>
      tpu.vector_store %arg12[%c0_28, %c0_29], %37 {strides = array<i32>} : memref<2x512xf32, #tpu.memory_space<vmem>>, vector<2x512xf32>,
    } else {
    }
    %c0 = arith.constant 0 : index
    %c0_1 = arith.constant 0 : index
    %3 = vector.load %arg11[%c0, %c0_1] : memref<2x1024xf32, #tpu.memory_space<vmem>>, vector<2x1024xf32>
    %4 = arith.truncf %3 : vector<2x1024xf32> to vector<2x1024xbf16>
    %c0_2 = arith.constant 0 : index
    %c0_3 = arith.constant 0 : index
    %5 = vector.load %arg4[%c0_2, %c0_3] : memref<1024x256xbf16, #tpu.memory_space<vmem>>, vector<1024x256xbf16>
    %cst = arith.constant dense<0.000000e+00> : vector<2x256xf32>
    %6 = tpu.matmul %4, %5, %cst {dimension_numbers = #tpu.dot_dimension_numbers<[1], [0], [0], [1], [0, 0, 1, 1], [], []>} : vector<2x1024xbf16>, vector<1024x256xbf16>, vector<2x256xf32> -> vector<2x256xf32>
    %c0_4 = arith.constant 0 : index
    %c0_5 = arith.constant 0 : index
    %7 = vector.load %arg5[%c0_4, %c0_5] : memref<1x256xf32, #tpu.memory_space<vmem>>, vector<1x256xf32>
    %8 = vector.broadcast %7 : vector<1x256xf32> to vector<2x256xf32>
    %9 = arith.addf %6, %8 : vector<2x256xf32>
    %cst_6 = arith.constant 0.000000e+00 : f32
    %10 = vector.broadcast %cst_6 : f32 to vector<2x256xf32>
    %11 = arith.cmpf ogt, %9, %10 : vector<2x256xf32>
    %cst_7 = arith.constant 0.00999999977 : f32
    %12 = vector.broadcast %cst_7 : f32 to vector<2x256xf32>
    %13 = arith.mulf %12, %9 : vector<2x256xf32>
    %14 = arith.select %11, %9, %13 : vector<2x256xi1>, vector<2x256xf32>
    %c0_8 = arith.constant 0 : index
    %c0_9 = arith.constant 0 : index
    %15 = vector.load %arg12[%c0_8, %c0_9] : memref<2x512xf32, #tpu.memory_space<vmem>>, vector<2x512xf32>
    %16 = arith.truncf %14 : vector<2x256xf32> to vector<2x256xbf16>
    %c0_10 = arith.constant 0 : index
    %c0_11 = arith.constant 0 : index
    %17 = vector.load %arg6[%c0_10, %c0_11] : memref<256x512xbf16, #tpu.memory_space<vmem>>, vector<256x512xbf16>
    %cst_12 = arith.constant dense<0.000000e+00> : vector<2x512xf32>
    %18 = tpu.matmul %16, %17, %cst_12 {dimension_numbers = #tpu.dot_dimension_numbers<[1], [0], [0], [1], [0, 0, 1, 1], [], []>} : vector<2x256xbf16>, vector<256x512xbf16>, vector<2x512xf32> -> vector<2x512xf32>
    %19 = arith.addf %15, %18 : vector<2x512xf32>
    %c0_13 = arith.constant 0 : index
    %c0_14 = arith.constant 0 : index
    %20 = vector.load %arg12[%c0_13, %c0_14] : memref<2x512xf32, #tpu.memory_space<vmem>>, vector<2x512xf32>
    tpu.vector_store %arg12[%c0_13, %c0_14], %19 {strides = array<i32>} : memref<2x512xf32, #tpu.memory_space<vmem>>, vector<2x512xf32>,
    %c3_i32 = arith.constant 3 : i32
    %21 = arith.cmpi eq, %arg0, %c3_i32 : i32
    %22 = arith.extui %21 : i1 to i32
    %c0_i32_15 = arith.constant 0 : i32
    %23 = arith.cmpi ne, %22, %c0_i32_15 : i32
    scf.if %23 {
      %c0_16 = arith.constant 0 : index
      %c0_17 = arith.constant 0 : index
      %24 = vector.load %arg12[%c0_16, %c0_17] : memref<2x512xf32, #tpu.memory_space<vmem>>, vector<2x512xf32>
      %c0_18 = arith.constant 0 : index
      %c0_19 = arith.constant 0 : index
      %25 = vector.load %arg7[%c0_18, %c0_19] : memref<1x512xf32, #tpu.memory_space<vmem>>, vector<1x512xf32>
      %26 = vector.broadcast %25 : vector<1x512xf32> to vector<2x512xf32>
      %27 = arith.addf %24, %26 : vector<2x512xf32>
      %cst_20 = arith.constant 0.000000e+00 : f32
      %28 = vector.broadcast %cst_20 : f32 to vector<2x512xf32>
      %29 = arith.cmpf ogt, %27, %28 : vector<2x512xf32>
      %cst_21 = arith.constant 0.00999999977 : f32
      %30 = vector.broadcast %cst_21 : f32 to vector<2x512xf32>
      %31 = arith.mulf %30, %27 : vector<2x512xf32>
      %32 = arith.select %29, %27, %31 : vector<2x512xi1>, vector<2x512xf32>
      %33 = arith.truncf %32 : vector<2x512xf32> to vector<2x512xbf16>
      %c0_22 = arith.constant 0 : index
      %c0_23 = arith.constant 0 : index
      %34 = vector.load %arg8[%c0_22, %c0_23] : memref<512x2xbf16, #tpu.memory_space<vmem>>, vector<512x2xbf16>
      %cst_24 = arith.constant dense<0.000000e+00> : vector<2x2xf32>
      %35 = tpu.matmul %33, %34, %cst_24 {dimension_numbers = #tpu.dot_dimension_numbers<[1], [0], [0], [1], [0, 0, 1, 1], [], []>} : vector<2x512xbf16>, vector<512x2xbf16>, vector<2x2xf32> -> vector<2x2xf32>
      %c0_25 = arith.constant 0 : index
      %c0_26 = arith.constant 0 : index
      %36 = vector.load %arg9[%c0_25, %c0_26] : memref<1x2xf32, #tpu.memory_space<vmem>>, vector<1x2xf32>
      %37 = vector.broadcast %36 : vector<1x2xf32> to vector<2x2xf32>
      %38 = arith.addf %35, %37 : vector<2x2xf32>
      %c0_27 = arith.constant 0 : index
      %c0_28 = arith.constant 0 : index
      %39 = vector.load %arg10[%c0_27, %c0_28] : memref<2x2xf32, #tpu.memory_space<vmem>>, vector<2x2xf32>
      tpu.vector_store %arg10[%c0_27, %c0_28], %38 {strides = array<i32>} : memref<2x2xf32, #tpu.memory_space<vmem>>, vector<2x2xf32>,
    } else {
    }
    return
  }
  func.func @transform_0(%arg0: i32) -> (i32, i32) {
    %c0_i32 = arith.constant 0 : i32
    %c0_i32_0 = arith.constant 0 : i32
    %c0_i32_1 = arith.constant 0 : i32
    return %c0_i32, %c0_i32_0 : i32, i32
  }
  func.func @transform_1(%arg0: i32) -> (i32, i32) {
    %c0_i32 = arith.constant 0 : i32
    %c0_i32_0 = arith.constant 0 : i32
    %c0_i32_1 = arith.constant 0 : i32
    return %c0_i32, %c0_i32_0 : i32, i32
  }
  func.func @transform_2(%arg0: i32) -> (i32, i32) {
    %c0_i32 = arith.constant 0 : i32
    %c0_i32_0 = arith.constant 0 : i32
    %c0_i32_1 = arith.constant 0 : i32
    return %c0_i32, %c0_i32_0 : i32, i32
  }
  func.func @transform_3(%arg0: i32) -> (i32, i32) {
    %c0_i32 = arith.constant 0 : i32
    %c0_i32_0 = arith.constant 0 : i32
    return %c0_i32, %arg0 : i32, i32
  }
  func.func @transform_4(%arg0: i32) -> (i32, i32) {
    %c0_i32 = arith.constant 0 : i32
    %c0_i32_0 = arith.constant 0 : i32
    return %c0_i32, %arg0 : i32, i32
  }
  func.func @transform_5(%arg0: i32) -> (i32, i32) {
    %c0_i32 = arith.constant 0 : i32
    %c0_i32_0 = arith.constant 0 : i32
    return %arg0, %c0_i32 : i32, i32
  }
  func.func @transform_6(%arg0: i32) -> (i32, i32) {
    %c0_i32 = arith.constant 0 : i32
    %c0_i32_0 = arith.constant 0 : i32
    %c0_i32_1 = arith.constant 0 : i32
    return %c0_i32, %c0_i32_0 : i32, i32
  }
  func.func @transform_7(%arg0: i32) -> (i32, i32) {
    %c0_i32 = arith.constant 0 : i32
    %c0_i32_0 = arith.constant 0 : i32
    %c0_i32_1 = arith.constant 0 : i32
    return %c0_i32, %c0_i32_0 : i32, i32
  }
  func.func @transform_8(%arg0: i32) -> (i32, i32) {
    %c0_i32 = arith.constant 0 : i32
    %c0_i32_0 = arith.constant 0 : i32
    %c0_i32_1 = arith.constant 0 : i32
    return %c0_i32, %c0_i32_0 : i32, i32
  }
  func.func @transform_9(%arg0: i32) -> (i32, i32) {
    %c0_i32 = arith.constant 0 : i32
    %c0_i32_0 = arith.constant 0 : i32
    %c0_i32_1 = arith.constant 0 : i32
    return %c0_i32, %c0_i32_0 : i32, i32
  }
}

module attributes {stable_mosaic.version = 11 : i64} {
  func.func @_pair_kernel(%arg0: i32, %arg1: memref<1x32x1xi32, #tpu.memory_space<vmem>>, %arg2: memref<1x48x1xi32, #tpu.memory_space<vmem>>, %arg3: memref<65x16xf32, #tpu.memory_space<vmem>>, %arg4: memref<26x16xf32, #tpu.memory_space<vmem>>, %arg5: memref<3x16x8xf32, #tpu.memory_space<vmem>>, %arg6: memref<1x8xf32, #tpu.memory_space<vmem>>, %arg7: memref<3x8x16xf32, #tpu.memory_space<vmem>>, %arg8: memref<1x16xf32, #tpu.memory_space<vmem>>, %arg9: memref<3x16x32xf32, #tpu.memory_space<vmem>>, %arg10: memref<1x32xf32, #tpu.memory_space<vmem>>, %arg11: memref<8x26xf32, #tpu.memory_space<vmem>>, %arg12: memref<26x8xf32, #tpu.memory_space<vmem>>, %arg13: memref<3x16x8xf32, #tpu.memory_space<vmem>>, %arg14: memref<1x8xf32, #tpu.memory_space<vmem>>, %arg15: memref<3x8x16xf32, #tpu.memory_space<vmem>>, %arg16: memref<1x16xf32, #tpu.memory_space<vmem>>, %arg17: memref<3x16x32xf32, #tpu.memory_space<vmem>>, %arg18: memref<1x32xf32, #tpu.memory_space<vmem>>, %arg19: memref<14x42xf32, #tpu.memory_space<vmem>>, %arg20: memref<42x14xf32, #tpu.memory_space<vmem>>, %arg21: memref<1x1x64xf32, #tpu.memory_space<vmem>>) attributes {dimension_semantics = [#tpu.dimension_semantics<parallel>], iteration_bounds = array<i64: 2>, scalar_prefetch = 0 : i64, scratch_operands = 0 : i64, tpu.core_type = #tpu.core_type<tc>, window_params = [{transform_indices = @transform_0, window_bounds = array<i64: 1, 32, 1>}, {transform_indices = @transform_1, window_bounds = array<i64: 1, 48, 1>}, {pipeline_mode = #tpu.pipeline_mode<synchronous>, transform_indices = @transform_2, window_bounds = array<i64: 65, 16>}, {pipeline_mode = #tpu.pipeline_mode<synchronous>, transform_indices = @transform_3, window_bounds = array<i64: 26, 16>}, {pipeline_mode = #tpu.pipeline_mode<synchronous>, transform_indices = @transform_4, window_bounds = array<i64: 3, 16, 8>}, {pipeline_mode = #tpu.pipeline_mode<synchronous>, transform_indices = @transform_5, window_bounds = array<i64: 1, 8>}, {pipeline_mode = #tpu.pipeline_mode<synchronous>, transform_indices = @transform_6, window_bounds = array<i64: 3, 8, 16>}, {pipeline_mode = #tpu.pipeline_mode<synchronous>, transform_indices = @transform_7, window_bounds = array<i64: 1, 16>}, {pipeline_mode = #tpu.pipeline_mode<synchronous>, transform_indices = @transform_8, window_bounds = array<i64: 3, 16, 32>}, {pipeline_mode = #tpu.pipeline_mode<synchronous>, transform_indices = @transform_9, window_bounds = array<i64: 1, 32>}, {pipeline_mode = #tpu.pipeline_mode<synchronous>, transform_indices = @transform_10, window_bounds = array<i64: 8, 26>}, {pipeline_mode = #tpu.pipeline_mode<synchronous>, transform_indices = @transform_11, window_bounds = array<i64: 26, 8>}, {pipeline_mode = #tpu.pipeline_mode<synchronous>, transform_indices = @transform_12, window_bounds = array<i64: 3, 16, 8>}, {pipeline_mode = #tpu.pipeline_mode<synchronous>, transform_indices = @transform_13, window_bounds = array<i64: 1, 8>}, {pipeline_mode = #tpu.pipeline_mode<synchronous>, transform_indices = @transform_14, window_bounds = array<i64: 3, 8, 16>}, {pipeline_mode = #tpu.pipeline_mode<synchronous>, transform_indices = @transform_15, window_bounds = array<i64: 1, 16>}, {pipeline_mode = #tpu.pipeline_mode<synchronous>, transform_indices = @transform_16, window_bounds = array<i64: 3, 16, 32>}, {pipeline_mode = #tpu.pipeline_mode<synchronous>, transform_indices = @transform_17, window_bounds = array<i64: 1, 32>}, {pipeline_mode = #tpu.pipeline_mode<synchronous>, transform_indices = @transform_18, window_bounds = array<i64: 14, 42>}, {pipeline_mode = #tpu.pipeline_mode<synchronous>, transform_indices = @transform_19, window_bounds = array<i64: 42, 14>}, {transform_indices = @transform_20, window_bounds = array<i64: 1, 1, 64>}]} {
    %c0 = arith.constant 0 : index
    %c0_0 = arith.constant 0 : index
    %c0_1 = arith.constant 0 : index
    %0 = vector.load %arg1[%c0, %c0_0, %c0_1] : memref<1x32x1xi32, #tpu.memory_space<vmem>>, vector<1x32x1xi32>
    %1 = vector.shape_cast %0 : vector<1x32x1xi32> to vector<32x1xi32>
    %2 = tpu.iota {dimensions = array<i32: 1>} : vector<32x65xi32>
    %3 = vector.broadcast %1 : vector<32x1xi32> to vector<32x65xi32>
    %4 = arith.cmpi eq, %3, %2 : vector<32x65xi32>
    %5 = arith.extui %4 : vector<32x65xi1> to vector<32x65xi32>
    %6 = arith.sitofp %5 : vector<32x65xi32> to vector<32x65xf32>
    %c0_2 = arith.constant 0 : index
    %c0_3 = arith.constant 0 : index
    %7 = vector.load %arg3[%c0_2, %c0_3] : memref<65x16xf32, #tpu.memory_space<vmem>>, vector<65x16xf32>
    %cst = arith.constant dense<0.000000e+00> : vector<32x16xf32>
    %8 = tpu.matmul %6, %7, %cst {dimension_numbers = #tpu.dot_dimension_numbers<[1], [0], [0], [1], [0, 0, 1, 1], [], []>} : vector<32x65xf32>, vector<65x16xf32>, vector<32x16xf32> -> vector<32x16xf32>
    %9 = vector.extract_strided_slice %8 {offsets = [0, 0], sizes = [30, 16], strides = [1, 1]} : vector<32x16xf32> to vector<30x16xf32>
    %c0_4 = arith.constant 0 : index
    %c0_5 = arith.constant 0 : index
    %c0_6 = arith.constant 0 : index
    %10 = vector.load %arg5[%c0_4, %c0_5, %c0_6] : memref<3x16x8xf32, #tpu.memory_space<vmem>>, vector<1x16x8xf32>
    %11 = vector.shape_cast %10 : vector<1x16x8xf32> to vector<16x8xf32>
    %cst_7 = arith.constant dense<0.000000e+00> : vector<30x8xf32>
    %12 = tpu.matmul %9, %11, %cst_7 {dimension_numbers = #tpu.dot_dimension_numbers<[1], [0], [0], [1], [0, 0, 1, 1], [], []>} : vector<30x16xf32>, vector<16x8xf32>, vector<30x8xf32> -> vector<30x8xf32>
    %13 = vector.extract_strided_slice %8 {offsets = [1, 0], sizes = [30, 16], strides = [1, 1]} : vector<32x16xf32> to vector<30x16xf32>
    %c1 = arith.constant 1 : index
    %c0_8 = arith.constant 0 : index
    %c0_9 = arith.constant 0 : index
    %14 = vector.load %arg5[%c1, %c0_8, %c0_9] : memref<3x16x8xf32, #tpu.memory_space<vmem>>, vector<1x16x8xf32>
    %15 = vector.shape_cast %14 : vector<1x16x8xf32> to vector<16x8xf32>
    %cst_10 = arith.constant dense<0.000000e+00> : vector<30x8xf32>
    %16 = tpu.matmul %13, %15, %cst_10 {dimension_numbers = #tpu.dot_dimension_numbers<[1], [0], [0], [1], [0, 0, 1, 1], [], []>} : vector<30x16xf32>, vector<16x8xf32>, vector<30x8xf32> -> vector<30x8xf32>
    %17 = arith.addf %12, %16 : vector<30x8xf32>
    %18 = vector.extract_strided_slice %8 {offsets = [2, 0], sizes = [30, 16], strides = [1, 1]} : vector<32x16xf32> to vector<30x16xf32>
    %c2 = arith.constant 2 : index
    %c0_11 = arith.constant 0 : index
    %c0_12 = arith.constant 0 : index
    %19 = vector.load %arg5[%c2, %c0_11, %c0_12] : memref<3x16x8xf32, #tpu.memory_space<vmem>>, vector<1x16x8xf32>
    %20 = vector.shape_cast %19 : vector<1x16x8xf32> to vector<16x8xf32>
    %cst_13 = arith.constant dense<0.000000e+00> : vector<30x8xf32>
    %21 = tpu.matmul %18, %20, %cst_13 {dimension_numbers = #tpu.dot_dimension_numbers<[1], [0], [0], [1], [0, 0, 1, 1], [], []>} : vector<30x16xf32>, vector<16x8xf32>, vector<30x8xf32> -> vector<30x8xf32>
    %22 = arith.addf %17, %21 : vector<30x8xf32>
    %c0_14 = arith.constant 0 : index
    %c0_15 = arith.constant 0 : index
    %23 = vector.load %arg6[%c0_14, %c0_15] : memref<1x8xf32, #tpu.memory_space<vmem>>, vector<1x8xf32>
    %24 = vector.broadcast %23 : vector<1x8xf32> to vector<30x8xf32>
    %25 = arith.addf %22, %24 : vector<30x8xf32>
    %cst_16 = arith.constant 0.000000e+00 : f32
    %26 = vector.broadcast %cst_16 : f32 to vector<30x8xf32>
    %27 = arith.maximumf %25, %26 : vector<30x8xf32>
    %28 = vector.extract_strided_slice %27 {offsets = [0, 0], sizes = [28, 8], strides = [1, 1]} : vector<30x8xf32> to vector<28x8xf32>
    %c0_17 = arith.constant 0 : index
    %c0_18 = arith.constant 0 : index
    %c0_19 = arith.constant 0 : index
    %29 = vector.load %arg7[%c0_17, %c0_18, %c0_19] : memref<3x8x16xf32, #tpu.memory_space<vmem>>, vector<1x8x16xf32>
    %30 = vector.shape_cast %29 : vector<1x8x16xf32> to vector<8x16xf32>
    %cst_20 = arith.constant dense<0.000000e+00> : vector<28x16xf32>
    %31 = tpu.matmul %28, %30, %cst_20 {dimension_numbers = #tpu.dot_dimension_numbers<[1], [0], [0], [1], [0, 0, 1, 1], [], []>} : vector<28x8xf32>, vector<8x16xf32>, vector<28x16xf32> -> vector<28x16xf32>
    %32 = vector.extract_strided_slice %27 {offsets = [1, 0], sizes = [28, 8], strides = [1, 1]} : vector<30x8xf32> to vector<28x8xf32>
    %c1_21 = arith.constant 1 : index
    %c0_22 = arith.constant 0 : index
    %c0_23 = arith.constant 0 : index
    %33 = vector.load %arg7[%c1_21, %c0_22, %c0_23] : memref<3x8x16xf32, #tpu.memory_space<vmem>>, vector<1x8x16xf32>
    %34 = vector.shape_cast %33 : vector<1x8x16xf32> to vector<8x16xf32>
    %cst_24 = arith.constant dense<0.000000e+00> : vector<28x16xf32>
    %35 = tpu.matmul %32, %34, %cst_24 {dimension_numbers = #tpu.dot_dimension_numbers<[1], [0], [0], [1], [0, 0, 1, 1], [], []>} : vector<28x8xf32>, vector<8x16xf32>, vector<28x16xf32> -> vector<28x16xf32>
    %36 = arith.addf %31, %35 : vector<28x16xf32>
    %37 = vector.extract_strided_slice %27 {offsets = [2, 0], sizes = [28, 8], strides = [1, 1]} : vector<30x8xf32> to vector<28x8xf32>
    %c2_25 = arith.constant 2 : index
    %c0_26 = arith.constant 0 : index
    %c0_27 = arith.constant 0 : index
    %38 = vector.load %arg7[%c2_25, %c0_26, %c0_27] : memref<3x8x16xf32, #tpu.memory_space<vmem>>, vector<1x8x16xf32>
    %39 = vector.shape_cast %38 : vector<1x8x16xf32> to vector<8x16xf32>
    %cst_28 = arith.constant dense<0.000000e+00> : vector<28x16xf32>
    %40 = tpu.matmul %37, %39, %cst_28 {dimension_numbers = #tpu.dot_dimension_numbers<[1], [0], [0], [1], [0, 0, 1, 1], [], []>} : vector<28x8xf32>, vector<8x16xf32>, vector<28x16xf32> -> vector<28x16xf32>
    %41 = arith.addf %36, %40 : vector<28x16xf32>
    %c0_29 = arith.constant 0 : index
    %c0_30 = arith.constant 0 : index
    %42 = vector.load %arg8[%c0_29, %c0_30] : memref<1x16xf32, #tpu.memory_space<vmem>>, vector<1x16xf32>
    %43 = vector.broadcast %42 : vector<1x16xf32> to vector<28x16xf32>
    %44 = arith.addf %41, %43 : vector<28x16xf32>
    %cst_31 = arith.constant 0.000000e+00 : f32
    %45 = vector.broadcast %cst_31 : f32 to vector<28x16xf32>
    %46 = arith.maximumf %44, %45 : vector<28x16xf32>
    %47 = vector.extract_strided_slice %46 {offsets = [0, 0], sizes = [26, 16], strides = [1, 1]} : vector<28x16xf32> to vector<26x16xf32>
    %c0_32 = arith.constant 0 : index
    %c0_33 = arith.constant 0 : index
    %c0_34 = arith.constant 0 : index
    %48 = vector.load %arg9[%c0_32, %c0_33, %c0_34] : memref<3x16x32xf32, #tpu.memory_space<vmem>>, vector<1x16x32xf32>
    %49 = vector.shape_cast %48 : vector<1x16x32xf32> to vector<16x32xf32>
    %cst_35 = arith.constant dense<0.000000e+00> : vector<26x32xf32>
    %50 = tpu.matmul %47, %49, %cst_35 {dimension_numbers = #tpu.dot_dimension_numbers<[1], [0], [0], [1], [0, 0, 1, 1], [], []>} : vector<26x16xf32>, vector<16x32xf32>, vector<26x32xf32> -> vector<26x32xf32>
    %51 = vector.extract_strided_slice %46 {offsets = [1, 0], sizes = [26, 16], strides = [1, 1]} : vector<28x16xf32> to vector<26x16xf32>
    %c1_36 = arith.constant 1 : index
    %c0_37 = arith.constant 0 : index
    %c0_38 = arith.constant 0 : index
    %52 = vector.load %arg9[%c1_36, %c0_37, %c0_38] : memref<3x16x32xf32, #tpu.memory_space<vmem>>, vector<1x16x32xf32>
    %53 = vector.shape_cast %52 : vector<1x16x32xf32> to vector<16x32xf32>
    %cst_39 = arith.constant dense<0.000000e+00> : vector<26x32xf32>
    %54 = tpu.matmul %51, %53, %cst_39 {dimension_numbers = #tpu.dot_dimension_numbers<[1], [0], [0], [1], [0, 0, 1, 1], [], []>} : vector<26x16xf32>, vector<16x32xf32>, vector<26x32xf32> -> vector<26x32xf32>
    %55 = arith.addf %50, %54 : vector<26x32xf32>
    %56 = vector.extract_strided_slice %46 {offsets = [2, 0], sizes = [26, 16], strides = [1, 1]} : vector<28x16xf32> to vector<26x16xf32>
    %c2_40 = arith.constant 2 : index
    %c0_41 = arith.constant 0 : index
    %c0_42 = arith.constant 0 : index
    %57 = vector.load %arg9[%c2_40, %c0_41, %c0_42] : memref<3x16x32xf32, #tpu.memory_space<vmem>>, vector<1x16x32xf32>
    %58 = vector.shape_cast %57 : vector<1x16x32xf32> to vector<16x32xf32>
    %cst_43 = arith.constant dense<0.000000e+00> : vector<26x32xf32>
    %59 = tpu.matmul %56, %58, %cst_43 {dimension_numbers = #tpu.dot_dimension_numbers<[1], [0], [0], [1], [0, 0, 1, 1], [], []>} : vector<26x16xf32>, vector<16x32xf32>, vector<26x32xf32> -> vector<26x32xf32>
    %60 = arith.addf %55, %59 : vector<26x32xf32>
    %c0_44 = arith.constant 0 : index
    %c0_45 = arith.constant 0 : index
    %61 = vector.load %arg10[%c0_44, %c0_45] : memref<1x32xf32, #tpu.memory_space<vmem>>, vector<1x32xf32>
    %62 = vector.broadcast %61 : vector<1x32xf32> to vector<26x32xf32>
    %63 = arith.addf %60, %62 : vector<26x32xf32>
    %cst_46 = arith.constant 0.000000e+00 : f32
    %64 = vector.broadcast %cst_46 : f32 to vector<26x32xf32>
    %65 = arith.maximumf %63, %64 : vector<26x32xf32>
    %cst_47 = arith.constant dense<0.000000e+00> : vector<26xf32>
    %66 = vector.multi_reduction <add>, %65, %cst_47 [1] : vector<26x32xf32> to vector<26xf32>
    %67 = vector.shape_cast %66 : vector<26xf32> to vector<26x1xf32>
    %cst_48 = arith.constant 3.200000e+01 : f32
    %68 = vector.broadcast %cst_48 : f32 to vector<26x1xf32>
    %69 = arith.divf %67, %68 : vector<26x1xf32>
    %c0_49 = arith.constant 0 : index
    %c0_50 = arith.constant 0 : index
    %70 = vector.load %arg11[%c0_49, %c0_50] : memref<8x26xf32, #tpu.memory_space<vmem>>, vector<8x26xf32>
    %cst_51 = arith.constant dense<0.000000e+00> : vector<8x1xf32>
    %71 = tpu.matmul %70, %69, %cst_51 {dimension_numbers = #tpu.dot_dimension_numbers<[1], [0], [0], [1], [0, 0, 1, 1], [], []>} : vector<8x26xf32>, vector<26x1xf32>, vector<8x1xf32> -> vector<8x1xf32>
    %cst_52 = arith.constant 0.000000e+00 : f32
    %72 = vector.broadcast %cst_52 : f32 to vector<8x1xf32>
    %73 = arith.maximumf %71, %72 : vector<8x1xf32>
    %c0_53 = arith.constant 0 : index
    %c0_54 = arith.constant 0 : index
    %74 = vector.load %arg12[%c0_53, %c0_54] : memref<26x8xf32, #tpu.memory_space<vmem>>, vector<26x8xf32>
    %cst_55 = arith.constant dense<0.000000e+00> : vector<26x1xf32>
    %75 = tpu.matmul %74, %73, %cst_55 {dimension_numbers = #tpu.dot_dimension_numbers<[1], [0], [0], [1], [0, 0, 1, 1], [], []>} : vector<26x8xf32>, vector<8x1xf32>, vector<26x1xf32> -> vector<26x1xf32>
    %cst_56 = arith.constant 0.000000e+00 : f32
    %76 = vector.broadcast %cst_56 : f32 to vector<26x1xf32>
    %77 = arith.maximumf %75, %76 : vector<26x1xf32>
    %cst_57 = arith.constant dense<0xFF800000> : vector<32xf32>
    %78 = vector.multi_reduction <maximumf>, %65, %cst_57 [0] : vector<26x32xf32> to vector<32xf32>
    %79 = vector.shape_cast %78 : vector<32xf32> to vector<1x32xf32>
    %80 = vector.broadcast %77 : vector<26x1xf32> to vector<26x32xf32>
    %81 = arith.mulf %65, %80 : vector<26x32xf32>
    %cst_58 = arith.constant dense<0xFF800000> : vector<32xf32>
    %82 = vector.multi_reduction <maximumf>, %81, %cst_58 [0] : vector<26x32xf32> to vector<32xf32>
    %83 = vector.shape_cast %82 : vector<32xf32> to vector<1x32xf32>
    %84 = arith.addf %79, %83 : vector<1x32xf32>
    %c0_59 = arith.constant 0 : index
    %c0_60 = arith.constant 0 : index
    %c0_61 = arith.constant 0 : index
    %85 = vector.load %arg2[%c0_59, %c0_60, %c0_61] : memref<1x48x1xi32, #tpu.memory_space<vmem>>, vector<1x48x1xi32>
    %86 = vector.shape_cast %85 : vector<1x48x1xi32> to vector<48x1xi32>
    %87 = tpu.iota {dimensions = array<i32: 1>} : vector<48x26xi32>
    %88 = vector.broadcast %86 : vector<48x1xi32> to vector<48x26xi32>
    %89 = arith.cmpi eq, %88, %87 : vector<48x26xi32>
    %90 = arith.extui %89 : vector<48x26xi1> to vector<48x26xi32>
    %91 = arith.sitofp %90 : vector<48x26xi32> to vector<48x26xf32>
    %c0_62 = arith.constant 0 : index
    %c0_63 = arith.constant 0 : index
    %92 = vector.load %arg4[%c0_62, %c0_63] : memref<26x16xf32, #tpu.memory_space<vmem>>, vector<26x16xf32>
    %cst_64 = arith.constant dense<0.000000e+00> : vector<48x16xf32>
    %93 = tpu.matmul %91, %92, %cst_64 {dimension_numbers = #tpu.dot_dimension_numbers<[1], [0], [0], [1], [0, 0, 1, 1], [], []>} : vector<48x26xf32>, vector<26x16xf32>, vector<48x16xf32> -> vector<48x16xf32>
    %94 = vector.extract_strided_slice %93 {offsets = [0, 0], sizes = [46, 16], strides = [1, 1]} : vector<48x16xf32> to vector<46x16xf32>
    %c0_65 = arith.constant 0 : index
    %c0_66 = arith.constant 0 : index
    %c0_67 = arith.constant 0 : index
    %95 = vector.load %arg13[%c0_65, %c0_66, %c0_67] : memref<3x16x8xf32, #tpu.memory_space<vmem>>, vector<1x16x8xf32>
    %96 = vector.shape_cast %95 : vector<1x16x8xf32> to vector<16x8xf32>
    %cst_68 = arith.constant dense<0.000000e+00> : vector<46x8xf32>
    %97 = tpu.matmul %94, %96, %cst_68 {dimension_numbers = #tpu.dot_dimension_numbers<[1], [0], [0], [1], [0, 0, 1, 1], [], []>} : vector<46x16xf32>, vector<16x8xf32>, vector<46x8xf32> -> vector<46x8xf32>
    %98 = vector.extract_strided_slice %93 {offsets = [1, 0], sizes = [46, 16], strides = [1, 1]} : vector<48x16xf32> to vector<46x16xf32>
    %c1_69 = arith.constant 1 : index
    %c0_70 = arith.constant 0 : index
    %c0_71 = arith.constant 0 : index
    %99 = vector.load %arg13[%c1_69, %c0_70, %c0_71] : memref<3x16x8xf32, #tpu.memory_space<vmem>>, vector<1x16x8xf32>
    %100 = vector.shape_cast %99 : vector<1x16x8xf32> to vector<16x8xf32>
    %cst_72 = arith.constant dense<0.000000e+00> : vector<46x8xf32>
    %101 = tpu.matmul %98, %100, %cst_72 {dimension_numbers = #tpu.dot_dimension_numbers<[1], [0], [0], [1], [0, 0, 1, 1], [], []>} : vector<46x16xf32>, vector<16x8xf32>, vector<46x8xf32> -> vector<46x8xf32>
    %102 = arith.addf %97, %101 : vector<46x8xf32>
    %103 = vector.extract_strided_slice %93 {offsets = [2, 0], sizes = [46, 16], strides = [1, 1]} : vector<48x16xf32> to vector<46x16xf32>
    %c2_73 = arith.constant 2 : index
    %c0_74 = arith.constant 0 : index
    %c0_75 = arith.constant 0 : index
    %104 = vector.load %arg13[%c2_73, %c0_74, %c0_75] : memref<3x16x8xf32, #tpu.memory_space<vmem>>, vector<1x16x8xf32>
    %105 = vector.shape_cast %104 : vector<1x16x8xf32> to vector<16x8xf32>
    %cst_76 = arith.constant dense<0.000000e+00> : vector<46x8xf32>
    %106 = tpu.matmul %103, %105, %cst_76 {dimension_numbers = #tpu.dot_dimension_numbers<[1], [0], [0], [1], [0, 0, 1, 1], [], []>} : vector<46x16xf32>, vector<16x8xf32>, vector<46x8xf32> -> vector<46x8xf32>
    %107 = arith.addf %102, %106 : vector<46x8xf32>
    %c0_77 = arith.constant 0 : index
    %c0_78 = arith.constant 0 : index
    %108 = vector.load %arg14[%c0_77, %c0_78] : memref<1x8xf32, #tpu.memory_space<vmem>>, vector<1x8xf32>
    %109 = vector.broadcast %108 : vector<1x8xf32> to vector<46x8xf32>
    %110 = arith.addf %107, %109 : vector<46x8xf32>
    %cst_79 = arith.constant 0.000000e+00 : f32
    %111 = vector.broadcast %cst_79 : f32 to vector<46x8xf32>
    %112 = arith.maximumf %110, %111 : vector<46x8xf32>
    %113 = vector.extract_strided_slice %112 {offsets = [0, 0], sizes = [44, 8], strides = [1, 1]} : vector<46x8xf32> to vector<44x8xf32>
    %c0_80 = arith.constant 0 : index
    %c0_81 = arith.constant 0 : index
    %c0_82 = arith.constant 0 : index
    %114 = vector.load %arg15[%c0_80, %c0_81, %c0_82] : memref<3x8x16xf32, #tpu.memory_space<vmem>>, vector<1x8x16xf32>
    %115 = vector.shape_cast %114 : vector<1x8x16xf32> to vector<8x16xf32>
    %cst_83 = arith.constant dense<0.000000e+00> : vector<44x16xf32>
    %116 = tpu.matmul %113, %115, %cst_83 {dimension_numbers = #tpu.dot_dimension_numbers<[1], [0], [0], [1], [0, 0, 1, 1], [], []>} : vector<44x8xf32>, vector<8x16xf32>, vector<44x16xf32> -> vector<44x16xf32>
    %117 = vector.extract_strided_slice %112 {offsets = [1, 0], sizes = [44, 8], strides = [1, 1]} : vector<46x8xf32> to vector<44x8xf32>
    %c1_84 = arith.constant 1 : index
    %c0_85 = arith.constant 0 : index
    %c0_86 = arith.constant 0 : index
    %118 = vector.load %arg15[%c1_84, %c0_85, %c0_86] : memref<3x8x16xf32, #tpu.memory_space<vmem>>, vector<1x8x16xf32>
    %119 = vector.shape_cast %118 : vector<1x8x16xf32> to vector<8x16xf32>
    %cst_87 = arith.constant dense<0.000000e+00> : vector<44x16xf32>
    %120 = tpu.matmul %117, %119, %cst_87 {dimension_numbers = #tpu.dot_dimension_numbers<[1], [0], [0], [1], [0, 0, 1, 1], [], []>} : vector<44x8xf32>, vector<8x16xf32>, vector<44x16xf32> -> vector<44x16xf32>
    %121 = arith.addf %116, %120 : vector<44x16xf32>
    %122 = vector.extract_strided_slice %112 {offsets = [2, 0], sizes = [44, 8], strides = [1, 1]} : vector<46x8xf32> to vector<44x8xf32>
    %c2_88 = arith.constant 2 : index
    %c0_89 = arith.constant 0 : index
    %c0_90 = arith.constant 0 : index
    %123 = vector.load %arg15[%c2_88, %c0_89, %c0_90] : memref<3x8x16xf32, #tpu.memory_space<vmem>>, vector<1x8x16xf32>
    %124 = vector.shape_cast %123 : vector<1x8x16xf32> to vector<8x16xf32>
    %cst_91 = arith.constant dense<0.000000e+00> : vector<44x16xf32>
    %125 = tpu.matmul %122, %124, %cst_91 {dimension_numbers = #tpu.dot_dimension_numbers<[1], [0], [0], [1], [0, 0, 1, 1], [], []>} : vector<44x8xf32>, vector<8x16xf32>, vector<44x16xf32> -> vector<44x16xf32>
    %126 = arith.addf %121, %125 : vector<44x16xf32>
    %c0_92 = arith.constant 0 : index
    %c0_93 = arith.constant 0 : index
    %127 = vector.load %arg16[%c0_92, %c0_93] : memref<1x16xf32, #tpu.memory_space<vmem>>, vector<1x16xf32>
    %128 = vector.broadcast %127 : vector<1x16xf32> to vector<44x16xf32>
    %129 = arith.addf %126, %128 : vector<44x16xf32>
    %cst_94 = arith.constant 0.000000e+00 : f32
    %130 = vector.broadcast %cst_94 : f32 to vector<44x16xf32>
    %131 = arith.maximumf %129, %130 : vector<44x16xf32>
    %132 = vector.extract_strided_slice %131 {offsets = [0, 0], sizes = [42, 16], strides = [1, 1]} : vector<44x16xf32> to vector<42x16xf32>
    %c0_95 = arith.constant 0 : index
    %c0_96 = arith.constant 0 : index
    %c0_97 = arith.constant 0 : index
    %133 = vector.load %arg17[%c0_95, %c0_96, %c0_97] : memref<3x16x32xf32, #tpu.memory_space<vmem>>, vector<1x16x32xf32>
    %134 = vector.shape_cast %133 : vector<1x16x32xf32> to vector<16x32xf32>
    %cst_98 = arith.constant dense<0.000000e+00> : vector<42x32xf32>
    %135 = tpu.matmul %132, %134, %cst_98 {dimension_numbers = #tpu.dot_dimension_numbers<[1], [0], [0], [1], [0, 0, 1, 1], [], []>} : vector<42x16xf32>, vector<16x32xf32>, vector<42x32xf32> -> vector<42x32xf32>
    %136 = vector.extract_strided_slice %131 {offsets = [1, 0], sizes = [42, 16], strides = [1, 1]} : vector<44x16xf32> to vector<42x16xf32>
    %c1_99 = arith.constant 1 : index
    %c0_100 = arith.constant 0 : index
    %c0_101 = arith.constant 0 : index
    %137 = vector.load %arg17[%c1_99, %c0_100, %c0_101] : memref<3x16x32xf32, #tpu.memory_space<vmem>>, vector<1x16x32xf32>
    %138 = vector.shape_cast %137 : vector<1x16x32xf32> to vector<16x32xf32>
    %cst_102 = arith.constant dense<0.000000e+00> : vector<42x32xf32>
    %139 = tpu.matmul %136, %138, %cst_102 {dimension_numbers = #tpu.dot_dimension_numbers<[1], [0], [0], [1], [0, 0, 1, 1], [], []>} : vector<42x16xf32>, vector<16x32xf32>, vector<42x32xf32> -> vector<42x32xf32>
    %140 = arith.addf %135, %139 : vector<42x32xf32>
    %141 = vector.extract_strided_slice %131 {offsets = [2, 0], sizes = [42, 16], strides = [1, 1]} : vector<44x16xf32> to vector<42x16xf32>
    %c2_103 = arith.constant 2 : index
    %c0_104 = arith.constant 0 : index
    %c0_105 = arith.constant 0 : index
    %142 = vector.load %arg17[%c2_103, %c0_104, %c0_105] : memref<3x16x32xf32, #tpu.memory_space<vmem>>, vector<1x16x32xf32>
    %143 = vector.shape_cast %142 : vector<1x16x32xf32> to vector<16x32xf32>
    %cst_106 = arith.constant dense<0.000000e+00> : vector<42x32xf32>
    %144 = tpu.matmul %141, %143, %cst_106 {dimension_numbers = #tpu.dot_dimension_numbers<[1], [0], [0], [1], [0, 0, 1, 1], [], []>} : vector<42x16xf32>, vector<16x32xf32>, vector<42x32xf32> -> vector<42x32xf32>
    %145 = arith.addf %140, %144 : vector<42x32xf32>
    %c0_107 = arith.constant 0 : index
    %c0_108 = arith.constant 0 : index
    %146 = vector.load %arg18[%c0_107, %c0_108] : memref<1x32xf32, #tpu.memory_space<vmem>>, vector<1x32xf32>
    %147 = vector.broadcast %146 : vector<1x32xf32> to vector<42x32xf32>
    %148 = arith.addf %145, %147 : vector<42x32xf32>
    %cst_109 = arith.constant 0.000000e+00 : f32
    %149 = vector.broadcast %cst_109 : f32 to vector<42x32xf32>
    %150 = arith.maximumf %148, %149 : vector<42x32xf32>
    %cst_110 = arith.constant dense<0.000000e+00> : vector<42xf32>
    %151 = vector.multi_reduction <add>, %150, %cst_110 [1] : vector<42x32xf32> to vector<42xf32>
    %152 = vector.shape_cast %151 : vector<42xf32> to vector<42x1xf32>
    %cst_111 = arith.constant 3.200000e+01 : f32
    %153 = vector.broadcast %cst_111 : f32 to vector<42x1xf32>
    %154 = arith.divf %152, %153 : vector<42x1xf32>
    %c0_112 = arith.constant 0 : index
    %c0_113 = arith.constant 0 : index
    %155 = vector.load %arg19[%c0_112, %c0_113] : memref<14x42xf32, #tpu.memory_space<vmem>>, vector<14x42xf32>
    %cst_114 = arith.constant dense<0.000000e+00> : vector<14x1xf32>
    %156 = tpu.matmul %155, %154, %cst_114 {dimension_numbers = #tpu.dot_dimension_numbers<[1], [0], [0], [1], [0, 0, 1, 1], [], []>} : vector<14x42xf32>, vector<42x1xf32>, vector<14x1xf32> -> vector<14x1xf32>
    %cst_115 = arith.constant 0.000000e+00 : f32
    %157 = vector.broadcast %cst_115 : f32 to vector<14x1xf32>
    %158 = arith.maximumf %156, %157 : vector<14x1xf32>
    %c0_116 = arith.constant 0 : index
    %c0_117 = arith.constant 0 : index
    %159 = vector.load %arg20[%c0_116, %c0_117] : memref<42x14xf32, #tpu.memory_space<vmem>>, vector<42x14xf32>
    %cst_118 = arith.constant dense<0.000000e+00> : vector<42x1xf32>
    %160 = tpu.matmul %159, %158, %cst_118 {dimension_numbers = #tpu.dot_dimension_numbers<[1], [0], [0], [1], [0, 0, 1, 1], [], []>} : vector<42x14xf32>, vector<14x1xf32>, vector<42x1xf32> -> vector<42x1xf32>
    %cst_119 = arith.constant 0.000000e+00 : f32
    %161 = vector.broadcast %cst_119 : f32 to vector<42x1xf32>
    %162 = arith.maximumf %160, %161 : vector<42x1xf32>
    %cst_120 = arith.constant dense<0xFF800000> : vector<32xf32>
    %163 = vector.multi_reduction <maximumf>, %150, %cst_120 [0] : vector<42x32xf32> to vector<32xf32>
    %164 = vector.shape_cast %163 : vector<32xf32> to vector<1x32xf32>
    %165 = vector.broadcast %162 : vector<42x1xf32> to vector<42x32xf32>
    %166 = arith.mulf %150, %165 : vector<42x32xf32>
    %cst_121 = arith.constant dense<0xFF800000> : vector<32xf32>
    %167 = vector.multi_reduction <maximumf>, %166, %cst_121 [0] : vector<42x32xf32> to vector<32xf32>
    %168 = vector.shape_cast %167 : vector<32xf32> to vector<1x32xf32>
    %169 = arith.addf %164, %168 : vector<1x32xf32>
    %170 = tpu.concatenate %84, %169 in 1 : vector<1x32xf32>, vector<1x32xf32> -> vector<1x64xf32>
    %c0_122 = arith.constant 0 : index
    %c0_123 = arith.constant 0 : index
    %c0_124 = arith.constant 0 : index
    %171 = vector.load %arg21[%c0_122, %c0_123, %c0_124] : memref<1x1x64xf32, #tpu.memory_space<vmem>>, vector<1x1x64xf32>
    %172 = vector.shape_cast %171 : vector<1x1x64xf32> to vector<1x64xf32>
    %173 = vector.shape_cast %170 : vector<1x64xf32> to vector<1x1x64xf32>
    tpu.vector_store %arg21[%c0_122, %c0_123, %c0_124], %173 {strides = array<i32>} : memref<1x1x64xf32, #tpu.memory_space<vmem>>, vector<1x1x64xf32>,
    return
  }
  func.func @transform_0(%arg0: i32) -> (i32, i32, i32) {
    %c0_i32 = arith.constant 0 : i32
    %c0_i32_0 = arith.constant 0 : i32
    %c0_i32_1 = arith.constant 0 : i32
    return %arg0, %c0_i32, %c0_i32_0 : i32, i32, i32
  }
  func.func @transform_1(%arg0: i32) -> (i32, i32, i32) {
    %c0_i32 = arith.constant 0 : i32
    %c0_i32_0 = arith.constant 0 : i32
    %c0_i32_1 = arith.constant 0 : i32
    return %arg0, %c0_i32, %c0_i32_0 : i32, i32, i32
  }
  func.func @transform_2(%arg0: i32) -> (i32, i32) {
    %c0_i32 = arith.constant 0 : i32
    %c0_i32_0 = arith.constant 0 : i32
    %c0_i32_1 = arith.constant 0 : i32
    return %c0_i32, %c0_i32_0 : i32, i32
  }
  func.func @transform_3(%arg0: i32) -> (i32, i32) {
    %c0_i32 = arith.constant 0 : i32
    %c0_i32_0 = arith.constant 0 : i32
    %c0_i32_1 = arith.constant 0 : i32
    return %c0_i32, %c0_i32_0 : i32, i32
  }
  func.func @transform_4(%arg0: i32) -> (i32, i32, i32) {
    %c0_i32 = arith.constant 0 : i32
    %c0_i32_0 = arith.constant 0 : i32
    %c0_i32_1 = arith.constant 0 : i32
    %c0_i32_2 = arith.constant 0 : i32
    return %c0_i32, %c0_i32_0, %c0_i32_1 : i32, i32, i32
  }
  func.func @transform_5(%arg0: i32) -> (i32, i32) {
    %c0_i32 = arith.constant 0 : i32
    %c0_i32_0 = arith.constant 0 : i32
    %c0_i32_1 = arith.constant 0 : i32
    return %c0_i32, %c0_i32_0 : i32, i32
  }
  func.func @transform_6(%arg0: i32) -> (i32, i32, i32) {
    %c0_i32 = arith.constant 0 : i32
    %c0_i32_0 = arith.constant 0 : i32
    %c0_i32_1 = arith.constant 0 : i32
    %c0_i32_2 = arith.constant 0 : i32
    return %c0_i32, %c0_i32_0, %c0_i32_1 : i32, i32, i32
  }
  func.func @transform_7(%arg0: i32) -> (i32, i32) {
    %c0_i32 = arith.constant 0 : i32
    %c0_i32_0 = arith.constant 0 : i32
    %c0_i32_1 = arith.constant 0 : i32
    return %c0_i32, %c0_i32_0 : i32, i32
  }
  func.func @transform_8(%arg0: i32) -> (i32, i32, i32) {
    %c0_i32 = arith.constant 0 : i32
    %c0_i32_0 = arith.constant 0 : i32
    %c0_i32_1 = arith.constant 0 : i32
    %c0_i32_2 = arith.constant 0 : i32
    return %c0_i32, %c0_i32_0, %c0_i32_1 : i32, i32, i32
  }
  func.func @transform_9(%arg0: i32) -> (i32, i32) {
    %c0_i32 = arith.constant 0 : i32
    %c0_i32_0 = arith.constant 0 : i32
    %c0_i32_1 = arith.constant 0 : i32
    return %c0_i32, %c0_i32_0 : i32, i32
  }
  func.func @transform_10(%arg0: i32) -> (i32, i32) {
    %c0_i32 = arith.constant 0 : i32
    %c0_i32_0 = arith.constant 0 : i32
    %c0_i32_1 = arith.constant 0 : i32
    return %c0_i32, %c0_i32_0 : i32, i32
  }
  func.func @transform_11(%arg0: i32) -> (i32, i32) {
    %c0_i32 = arith.constant 0 : i32
    %c0_i32_0 = arith.constant 0 : i32
    %c0_i32_1 = arith.constant 0 : i32
    return %c0_i32, %c0_i32_0 : i32, i32
  }
  func.func @transform_12(%arg0: i32) -> (i32, i32, i32) {
    %c0_i32 = arith.constant 0 : i32
    %c0_i32_0 = arith.constant 0 : i32
    %c0_i32_1 = arith.constant 0 : i32
    %c0_i32_2 = arith.constant 0 : i32
    return %c0_i32, %c0_i32_0, %c0_i32_1 : i32, i32, i32
  }
  func.func @transform_13(%arg0: i32) -> (i32, i32) {
    %c0_i32 = arith.constant 0 : i32
    %c0_i32_0 = arith.constant 0 : i32
    %c0_i32_1 = arith.constant 0 : i32
    return %c0_i32, %c0_i32_0 : i32, i32
  }
  func.func @transform_14(%arg0: i32) -> (i32, i32, i32) {
    %c0_i32 = arith.constant 0 : i32
    %c0_i32_0 = arith.constant 0 : i32
    %c0_i32_1 = arith.constant 0 : i32
    %c0_i32_2 = arith.constant 0 : i32
    return %c0_i32, %c0_i32_0, %c0_i32_1 : i32, i32, i32
  }
  func.func @transform_15(%arg0: i32) -> (i32, i32) {
    %c0_i32 = arith.constant 0 : i32
    %c0_i32_0 = arith.constant 0 : i32
    %c0_i32_1 = arith.constant 0 : i32
    return %c0_i32, %c0_i32_0 : i32, i32
  }
  func.func @transform_16(%arg0: i32) -> (i32, i32, i32) {
    %c0_i32 = arith.constant 0 : i32
    %c0_i32_0 = arith.constant 0 : i32
    %c0_i32_1 = arith.constant 0 : i32
    %c0_i32_2 = arith.constant 0 : i32
    return %c0_i32, %c0_i32_0, %c0_i32_1 : i32, i32, i32
  }
  func.func @transform_17(%arg0: i32) -> (i32, i32) {
    %c0_i32 = arith.constant 0 : i32
    %c0_i32_0 = arith.constant 0 : i32
    %c0_i32_1 = arith.constant 0 : i32
    return %c0_i32, %c0_i32_0 : i32, i32
  }
  func.func @transform_18(%arg0: i32) -> (i32, i32) {
    %c0_i32 = arith.constant 0 : i32
    %c0_i32_0 = arith.constant 0 : i32
    %c0_i32_1 = arith.constant 0 : i32
    return %c0_i32, %c0_i32_0 : i32, i32
  }
  func.func @transform_19(%arg0: i32) -> (i32, i32) {
    %c0_i32 = arith.constant 0 : i32
    %c0_i32_0 = arith.constant 0 : i32
    %c0_i32_1 = arith.constant 0 : i32
    return %c0_i32, %c0_i32_0 : i32, i32
  }
  func.func @transform_20(%arg0: i32) -> (i32, i32, i32) {
    %c0_i32 = arith.constant 0 : i32
    %c0_i32_0 = arith.constant 0 : i32
    %c0_i32_1 = arith.constant 0 : i32
    return %arg0, %c0_i32, %c0_i32_0 : i32, i32, i32
  }
}

</mosaic_0001>

<bundles_post_ra>
// kernel: eadtn_forward.3
= control target key start
LH: loop header
LB: loop body
LE: loop exit
PB: predicated region body
PF: predicated region fallthrough
CT: control target
= control target key end

     0   :  { %s4802_s0 = inlined_call_operand.vmem [shape: f32[2,64], index: 0, kind: input, shape index: {}]   ;;  %s4803_s1 = inlined_call_operand.hbm [shape: bf16[64,1024], index: 1, kind: input, shape index: {}]   ;;  %s4804_s2 = inlined_call_operand.hbm [shape: f32[1,1024], index: 2, kind: input, shape index: {}]   ;;  %s4805_s3 = inlined_call_operand.hbm [shape: bf16[1024,1024], index: 3, kind: input, shape index: {}]   ;;  %s4806_s4 = inlined_call_operand.hbm [shape: f32[1,1024], index: 4, kind: input, shape index: {}]   ;;  %s4807_s5 = inlined_call_operand.hbm [shape: bf16[1024,512], index: 5, kind: input, shape index: {}]   ;;  %s4808_s6 = inlined_call_operand.hbm [shape: f32[1,512], index: 6, kind: input, shape index: {}]   ;;  %s4809_s7 = inlined_call_operand.vmem [shape: bf16[512,2], index: 7, kind: input, shape index: {}]   ;;  %s4810_s8 = inlined_call_operand.hbm [shape: f32[1,2], index: 8, kind: input, shape index: {}]   ;;  %s4811_s9 = inlined_call_operand.hbm [shape: f32[2,2], index: 9, kind: output, shape index: {}]  }
   0x1   :  { %4831 = sst [smem:[#allocation26_spill]] %s4802_s0 }
   0x2   :  { %4832 = sst [smem:[#allocation27_spill]] %s4803_s1 }
   0x3   :  { %4833 = sst [smem:[#allocation28_spill]] %s4805_s3 }
   0x4   :  { %4834 = sst [smem:[#allocation29_spill]] %s4809_s7 }
   0x5   :  { %4835 = sst [smem:[#allocation30_spill]] %s4811_s9 }
   0x6   :  { %14 = vsyncpa [#allocation5], 0 }
   0x7   :  { %15 = vsyncpa [#allocation8], 0 }
   0x8   :  { %16 = vsyncpa [#allocation14], 0 }
   0x9   :  { %17 = vsyncpa [#allocation6], 0  ;;  %s4126_s30 = smov 0   ;;  %s4128_s10 = smov 0  }
   0xa   :  { %s4130_s11 = smov 0   ;;  %s4132_s12 = smov 0  }
   0xb LB: > { %4836 = sst [smem:[#allocation22_spill]] %s4052_s11  ;;  %s4145_s13 = sadd.s32 4294967295, %s4056_s12   ;;  %s4056_s12 = sphi %s4132_s12, %s4874_s12   ;;  %s4052_s11 = sphi %s4130_s11, %s4876_s11   ;;  %s4048_s10 = sphi %s4128_s10, %s4878_s10   ;;  %s4044_s30 = sphi %s4126_s30, %s4877_s30  }
   0xc   : > { %s4148_s14 = sadd.s32 1, %s4056_s12   ;;  %s93_s16 = sadd.s32 1, %s4052_s11 }
   0xd   : > { %4837 = sst [smem:[#allocation23_spill]] %s4148_s14  ;;  %s90_s15 = ssub.s32 %s4056_s12, %s4148_s14 }
   0xe   : > { %p91_p0 = scmp.eq.s32.totalorder %s90_s15, 0  ;;  %p100_p1 = scmp.ne.s32.totalorder %s4052_s11, %s4048_s10 }
   0xf   : > { %p101_p2 = scmp.eq.s32.totalorder %s4056_s12, 0  ;;  %p106_p3 = scmp.ne.s32.totalorder %s4048_s10, %s4044_s30 }
  0x10   : > { %s4158_s17 = scalar_select %p91_p0, %s4052_s11, %s93_s16  }
  0x11   : > { %p4160_p4 = por %p101_p2, %p100_p1  ;;  %p4812_p5 = scmp.eq.s32.totalorder %s4145_s13, 0 }
  0x12   : > { %4838 = sst [smem:[#allocation24_spill]] %s4158_s17  ;;  %p2994_p6 = scmp.ge.s32.totalorder %s4056_s12, 1 }
  0x13   : > { %p253_p7 = scmp.lt.s32.totalorder %s4056_s12, 5  ;;  %p4169_p8 = por %p4812_p5, %p106_p3 }
  0x14   : > { %s4058_s21 = smov [#allocation4]   ;;  %p3398_p13 = scmp.lt.s32.totalorder %s4056_s12, 4 }
  0x15   : > { %s4840_s19 = scalar_select %p4169_p8, 1, 0 }
  0x16   : > { %p4174_p10 = pnand %p2994_p6, %p253_p7  ;;  %s268_s22 = sshll.u32 %s4058_s21, 4  ;;  %s269_s22 = int_to_ptr.vmem [resolvable:$true] %s268_s22 }
  0x17   : > { %4841 = sst [smem:[#allocation25_spill]] %s4840_s19  ;;  %s318_s24 = sand.u32 1, %s4056_s12  }
  0x18   : > { %s4842_s20 = scalar_select %p4174_p10, 1, 0 }
  0x19   : > { %p3371_p11 = pneg %p4174_p10  ;;  %s4189_s25 = sand.u32 1, %s4052_s11  }
  0x1a   : > { %p4193_p0 = pnand %p3398_p13, %p4160_p4  ;;  %s4845_s1 = sld [smem:[#allocation27_spill]] }
  0x1b   : > { %p4182_p12 = pnand %p3371_p11, %p4812_p5 }
  0x1c   : > { %s4844_s26 = scalar_select %p4193_p0, 1, 0 }
  0x1d   : > { %s4843_s23 = scalar_select %p4182_p12, 1, 0 }
  0x1e   : > { %p4205_p2 = pneg %p4182_p12 }
  0x20   : > { %s3774_s29 = scalar_lea.hbm %s4845_s1, 4096 }
  0x21   : > { %p3775_p1 = scmp.ne.s32.totalorder %s4845_s1, %s3774_s29  ;;  %p3781_p6 = scmp.lt.u32.totalorder %s3774_s29, %s4845_s1 }
  0x22   : > { %s4846_s16 = scalar_select %p4205_p2, 1, 0 }
  0x23   : > { %p3777_p3 = pnand %p4205_p2, %p3775_p1 }
  0x25   : > { %p3778_p4 = pneg %p3777_p3 }
  0x27   : > { %p3783_p7 = pnand %p3781_p6, %p3778_p4 }
  0x29   : > { %3786 = shalt.err (!%p3783_p7)
}
  0x2a   : > { %s3787_s27 = scalar_lea.vmem %s269_s22, 4096  ;;  %p3795_p5 = scmp.lt.s32.totalorder %s269_s22, %s269_s22 }
  0x2b   : > { %p3788_p11 = scmp.ne.s32.totalorder %s269_s22, %s3787_s27  ;;  %p3796_p8 = scmp.lt.s32.totalorder %s3787_s27, %s3787_s27 }
  0x2d   : > { %p3790_p13 = pnand %p3788_p11, %p4205_p2  ;;  %p3797_p10 = por %p3796_p8, %p3795_p5 }
  0x2f   : > { %p3791_p9 = pneg %p3790_p13 }
  0x31   : > { %p3798_p0 = pnand %p3797_p10, %p3791_p9 }
  0x33   : > { %3801 = shalt.err (!%p3798_p0)
}
  0x34   : > { %s4059_s28 = smov 512   ;;  %s4060_s30 = smov 32  }
  0x35   : > { %3374 = dma.hbm_to_vmem [thread:$0]  (!%p4182_p12), %s4845_s1, 4096, %s269_s22, [#allocation5], %s4059_s28, %s4059_s28, %s4060_s30  }
  0x36   : > { %s3000_s18 = sshll.u32 %s4189_s25, 10  ;;  %s3285_s21 = sshll.u32 %s4056_s12, 7 }
  0x37   : > { %s4847_s3 = sld [smem:[#allocation28_spill]]  ;;  %s322_s14 = scalar_lea.vmem [#allocation9], %s3000_s18 }
  0x38   : > { %s329_s9 = sshll.u32 %s322_s14, 4  ;;  %s4232_s7 = scalar_lea.sflag [#allocation5], %s318_s24  ;;  %s4230_s9 = int_to_ptr.vmem [resolvable:$true] %s329_s9 }
  0x39   : > { %p4848_p8 = scmp.ne.s32.totalorder %s4844_s26, 0 }
  0x3b   : > { %p4238_p9 = pneg %p4848_p8 }
  0x3d   : > { %s4228_s11 = scalar_lea.hbm %s4847_s3, %s3285_s21  ;;  %s3807_s29 = scalar_lea.hbm %s4847_s3, 65536 }
  0x3e   : > { %s3802_s0 = scalar_lea.hbm %s4228_s11, 16384  ;;  %p3808_p1 = scmp.lt.u32.totalorder %s4228_s11, %s4847_s3 }
  0x3f   : > { %p3803_p5 = scmp.ne.s32.totalorder %s4228_s11, %s3802_s0  ;;  %p3809_p3 = scmp.lt.u32.totalorder %s3807_s29, %s3802_s0 }
  0x40   : > { %s4849_s22 = scalar_select %p4238_p9, 1, 0 }
  0x41   : > { %p3805_p10 = pnand %p4238_p9, %p3803_p5  ;;  %p3810_p4 = por %p3809_p3, %p3808_p1 }
  0x42   : > { %p3811_p6 = scmp.lt.u32.totalorder %s3802_s0, %s4228_s11 }
  0x43   : > { %p3806_p0 = pneg %p3805_p10 }
  0x44   : > { %p3812_p7 = por %p3811_p6, %p3810_p4 }
  0x46   : > { %p3813_p11 = pnand %p3812_p7, %p3806_p0 }
  0x48   : > { %3816 = shalt.err (!%p3813_p11)
}
  0x49   : > { %s3817_s24 = scalar_lea.vmem %s4230_s9, 16384  ;;  %s4061_s18 = smov [#allocation9]  }
  0x4a   : > { %p3818_p13 = scmp.ne.s32.totalorder %s4230_s9, %s3817_s24  ;;  %s3822_s21 = sshll.u32 %s4061_s18, 4  ;;  %s3823_s21 = int_to_ptr.vmem [resolvable:$false] %s3822_s21 }
  0x4b   : > { %s3824_s27 = scalar_lea.vmem %s3823_s21, 32768  ;;  %p3825_p12 = scmp.lt.s32.totalorder %s4230_s9, %s3823_s21 }
  0x4c   : > { %p3820_p5 = pnand %p3818_p13, %p4238_p9  ;;  %p3826_p2 = scmp.lt.s32.totalorder %s3824_s27, %s3817_s24 }
  0x4e   : > { %p3821_p10 = pneg %p3820_p5  ;;  %p3827_p1 = por %p3826_p2, %p3825_p12 }
  0x50   : > { %p3828_p3 = pnand %p3827_p1, %p3821_p10 }
  0x52   : > { %3831 = shalt.err (!%p3828_p3)
}
  0x53   : > { %s4062_s0 = smov 128   ;;  %s4063_s17 = smov 8  }
  0x54   : > { %3387 = dma.hbm_to_vmem [thread:$0]  (!%p4848_p8), %s4228_s11, 16384, %s4230_s9, %s4232_s7, %s4059_s28, %s4062_s0, %s4063_s17  }
  0x55   : > { %s3003_s30 = sshll.u32 %s4189_s25, 1  ;;  %s4064_s29 = smov [#allocation7]  }
  0x56   : > { %s282_s14 = sshll.u32 %s4064_s29, 4  ;;  %s3286_s15 = sshll.u32 %s4056_s12, 5  ;;  %s283_s14 = int_to_ptr.vmem [resolvable:$true] %s282_s14 }
  0x57   : > { %s3832_s21 = scalar_lea.hbm %s4804_s2, 128  ;;  %p4850_p2 = scmp.ne.s32.totalorder %s4846_s16, 0 }
  0x58   : > { %p3833_p12 = scmp.ne.s32.totalorder %s4804_s2, %s3832_s21  ;;  %p3839_p6 = scmp.lt.u32.totalorder %s3832_s21, %s4804_s2 }
  0x5a   : > { %p3835_p0 = pnand %p3833_p12, %p4850_p2 }
  0x5c   : > { %p3836_p4 = pneg %p3835_p0 }
  0x5e   : > { %p3841_p7 = pnand %p3839_p6, %p3836_p4 }
  0x60   : > { %3844 = shalt.err (!%p3841_p7)
}
  0x61   : > { %s3845_s9 = scalar_lea.vmem %s283_s14, 128  ;;  %p3853_p10 = scmp.lt.s32.totalorder %s283_s14, %s283_s14 }
  0x62   : > { %p3846_p11 = scmp.ne.s32.totalorder %s283_s14, %s3845_s9  ;;  %p3854_p1 = scmp.lt.s32.totalorder %s3845_s9, %s3845_s9 }
  0x64   : > { %p3848_p13 = pnand %p3846_p11, %p4850_p2  ;;  %p3855_p3 = por %p3854_p1, %p3853_p10 }
  0x66   : > { %p3849_p5 = pneg %p3848_p13 }
  0x68   : > { %p3856_p8 = pnand %p3855_p3, %p3849_p5 }
  0x6a   : > { %3859 = shalt.err (!%p3856_p8)
}
  0x6b   : > { %p4851_p12 = scmp.ne.s32.totalorder %s4843_s23, 0  ;;  %s4286_s28 = scalar_lea.hbm %s4806_s4, %s3286_s15 }
  0x6c   : > { %s343_s0 = scalar_lea.vmem [#allocation10], %s3003_s30  ;;  %s3860_s29 = scalar_lea.hbm %s4286_s28, 32 }
  0x6d   : > { %3377 = dma.hbm_to_vmem [thread:$0]  (!%p4851_p12), %s4804_s2, 128, %s283_s14, [#allocation8]  }
  0x6e   : > { %s351_s17 = sshll.u32 %s343_s0, 4  ;;  %p3861_p8 = scmp.ne.s32.totalorder %s4286_s28, %s3860_s29  ;;  %s352_s17 = int_to_ptr.vmem [resolvable:$true] %s351_s17 }
  0x6f   : > { %s3865_s14 = scalar_lea.hbm %s4806_s4, 128  ;;  %p3866_p6 = scmp.lt.u32.totalorder %s4286_s28, %s4806_s4 }
  0x70   : > { %p3863_p0 = pnand %p3861_p8, %p4238_p9  ;;  %p3867_p7 = scmp.lt.u32.totalorder %s3865_s14, %s3860_s29 }
  0x71   : > { %p3869_p13 = scmp.lt.u32.totalorder %s3860_s29, %s4286_s28 }
  0x72   : > { %p3864_p4 = pneg %p3863_p0  ;;  %p3868_p11 = por %p3867_p7, %p3866_p6 }
  0x74   : > { %p3870_p5 = por %p3869_p13, %p3868_p11 }
  0x76   : > { %p3871_p10 = pnand %p3870_p5, %p3864_p4 }
  0x78   : > { %3874 = shalt.err (!%p3871_p10)
}
  0x79   : > { %s3875_s30 = scalar_lea.vmem %s352_s17, 32  ;;  %s4065_s15 = smov [#allocation10]  }
  0x7a   : > { %p3876_p1 = scmp.ne.s32.totalorder %s352_s17, %s3875_s30  ;;  %s3880_s9 = sshll.u32 %s4065_s15, 4  ;;  %s3881_s9 = int_to_ptr.vmem [resolvable:$false] %s3880_s9 }
  0x7b   : > { %s3882_s1 = scalar_lea.vmem %s3881_s9, 64  ;;  %p3883_p0 = scmp.lt.s32.totalorder %s352_s17, %s3881_s9 }
  0x7c   : > { %p3878_p3 = pnand %p3876_p1, %p4238_p9  ;;  %p3884_p12 = scmp.lt.s32.totalorder %s3882_s1, %s3875_s30 }
  0x7e   : > { %p3879_p8 = pneg %p3878_p3  ;;  %p3885_p2 = por %p3884_p12, %p3883_p0 }
  0x80   : > { %p3886_p6 = pnand %p3885_p2, %p3879_p8 }
  0x82   : > { %3889 = shalt.err (!%p3886_p6)
}
  0x83   : > { %p4852_p7 = scmp.ne.s32.totalorder %s4844_s26, 0  ;;  %s4066_s11 = smov [#allocation12]  }
  0x84   : > { %s293_s3 = sshll.u32 %s4066_s11, 4  ;;  %s4067_s19 = smov [#allocation13]   ;;  %s294_s3 = int_to_ptr.vmem [resolvable:$true] %s293_s3 }
  0x85   : > { %3390 = dma.hbm_to_vmem [thread:$0]  (!%p4852_p7), %s4286_s28, 32, %s352_s17, %s4232_s7  }
  0x86   : > { %s307_s0 = sshll.u32 %s4067_s19, 4  ;;  %s3890_s18 = scalar_lea.hbm %s4808_s6, 64  ;;  %s308_s0 = int_to_ptr.vmem [resolvable:$true] %s307_s0 }
  0x87   : > { %p3891_p2 = scmp.ne.s32.totalorder %s4808_s6, %s3890_s18  ;;  %p4853_p12 = scmp.ne.s32.totalorder %s4846_s16, 0 }
  0x88   : > { %p3897_p13 = scmp.lt.u32.totalorder %s3890_s18, %s4808_s6 }
  0x89   : > { %p3893_p4 = pnand %p3891_p2, %p4853_p12 }
  0x8b   : > { %p3894_p11 = pneg %p3893_p4 }
  0x8d   : > { %p3899_p5 = pnand %p3897_p13, %p3894_p11 }
  0x8f   : > { %3902 = shalt.err (!%p3899_p5)
}
  0x90   : > { %s3903_s28 = scalar_lea.vmem %s294_s3, 64  ;;  %p3911_p8 = scmp.lt.s32.totalorder %s294_s3, %s294_s3 }
  0x91   : > { %p3904_p10 = scmp.ne.s32.totalorder %s294_s3, %s3903_s28  ;;  %p3912_p0 = scmp.lt.s32.totalorder %s3903_s28, %s3903_s28 }
  0x93   : > { %p3906_p1 = pnand %p3904_p10, %p4853_p12  ;;  %p3913_p6 = por %p3912_p0, %p3911_p8 }
  0x95   : > { %p3907_p3 = pneg %p3906_p1 }
  0x97   : > { %p3914_p7 = pnand %p3913_p6, %p3907_p3 }
  0x99   : > { %3917 = shalt.err (!%p3914_p7)
}
  0x9a   : > { %p4854_p2 = scmp.ne.s32.totalorder %s4843_s23, 0  ;;  %s3006_s9 = sshll.u32 %s4189_s25, 9 }
  0x9b   : > { %s3918_s19 = scalar_lea.hbm %s4810_s8, 16 }
  0x9c   : > { %3380 = dma.hbm_to_vmem [thread:$0]  (!%p4854_p2), %s4808_s6, 64, %s294_s3, [#allocation8]  }
  0x9d   : > { %p3919_p4 = scmp.ne.s32.totalorder %s4810_s8, %s3918_s19  ;;  %p3925_p13 = scmp.lt.u32.totalorder %s3918_s19, %s4810_s8 }
  0x9f   : > { %p3921_p7 = pnand %p3919_p4, %p4853_p12 }
  0xa1   : > { %p3922_p11 = pneg %p3921_p7 }
  0xa3   : > { %p3927_p5 = pnand %p3925_p13, %p3922_p11 }
  0xa5   : > { %3930 = shalt.err (!%p3927_p5)
}
  0xa6   : > { %s3931_s3 = scalar_lea.vmem %s308_s0, 16  ;;  %s3938_s25 = scalar_lea.vmem %s308_s0, 32 }
  0xa7   : > { %p3932_p10 = scmp.ne.s32.totalorder %s308_s0, %s3931_s3  ;;  %p3939_p8 = scmp.lt.s32.totalorder %s308_s0, %s308_s0 }
  0xa8   : > { %p3940_p0 = scmp.lt.s32.totalorder %s3938_s25, %s3931_s3 }
  0xa9   : > { %p3934_p1 = pnand %p3932_p10, %p4853_p12 }
  0xaa   : > { %p3941_p6 = por %p3940_p0, %p3939_p8 }
  0xab   : > { %p3935_p3 = pneg %p3934_p1 }
  0xad   : > { %p3942_p9 = pnand %p3941_p6, %p3935_p3 }
  0xaf   : > { %3945 = shalt.err (!%p3942_p9)
}
  0xb0   : > { %3383 = dma.hbm_to_vmem [thread:$0]  (!%p4854_p2), %s4810_s8, 16, %s308_s0, [#allocation14]  }
  0xb1   : > { %s3288_s30 = sshll.u32 %s4056_s12, 13  ;;  %s362_s15 = scalar_lea.vmem [#allocation11], %s3006_s9 }
  0xb2   : > { %s4347_s16 = scalar_lea.hbm %s4807_s5, %s3288_s30  ;;  %s370_s1 = sshll.u32 %s362_s15, 4  ;;  %s4349_s1 = int_to_ptr.vmem [resolvable:$true] %s370_s1 }
  0xb3   : > { %s3946_s23 = scalar_lea.hbm %s4347_s16, 8192  ;;  %p4855_p12 = scmp.ne.s32.totalorder %s4849_s22, 0 }
  0xb4   : > { %p3947_p9 = scmp.ne.s32.totalorder %s4347_s16, %s3946_s23  ;;  %s3951_s11 = scalar_lea.hbm %s4807_s5, 32768 }
  0xb5   : > { %p3952_p2 = scmp.lt.u32.totalorder %s4347_s16, %s4807_s5  ;;  %p3953_p11 = scmp.lt.u32.totalorder %s3951_s11, %s3946_s23 }
  0xb6   : > { %p3949_p4 = pnand %p3947_p9, %p4855_p12  ;;  %p3955_p5 = scmp.lt.u32.totalorder %s3946_s23, %s4347_s16 }
  0xb7   : > { %p3954_p13 = por %p3953_p11, %p3952_p2 }
  0xb8   : > { %p3950_p7 = pneg %p3949_p4 }
  0xb9   : > { %p3956_p10 = por %p3955_p5, %p3954_p13 }
  0xbb   : > { %p3957_p1 = pnand %p3956_p10, %p3950_p7 }
  0xbd   : > { %3960 = shalt.err (!%p3957_p1)
}
  0xbe   : > { %s3961_s9 = scalar_lea.vmem %s4349_s1, 8192  ;;  %s4068_s24 = smov [#allocation11]  }
  0xbf   : > { %p3962_p3 = scmp.ne.s32.totalorder %s4349_s1, %s3961_s9  ;;  %s3966_s18 = sshll.u32 %s4068_s24, 4  ;;  %s3967_s18 = int_to_ptr.vmem [resolvable:$false] %s3966_s18 }
  0xc0   : > { %s3968_s14 = scalar_lea.vmem %s3967_s18, 16384  ;;  %p3969_p6 = scmp.lt.s32.totalorder %s4349_s1, %s3967_s18 }
  0xc1   : > { %p3964_p8 = pnand %p3962_p3, %p4855_p12  ;;  %p3970_p9 = scmp.lt.s32.totalorder %s3968_s14, %s3961_s9 }
  0xc3   : > { %p3965_p0 = pneg %p3964_p8  ;;  %p3971_p4 = por %p3970_p9, %p3969_p6 }
  0xc5   : > { %p3972_p2 = pnand %p3971_p4, %p3965_p0 }
  0xc7   : > { %3975 = shalt.err (!%p3972_p2)
}
  0xc8   : > { %s4069_s3 = smov 256   ;;  %s4070_s25 = smov 16  }
  0xc9   : > { %p4856_p7 = scmp.ne.s32.totalorder %s4844_s26, 0  ;;  %p4857_p12 = scmp.ne.s32.totalorder %s4842_s20, 0 }
  0xca   : > { %p4858_p11 = scmp.eq.s32.totalorder (!%p4857_p12), %s4145_s13, 0 }
  0xcb   : > { %3393 = dma.hbm_to_vmem [thread:$0]  (!%p4856_p7), %s4347_s16, 8192, %s4349_s1, %s4232_s7, %s4069_s3, %s4069_s3, %s4070_s25  }
  0xcc   : > { %382 = sbr.rel (%p4857_p12) target bundleno = 1465 (0x5b9), region = 56 }
  0xd3   : > { %4019 = dma.done.wait (%p4858_p11), [#allocation5], 4096   ;;  %p4859_p13 = pmov %p4858_p11 }
  0xd4   : > { %p4860_p5 = pmov %p4858_p11 }
  0xd5   : > { %4021 = vsyncadd (%p4859_p13), [#allocation5], 4294963200 }
  0xd6   : > { %4023 = dma.done.wait (%p4860_p5), [#allocation8], 128   ;;  %p4861_p10 = pmov %p4860_p5 }
  0xd7   : > { %s4862_s22 = sld [smem:[#allocation25_spill]]  ;;  %s392_s26 = sand.u32 1, %s4145_s13  }
  0xd8   : > { %4025 = vsyncadd (%p4861_p10), [#allocation8], 4294967168  ;;  %s394_s7 = sand.u32 1, %s4048_s10   ;;  %s393_s20 = scalar_lea.sflag [#allocation5], %s392_s26 }
  0xd9   : > { %s3013_s21 = sshll.u32 %s394_s7, 10 }
  0xda   : > { %s4385_s27 = scalar_lea.vmem [#allocation9], %s3013_s21 }
  0xdd   : > { %p4863_p1 = scmp.ne.s32.totalorder %s4862_s22, 0 }
  0xdf   : > { %4027 = dma.done.wait (%p4863_p1), %s393_s20, 24608  }
  0xe0   : > { %4029 = vsyncadd (%p4863_p1), %s393_s20, 4294942688  ;;  %s3014_s30 = sshll.u32 %s394_s7, 1  ;;  %s3015_s28 = sshll.u32 %s394_s7, 9 }
  0xe1   : > { %s4391_s17 = scalar_lea.vmem [#allocation10], %s3014_s30  ;;  %s4393_s16 = scalar_lea.vmem [#allocation11], %s3015_s28 }
  0xe2   : > { %p4864_p3 = pmov %p4860_p5 }
  0xe4   : > { %4031 = dma.done.wait (%p4864_p3), [#allocation8], 64   ;;  %p4865_p8 = pmov %p4864_p3 }
  0xe5   : > { %p4866_p0 = pmov %p4864_p3 }
  0xe6   : > { %4033 = vsyncadd (%p4865_p8), [#allocation8], 4294967232 }
  0xe7   : > { %4035 = dma.done.wait (%p4866_p0), [#allocation14], 16   ;;  %p4867_p6 = pmov %p4866_p0 }
  0xe8   : > { %p4868_p9 = scmp.ne.s32.totalorder %s4145_s13, 0 }
  0xe9   : > { %4037 = vsyncadd (%p4867_p6), [#allocation14], 4294967280  ;;  %v472_v0 = vld [vmem:[#allocation4] sm:$0xff] (!%p4868_p9)  ;;  %v473_v2 = vld [vmem:[#allocation4 + $0x8] sm:$0xff] (!%p4868_p9)  ;;  %v4071_v8 = vmov (!%p4868_p9), 0   ;;  %s4869_s23 = sld [smem:[#allocation26_spill]] (!%p4868_p9) }
  0xea   : > { %469 = sbr.rel (%p4868_p9) target bundleno = 495 (0x1ef), region = 88  ;;  %v476_v1 = vld [vmem:[#allocation4 + $0x20] sm:$0xff] (!%p4868_p9)  ;;  %v477_v4 = vld [vmem:[#allocation4 + $0x28] sm:$0xff] (!%p4868_p9)  ;;  %742 = vmatprep.mubr.bf16.mxu0 (!%p4868_p9), %v4071_v8  ;;  %783 = vmatprep.mubr.bf16.mxu1 (!%p4868_p9), %v4071_v8  ;;  %v474_v31 = vld [vmem:[#allocation4 + $0x10] sm:$0xff] (!%p4868_p9)  ;;  %vm706_vm0 = vcmask (!%p4868_p9), 523264  }
  0xeb   : > { %v3020_v3 = vcombine.high (!%p4868_p9), %v472_v0, %v476_v1  ;;  %v3019_v5 = vcombine.low (!%p4868_p9), %v472_v0, %v476_v1  ;;  %v480_v6 = vld [vmem:[#allocation4 + $0x40] sm:$0xff] (!%p4868_p9)  ;;  %v3022_v9 = vcombine.high (!%p4868_p9), %v473_v2, %v477_v4  ;;  %v3021_v10 = vcombine.low (!%p4868_p9), %v473_v2, %v477_v4  ;;  %v481_v12 = vld [vmem:[#allocation4 + $0x48] sm:$0xff] (!%p4868_p9)  ;;  %v478_v32 = vld [vmem:[#allocation4 + $0x30] sm:$0xff] (!%p4868_p9) }
  0xec   : > { %v484_v7 = vld [vmem:[#allocation4 + $0x60] sm:$0xff] (!%p4868_p9)  ;;  %v485_v13 = vld [vmem:[#allocation4 + $0x68] sm:$0xff] (!%p4868_p9)  ;;  %v475_v33 = vld [vmem:[#allocation4 + $0x18] sm:$0xff] (!%p4868_p9)  ;;  %v3024_v38 = vcombine.high (!%p4868_p9), %v474_v31, %v478_v32  ;;  %v3023_v45 = vcombine.low (!%p4868_p9), %v474_v31, %v478_v32  ;;  %v506_v4 = vlaneseq (!%p4868_p9) }
  0xed   : > { %v3028_v11 = vcombine.high (!%p4868_p9), %v480_v6, %v484_v7  ;;  %v488_v14 = vld [vmem:[#allocation4 + $0x80] sm:$0xff] (!%p4868_p9)  ;;  %710 = vmatprep.subr.bf16.mxu0 (!%p4868_p9), %v3020_v3  ;;  %v3030_v15 = vcombine.high (!%p4868_p9), %v481_v12, %v485_v13  ;;  %v489_v17 = vld [vmem:[#allocation4 + $0x88] sm:$0xff] (!%p4868_p9)  ;;  %751 = vmatprep.subr.bf16.mxu1 (!%p4868_p9), %v3022_v9  ;;  %v3027_v19 = vcombine.low (!%p4868_p9), %v480_v6, %v484_v7  ;;  %v479_v34 = vld [vmem:[#allocation4 + $0x38] sm:$0xff] (!%p4868_p9)  ;;  %v4072_v3 = vmov (!%p4868_p9), 0.0  }
  0xee   : > { %v492_v16 = vld [vmem:[#allocation4 + $0xa0] sm:$0xff] (!%p4868_p9)  ;;  %v493_v18 = vld [vmem:[#allocation4 + $0xa8] sm:$0xff] (!%p4868_p9)  ;;  %711 = vmatpush1.bf16.msra.mxu0 (!%p4868_p9), %v3019_v5  ;;  %752 = vmatpush1.bf16.msra.mxu1 (!%p4868_p9), %v3021_v10  ;;  %v3029_v20 = vcombine.low (!%p4868_p9), %v481_v12, %v485_v13  ;;  %v3026_v39 = vcombine.high (!%p4868_p9), %v475_v33, %v479_v34  ;;  %v482_v40 = vld [vmem:[#allocation4 + $0x50] sm:$0xff] (!%p4868_p9)  ;;  %v3025_v46 = vcombine.low (!%p4868_p9), %v475_v33, %v479_v34  ;;  %v507_v5 = vshrl.u32 (!%p4868_p9), %v506_v4, 7 }
  0xef   : > { %712 = vmatprep.subr.bf16.mxu0 (!%p4868_p9), %v3028_v11  ;;  %v3036_v21 = vcombine.high (!%p4868_p9), %v488_v14, %v492_v16  ;;  %753 = vmatprep.subr.bf16.mxu1 (!%p4868_p9), %v3030_v15  ;;  %v3038_v22 = vcombine.high (!%p4868_p9), %v489_v17, %v493_v18  ;;  %v496_v23 = vld [vmem:[#allocation4 + $0xc0] sm:$0xff] (!%p4868_p9)  ;;  %v497_v25 = vld [vmem:[#allocation4 + $0xc8] sm:$0xff] (!%p4868_p9)  ;;  %v3035_v27 = vcombine.low (!%p4868_p9), %v488_v14, %v492_v16  ;;  %v486_v41 = vld [vmem:[#allocation4 + $0x70] sm:$0xff] (!%p4868_p9)  ;;  %v4073_v12 = vmov (!%p4868_p9), 1983009808  }
  0xf0   : > { %v500_v24 = vld [vmem:[#allocation4 + $0xe0] sm:$0xff] (!%p4868_p9)  ;;  %v501_v26 = vld [vmem:[#allocation4 + $0xe8] sm:$0xff] (!%p4868_p9)  ;;  %v3037_v28 = vcombine.low (!%p4868_p9), %v489_v17, %v493_v18  ;;  %v483_v43 = vld [vmem:[#allocation4 + $0x58] sm:$0xff] (!%p4868_p9)  ;;  %v3032_v47 = vcombine.high (!%p4868_p9), %v482_v40, %v486_v41  ;;  %v3031_v53 = vcombine.low (!%p4868_p9), %v482_v40, %v486_v41  ;;  %944 = vst [vmem:[#allocation3] sm:$0xff] (!%p4868_p9), %v4072_v3  ;;  %v508_v6 = vsub.s32 (!%p4868_p9), 0, %v507_v5 }
  0xf1   : > { %v3044_v29 = vcombine.high %v496_v23, %v500_v24  ;;  %v3046_v30 = vcombine.high %v497_v25, %v501_v26  ;;  %v3043_v35 = vcombine.low %v496_v23, %v500_v24  ;;  %v470_v36 = vld [vmem:[%s4869_s23] sm:$0x3]  ;;  %v3045_v37 = vcombine.low %v497_v25, %v501_v26  ;;  %v487_v44 = vld [vmem:[#allocation4 + $0x78] sm:$0xff]  ;;  %v490_v49 = vld [vmem:[#allocation4 + $0x90] sm:$0xff] }
  0xf2   : > { %713 = vmatpush1.bf16.msra.mxu0 %v3027_v19  ;;  %754 = vmatpush1.bf16.msra.mxu1 %v3029_v20  ;;  %v471_v42 = vpack.c.bf16 %v470_v36, %v470_v36  ;;  %v3034_v48 = vcombine.high %v483_v43, %v487_v44  ;;  %v494_v50 = vld [vmem:[#allocation4 + $0xb0] sm:$0xff]  ;;  %v491_v51 = vld [vmem:[#allocation4 + $0x98] sm:$0xff]  ;;  %v3033_v54 = vcombine.low %v483_v43, %v487_v44  ;;  %v504_v7 = vld [vmem:[#allocation7] sm:$0xff]  ;;  %v512_v9 = vsub.s32 1, %v507_v5 }
  0xf3   : > { %714 = vmatprep.subr.bf16.mxu0 %v3036_v21  ;;  %755 = vmatprep.subr.bf16.mxu1 %v3038_v22  ;;  %v495_v52 = vld [vmem:[#allocation4 + $0xb8] sm:$0xff]  ;;  %v3040_v55 = vcombine.high %v490_v49, %v494_v50  ;;  %v498_v57 = vld [vmem:[#allocation4 + $0xd0] sm:$0xff]  ;;  %v3039_v61 = vcombine.low %v490_v49, %v494_v50  ;;  %v520_v10 = vsub.s32 3, %v507_v5  ;;  %v509_v11 = vrot.slane %v504_v7, %v508_v6 }
  0xf4   : > { %v3042_v56 = vcombine.high %v491_v51, %v495_v52  ;;  %v502_v58 = vld [vmem:[#allocation4 + $0xf0] sm:$0xff]  ;;  %v499_v59 = vld [vmem:[#allocation4 + $0xd8] sm:$0xff]  ;;  %v3041_v62 = vcombine.low %v491_v51, %v495_v52  ;;  %v909_v13 = vunpack.c.l.s4 %v4073_v12  ;;  %v513_v15 = vrot.slane %v504_v7, %v512_v9 }
  0xf5   : > { %v503_v60 = vld [vmem:[#allocation4 + $0xf8] sm:$0xff]  ;;  %v3048_v63 = vcombine.high %v498_v57, %v502_v58  ;;  %v3047_v1 = vcombine.low %v498_v57, %v502_v58  ;;  %v521_v16 = vrot.slane %v504_v7, %v520_v10  ;;  %v532_v44 = vsub.s32 6, %v507_v5 }
  0xf6   : > { %715 = vmatpush1.bf16.msra.mxu0 %v3035_v27  ;;  %756 = vmatpush1.bf16.msra.mxu1 %v3037_v28  ;;  %v3050_v0 = vcombine.high %v499_v59, %v503_v60  ;;  %v3049_v2 = vcombine.low %v499_v59, %v503_v60  ;;  %v910_v21 = vunpack.c.0.s8 %v909_v13 }
  0xf7   : > { %716 = vmatprep.subr.bf16.mxu0 %v3044_v29  ;;  %757 = vmatprep.subr.bf16.mxu1 %v3046_v30  ;;  %v533_v49 = vrot.slane %v504_v7, %v532_v44 }
  0xf8   : > { %v913_v33 = vsub.s32 %v910_v21, %v507_v5 }
  0xfa   : > { %717 = vmatpush1.bf16.msra.mxu0 %v3043_v35  ;;  %758 = vmatpush1.bf16.msra.mxu1 %v3045_v37 }
  0xfb   : > { %792 = vmatprep.subr.bf16.mxu0 %v3024_v38  ;;  %833 = vmatprep.subr.bf16.mxu1 %v3026_v39 }
  0xfd   : > { %3051 = vmatmul.mubr.msk.bf16.vlgmr.msra.gmra.mrb[0].mxu0 %vm706_vm0, %v471_v42  ;;  %3052 = vmatmul.mubr.msk.bf16.vlgmr.msra.gmra.mrb[0].mxu1 %vm706_vm0, %v471_v42 }
  0xfe   : > { %793 = vmatpush1.bf16.msra.mxu0 %v3023_v45  ;;  %834 = vmatpush1.bf16.msra.mxu1 %v3025_v46  ;;  %v528_v45 = vsub.s32 5, %v507_v5  ;;  %v536_v46 = vsub.s32 7, %v507_v5 }
  0xff   : > { %794 = vmatprep.subr.bf16.mxu0 %v3032_v47  ;;  %835 = vmatprep.subr.bf16.mxu1 %v3034_v48 }
 0x100   : > { %824 = vmatprep.mubr.bf16.mxu0 %v4071_v8  ;;  %865 = vmatprep.mubr.bf16.mxu1 %v4071_v8  ;;  %v516_v8 = vsub.s32 2, %v507_v5  ;;  %v529_v50 = vrot.slane %v504_v7, %v528_v45  ;;  %v537_v51 = vrot.slane %v504_v7, %v536_v46 }
 0x102   : > { %795 = vmatpush1.bf16.msra.mxu0 %v3031_v53  ;;  %836 = vmatpush1.bf16.msra.mxu1 %v3033_v54  ;;  %v517_v14 = vrot.slane %v504_v7, %v516_v8 }
 0x103   : > { %796 = vmatprep.subr.bf16.mxu0 %v3040_v55  ;;  %837 = vmatprep.subr.bf16.mxu1 %v3042_v56 }
 0x106   : > { %797 = vmatpush1.bf16.msra.mxu0 %v3039_v61  ;;  %838 = vmatpush1.bf16.msra.mxu1 %v3041_v62 }
 0x107   : > { %798 = vmatprep.subr.bf16.mxu0 %v3048_v63  ;;  %839 = vmatprep.subr.bf16.mxu1 %v3050_v0 }
 0x10a   : > { %799 = vmatpush1.bf16.msra.mxu0 %v3047_v1  ;;  %840 = vmatpush1.bf16.msra.mxu1 %v3049_v2 }
 0x10d   : > { %3053 = vmatmul.mubr.msk.bf16.vlgmr.msra.gmra.mrb[4].mxu0 %vm706_vm0, %v471_v42  ;;  %3054 = vmatmul.mubr.msk.bf16.vlgmr.msra.gmra.mrb[4].mxu1 %vm706_vm0, %v471_v42  ;;  %v524_v42 = vsub.s32 4, %v507_v5 }
 0x10f   : > { %v525_v48 = vrot.slane %v504_v7, %v524_v42 }
 0x1d0   : > { %v744_v17 = vpop.f32.mrb[0].mxu0  ;;  %v785_v19 = vpop.f32.mrb[0].mxu1 }
 0x1d1   : > { %v745_v18 = vadd.f32 %v744_v17, %v509_v11  ;;  %v746_v20 = vpop.f32.mrb[1].mxu0  ;;  %v786_v22 = vadd.f32 %v785_v19, %v517_v14  ;;  %v787_v24 = vpop.f32.mrb[1].mxu1 }
 0x1d2   : > { %v747_v23 = vadd.f32 %v746_v20, %v513_v15  ;;  %v748_v25 = vpop.f32.mrb[2].mxu0  ;;  %v788_v27 = vadd.f32 %v787_v24, %v521_v16  ;;  %v789_v28 = vpop.f32.mrb[2].mxu1 }
 0x1d3   : > { %vm874_vm1 = vcmp.gt.f32.partialorder %v745_v18, 0.0  ;;  %v882_v26 = vmul.f32 0.01, %v745_v18  ;;  %v749_v29 = vpop.f32.mrb[3].mxu0  ;;  %vm876_vm2 = vcmp.gt.f32.partialorder %v786_v22, 0.0  ;;  %v790_v35 = vpop.f32.mrb[3].mxu1 }
 0x1d4   : > { %v884_v30 = vmul.f32 0.01, %v786_v22  ;;  %vm875_vm3 = vcmp.gt.f32.partialorder %v747_v23, 0.0  ;;  %v883_v31 = vmul.f32 0.01, %v747_v23  ;;  %vm877_vm4 = vcmp.gt.f32.partialorder %v788_v27, 0.0 }
 0x1d5   : > { %v890_v32 = vsel %vm874_vm1, %v745_v18, %v882_v26  ;;  %v885_v34 = vmul.f32 0.01, %v788_v27 }
 0x1d6   : > { %v892_v36 = vsel %vm876_vm2, %v786_v22, %v884_v30  ;;  %v891_v37 = vsel %vm875_vm3, %v747_v23, %v883_v31 }
 0x1d7   : > { %v906_v38 = vcombine.low %v890_v32, %v891_v37  ;;  %v893_v39 = vsel %vm877_vm4, %v788_v27, %v885_v34 }
 0x1d8   : > { %v907_v40 = vcombine.low %v892_v36, %v893_v39 }
 0x1d9   : > { %v914_v41 = vrot.slane %v906_v38, %v913_v33 }
 0x1da   : > { %v921_v43 = vrot.slane %v907_v40, %v913_v33 }
 0x1dc   : > { %v922_v47 = vcombine.low %v914_v41, %v921_v43 }
 0x1de   : > { %942 = vst [vmem:[#allocation2] sm:$0xff] %v922_v47 }
 0x1e0   : > { %v826_v52 = vpop.f32.mrb[4].mxu0  ;;  %v867_v54 = vpop.f32.mrb[4].mxu1 }
 0x1e1   : > { %v827_v53 = vadd.f32 %v826_v52, %v525_v48  ;;  %v828_v55 = vpop.f32.mrb[5].mxu0  ;;  %v868_v56 = vadd.f32 %v867_v54, %v533_v49  ;;  %v869_v58 = vpop.f32.mrb[5].mxu1 }
 0x1e2   : > { %v829_v57 = vadd.f32 %v828_v55, %v529_v50  ;;  %v830_v59 = vpop.f32.mrb[6].mxu0  ;;  %v870_v61 = vadd.f32 %v869_v58, %v537_v51  ;;  %v871_v62 = vpop.f32.mrb[6].mxu1 }
 0x1e3   : > { %vm878_vm5 = vcmp.gt.f32.partialorder %v827_v53, 0.0  ;;  %v886_v60 = vmul.f32 0.01, %v827_v53  ;;  %v831_v63 = vpop.f32.mrb[7].mxu0  ;;  %vm880_vm6 = vcmp.gt.f32.partialorder %v868_v56, 0.0  ;;  %v872_v4 = vpop.f32.mrb[7].mxu1 }
 0x1e4   : > { %v888_v0 = vmul.f32 0.01, %v868_v56  ;;  %vm879_vm7 = vcmp.gt.f32.partialorder %v829_v57, 0.0  ;;  %v887_v1 = vmul.f32 0.01, %v829_v57  ;;  %vm881_vm8 = vcmp.gt.f32.partialorder %v870_v61, 0.0 }
 0x1e5   : > { %v894_v2 = vsel %vm878_vm5, %v827_v53, %v886_v60  ;;  %v889_v3 = vmul.f32 0.01, %v870_v61 }
 0x1e6   : > { %v896_v5 = vsel %vm880_vm6, %v868_v56, %v888_v0  ;;  %v895_v6 = vsel %vm879_vm7, %v829_v57, %v887_v1 }
 0x1e7   : > { %v923_v7 = vcombine.low %v894_v2, %v895_v6  ;;  %v897_v8 = vsel %vm881_vm8, %v870_v61, %v889_v3 }
 0x1e8   : > { %v924_v9 = vcombine.low %v896_v5, %v897_v8 }
 0x1e9   : > { %v931_v10 = vrot.slane %v923_v7, %v913_v33 }
 0x1ea   : > { %v938_v11 = vrot.slane %v924_v9, %v913_v33 }
 0x1ec   : > { %v939_v12 = vcombine.low %v931_v10, %v938_v11 }
 0x1ee   : > { %943 = vst [vmem:[#allocation2 + $0x8] sm:$0xff] %v939_v12 }
 0x1ef PF: > { %v3452_v13 = vld [vmem:[%s4385_s27 + $0x104] ss:$8 sps:$4 sm:$0xff]   ;;  %v3454_v14 = vld [vmem:[%s4385_s27 + $0x100] ss:$8 sps:$4 sm:$0xff]   ;;  %v3455_v15 = vld [vmem:[%s4385_s27 + $0x114] ss:$8 sps:$4 sm:$0xff]   ;;  %v953_v24 = vlaneseq }
 0x1f0   : > { %1820 = vmatprep.subr.bf16.mxu0 %v3452_v13  ;;  %v3457_v16 = vld [vmem:[%s4385_s27 + $0x110] ss:$8 sps:$4 sm:$0xff]   ;;  %v3458_v17 = vld [vmem:[%s4385_s27 + $0x124] ss:$8 sps:$4 sm:$0xff]   ;;  %v3460_v18 = vld [vmem:[%s4385_s27 + $0x120] ss:$8 sps:$4 sm:$0xff]  }
 0x1f1   : > { %1821 = vmatpush1.bf16.msra.mxu0 %v3454_v14  ;;  %v3461_v19 = vld [vmem:[%s4385_s27 + $0x134] ss:$8 sps:$4 sm:$0xff]   ;;  %v3463_v20 = vld [vmem:[%s4385_s27 + $0x130] ss:$8 sps:$4 sm:$0xff]   ;;  %v3464_v21 = vld [vmem:[%s4385_s27 + $0x144] ss:$8 sps:$4 sm:$0xff]  }
 0x1f2   : > { %1822 = vmatprep.subr.bf16.mxu0 %v3455_v15  ;;  %v4074_v22 = vmov 1983009808   ;;  %v3466_v25 = vld [vmem:[%s4385_s27 + $0x140] ss:$8 sps:$4 sm:$0xff]   ;;  %v3467_v26 = vld [vmem:[%s4385_s27 + $0x154] ss:$8 sps:$4 sm:$0xff]  }
 0x1f3   : > { %v951_v23 = vunpack.c.l.s4 %v4074_v22  ;;  %v4427_v28 = vshrl.u32 %v953_v24, 7  ;;  %v3469_v29 = vld [vmem:[%s4385_s27 + $0x150] ss:$8 sps:$4 sm:$0xff]   ;;  %v3470_v30 = vld [vmem:[%s4385_s27 + $0x164] ss:$8 sps:$4 sm:$0xff]   ;;  %p3247_p4 = scmp.ne.s32.totalorder %s4145_s13, 3 }
 0x1f4   : > { %v945_v32 = vld [vmem:[#allocation2] sm:$0xff]  ;;  %v3473_v35 = vld [vmem:[%s4385_s27 + $0x174] ss:$8 sps:$4 sm:$0xff]   ;;  %v3475_v38 = vld [vmem:[%s4385_s27 + $0x170] ss:$8 sps:$4 sm:$0xff]   ;;  %s4870_s11 = sld [smem:[#allocation29_spill]] (!%p3247_p4) }
 0x1f5   : > { %1823 = vmatpush1.bf16.msra.mxu0 %v3457_v16  ;;  %v952_v27 = vunpack.c.0.s8 %v951_v23  ;;  %v949_v33 = vcombine.high %v945_v32, %v945_v32  ;;  %v3472_v34 = vld [vmem:[%s4385_s27 + $0x160] ss:$8 sps:$4 sm:$0xff]   ;;  %v3476_v39 = vld [vmem:[%s4385_s27 + $0x184] ss:$8 sps:$4 sm:$0xff]   ;;  %v3479_v42 = vld [vmem:[%s4385_s27 + $0x194] ss:$8 sps:$4 sm:$0xff]  }
 0x1f6   : > { %1824 = vmatprep.subr.bf16.mxu0 %v3458_v17  ;;  %v3478_v41 = vld [vmem:[%s4385_s27 + $0x180] ss:$8 sps:$4 sm:$0xff]   ;;  %v3481_v43 = vld [vmem:[%s4385_s27 + $0x190] ss:$8 sps:$4 sm:$0xff]   ;;  %v3482_v44 = vld [vmem:[%s4385_s27 + $0x1a4] ss:$8 sps:$4 sm:$0xff]  }
 0x1f7   : > { %v4432_v31 = vsub.s32 %v952_v27, %v4427_v28  ;;  %v3484_v45 = vld [vmem:[%s4385_s27 + $0x1a0] ss:$8 sps:$4 sm:$0xff]   ;;  %v3485_v46 = vld [vmem:[%s4385_s27 + $0x1b4] ss:$8 sps:$4 sm:$0xff]   ;;  %v3546_v47 = vld [vmem:[%s4385_s27 + $0x4] ss:$8 sps:$4 sm:$0xff]  }
 0x1f8   : > { %v3548_v48 = vld [vmem:[%s4385_s27] ss:$8 sps:$4 sm:$0xff]   ;;  %v3487_v49 = vld [vmem:[%s4385_s27 + $0x1b0] ss:$8 sps:$4 sm:$0xff]   ;;  %v3488_v50 = vld [vmem:[%s4385_s27 + $0x1c4] ss:$8 sps:$4 sm:$0xff]   ;;  %1779 = vmatprep.subr.bf16.mxu1 %v3546_v47 }
 0x1f9   : > { %1825 = vmatpush1.bf16.msra.mxu0 %v3460_v18  ;;  %v4437_v36 = vrot.slane %v949_v33, %v4432_v31  ;;  %1780 = vmatpush1.bf16.msra.mxu1 %v3548_v48  ;;  %v3552_v51 = vld [vmem:[%s4385_s27 + $0x14] ss:$8 sps:$4 sm:$0xff]   ;;  %v3554_v52 = vld [vmem:[%s4385_s27 + $0x10] ss:$8 sps:$4 sm:$0xff]   ;;  %v3490_v53 = vld [vmem:[%s4385_s27 + $0x1c0] ss:$8 sps:$4 sm:$0xff]   ;;  %v4467_v63 = vrot.slane %v945_v32, %v4432_v31 }
 0x1fa   : > { %1826 = vmatprep.subr.bf16.mxu0 %v3461_v19  ;;  %1781 = vmatprep.subr.bf16.mxu1 %v3552_v51  ;;  %v3491_v54 = vld [vmem:[%s4385_s27 + $0x1d4] ss:$8 sps:$4 sm:$0xff]   ;;  %v3558_v55 = vld [vmem:[%s4385_s27 + $0x24] ss:$8 sps:$4 sm:$0xff]   ;;  %v3560_v56 = vld [vmem:[%s4385_s27 + $0x20] ss:$8 sps:$4 sm:$0xff]   ;;  %s4871_s19 = smov (!%p3247_p4), %s4870_s11 }
 0x1fb   : > { %v965_v37 = vcombine.high %v4437_v36, %v4437_v36  ;;  %v3564_v57 = vld [vmem:[%s4385_s27 + $0x34] ss:$8 sps:$4 sm:$0xff]   ;;  %v3493_v58 = vld [vmem:[%s4385_s27 + $0x1d0] ss:$8 sps:$4 sm:$0xff]   ;;  %v3494_v59 = vld [vmem:[%s4385_s27 + $0x1e4] ss:$8 sps:$4 sm:$0xff]   ;;  %v964_v3 = vcombine.high %v4467_v63, %v4467_v63  ;;  %v993_v11 = vpack.c.bf16 %v4437_v36, %v4437_v36 }
 0x1fc   : > { %v4462_v60 = vld [vmem:[#allocation2 + $0x8] sm:$0xff]  ;;  %v3566_v61 = vld [vmem:[%s4385_s27 + $0x30] ss:$8 sps:$4 sm:$0xff]   ;;  %v3497_v2 = vld [vmem:[%s4385_s27 + $0x1f4] ss:$8 sps:$4 sm:$0xff]   ;;  %vm2856_vm12 = vcmask (!%p3247_p4), 9216  }
 0x1fd   : > { %1827 = vmatpush1.bf16.msra.mxu0 %v3463_v20  ;;  %v994_v40 = vpack.c.bf16 %v965_v37, %v965_v37  ;;  %1782 = vmatpush1.bf16.msra.mxu1 %v3554_v52  ;;  %v3570_v62 = vld [vmem:[%s4385_s27 + $0x44] ss:$8 sps:$4 sm:$0xff]   ;;  %v3496_v0 = vld [vmem:[%s4385_s27 + $0x1e0] ss:$8 sps:$4 sm:$0xff]   ;;  %v4472_v1 = vrot.slane %v4462_v60, %v4432_v31  ;;  %v3576_v5 = vld [vmem:[%s4385_s27 + $0x54] ss:$8 sps:$4 sm:$0xff]   ;;  %v992_v6 = vpack.c.bf16 %v964_v3, %v964_v3 }
 0x1fe   : > { %1828 = vmatprep.subr.bf16.mxu0 %v3464_v21  ;;  %1783 = vmatprep.subr.bf16.mxu1 %v3558_v55  ;;  %v3572_v4 = vld [vmem:[%s4385_s27 + $0x40] ss:$8 sps:$4 sm:$0xff]   ;;  %v3499_v7 = vld [vmem:[%s4385_s27 + $0x1f0] ss:$8 sps:$4 sm:$0xff]   ;;  %v3503_v9 = vld [vmem:[%s4385_s27 + $0x204] ss:$8 sps:$4 sm:$0xff]  }
 0x1ff   : > { %1852 = vmatprep.mubr.bf16.mxu0 %v994_v40  ;;  %v981_v8 = vcombine.high %v4472_v1, %v4472_v1  ;;  %1811 = vmatprep.mubr.bf16.mxu1 %v992_v6  ;;  %v3578_v10 = vld [vmem:[%s4385_s27 + $0x50] ss:$8 sps:$4 sm:$0xff]   ;;  %v3582_v12 = vld [vmem:[%s4385_s27 + $0x64] ss:$8 sps:$4 sm:$0xff]   ;;  %v3501_v13 = vld [vmem:[%s4385_s27 + $0x200] ss:$8 sps:$4 sm:$0xff]  }
 0x200   : > { %v3506_v15 = vld [vmem:[%s4385_s27 + $0x214] ss:$8 sps:$4 sm:$0xff]   ;;  %v3584_v16 = vld [vmem:[%s4385_s27 + $0x60] ss:$8 sps:$4 sm:$0xff]   ;;  %v3504_v18 = vld [vmem:[%s4385_s27 + $0x210] ss:$8 sps:$4 sm:$0xff]  }
 0x201   : > { %1829 = vmatpush1.bf16.msra.mxu0 %v3466_v25  ;;  %1784 = vmatpush1.bf16.msra.mxu1 %v3560_v56  ;;  %v996_v14 = vpack.c.bf16 %v981_v8, %v981_v8  ;;  %v3588_v17 = vld [vmem:[%s4385_s27 + $0x74] ss:$8 sps:$4 sm:$0xff]   ;;  %v3509_v19 = vld [vmem:[%s4385_s27 + $0x224] ss:$8 sps:$4 sm:$0xff]   ;;  %v3590_v20 = vld [vmem:[%s4385_s27 + $0x70] ss:$8 sps:$4 sm:$0xff]   ;;  %v966_v8 = vcombine.high %v4462_v60, %v4462_v60 }
 0x202   : > { %1830 = vmatprep.subr.bf16.mxu0 %v3467_v26  ;;  %1785 = vmatprep.subr.bf16.mxu1 %v3564_v57  ;;  %v3594_v21 = vld [vmem:[%s4385_s27 + $0x84] ss:$8 sps:$4 sm:$0xff]   ;;  %v3507_v22 = vld [vmem:[%s4385_s27 + $0x220] ss:$8 sps:$4 sm:$0xff]   ;;  %v3512_v23 = vld [vmem:[%s4385_s27 + $0x234] ss:$8 sps:$4 sm:$0xff]  }
 0x203   : > { %v3596_v24 = vld [vmem:[%s4385_s27 + $0x80] ss:$8 sps:$4 sm:$0xff]   ;;  %v3600_v25 = vld [vmem:[%s4385_s27 + $0x94] ss:$8 sps:$4 sm:$0xff]   ;;  %v3510_v26 = vld [vmem:[%s4385_s27 + $0x230] ss:$8 sps:$4 sm:$0xff]  }
 0x204   : > { %v3515_v27 = vld [vmem:[%s4385_s27 + $0x244] ss:$8 sps:$4 sm:$0xff]   ;;  %v3513_v32 = vld [vmem:[%s4385_s27 + $0x240] ss:$8 sps:$4 sm:$0xff]   ;;  %v3518_v33 = vld [vmem:[%s4385_s27 + $0x254] ss:$8 sps:$4 sm:$0xff]  }
 0x205   : > { %1831 = vmatpush1.bf16.msra.mxu0 %v3469_v29  ;;  %1786 = vmatpush1.bf16.msra.mxu1 %v3566_v61  ;;  %v3602_v29 = vld [vmem:[%s4385_s27 + $0x90] ss:$8 sps:$4 sm:$0xff]   ;;  %v3521_v37 = vld [vmem:[%s4385_s27 + $0x264] ss:$8 sps:$4 sm:$0xff]   ;;  %v3519_v40 = vld [vmem:[%s4385_s27 + $0x260] ss:$8 sps:$4 sm:$0xff]  }
 0x206   : > { %1832 = vmatprep.subr.bf16.mxu0 %v3470_v30  ;;  %1787 = vmatprep.subr.bf16.mxu1 %v3570_v62  ;;  %v3606_v30 = vld [vmem:[%s4385_s27 + $0xa4] ss:$8 sps:$4 sm:$0xff]   ;;  %v3516_v36 = vld [vmem:[%s4385_s27 + $0x250] ss:$8 sps:$4 sm:$0xff]   ;;  %v3525_v48 = vld [vmem:[%s4385_s27 + $0x280] ss:$8 sps:$4 sm:$0xff]  }
 0x207   : > { %v3630_v47 = vld [vmem:[%s4385_s27 + $0xe4] ss:$8 sps:$4 sm:$0xff]   ;;  %v3636_v51 = vld [vmem:[%s4385_s27 + $0xf4] ss:$8 sps:$4 sm:$0xff]   ;;  %v3528_v52 = vld [vmem:[%s4385_s27 + $0x290] ss:$8 sps:$4 sm:$0xff]  }
 0x208   : > { %v3638_v55 = vld [vmem:[%s4385_s27 + $0xf0] ss:$8 sps:$4 sm:$0xff]   ;;  %v3536_v57 = vld [vmem:[%s4385_s27 + $0x2b4] ss:$8 sps:$4 sm:$0xff]  }
 0x209   : > { %1833 = vmatpush1.bf16.msra.mxu0 %v3472_v34  ;;  %1788 = vmatpush1.bf16.msra.mxu1 %v3572_v4  ;;  %v3608_v34 = vld [vmem:[%s4385_s27 + $0xa0] ss:$8 sps:$4 sm:$0xff]   ;;  %v3534_v62 = vld [vmem:[%s4385_s27 + $0x2b0] ss:$8 sps:$4 sm:$0xff]   ;;  %v3658_v60 = vld [vmem:[%s4393_s16 + $0x80] ss:$16 sps:$4 sm:$0xff]  }
 0x20a   : > { %1834 = vmatprep.subr.bf16.mxu0 %v3473_v35  ;;  %1789 = vmatprep.subr.bf16.mxu1 %v3576_v5  ;;  %v3612_v35 = vld [vmem:[%s4385_s27 + $0xb4] ss:$8 sps:$4 sm:$0xff]   ;;  %v3648_v56 = vld [vmem:[%s4393_s16 + $0x4] ss:$16 sps:$4 sm:$0xff]  }
 0x20b   : > { %v3651_v61 = vld [vmem:[%s4393_s16 + $0x24] ss:$16 sps:$4 sm:$0xff]   ;;  %v3542_v5 = vld [vmem:[%s4385_s27 + $0x2d4] ss:$8 sps:$4 sm:$0xff]  }
 0x20c   : > { %v3654_v3 = vld [vmem:[%s4393_s16 + $0x44] ss:$16 sps:$4 sm:$0xff]  }
 0x20d   : > { %1835 = vmatpush1.bf16.msra.mxu0 %v3475_v38  ;;  %1790 = vmatpush1.bf16.msra.mxu1 %v3578_v10  ;;  %v3614_v38 = vld [vmem:[%s4385_s27 + $0xb0] ss:$8 sps:$4 sm:$0xff]   ;;  %v3537_v4 = vld [vmem:[%s4385_s27 + $0x2c0] ss:$8 sps:$4 sm:$0xff]   ;;  %v3655_v10 = vld [vmem:[%s4393_s16 + $0x60] ss:$16 sps:$4 sm:$0xff]  }
 0x20e   : > { %1836 = vmatprep.subr.bf16.mxu0 %v3476_v39  ;;  %1791 = vmatprep.subr.bf16.mxu1 %v3582_v12  ;;  %v3618_v39 = vld [vmem:[%s4385_s27 + $0xc4] ss:$8 sps:$4 sm:$0xff]   ;;  %v3657_v6 = vld [vmem:[%s4393_s16 + $0x64] ss:$16 sps:$4 sm:$0xff]  }
 0x20f   : > { %v3543_v12 = vld [vmem:[%s4385_s27 + $0x2e0] ss:$8 sps:$4 sm:$0xff]  }
 0x211   : > { %1837 = vmatpush1.bf16.msra.mxu0 %v3478_v41  ;;  %1792 = vmatpush1.bf16.msra.mxu1 %v3584_v16  ;;  %v3524_v41 = vld [vmem:[%s4385_s27 + $0x274] ss:$8 sps:$4 sm:$0xff]   ;;  %v3549_v16 = vld [vmem:[%s4385_s27 + $0x2f0] ss:$8 sps:$4 sm:$0xff]  }
 0x212   : > { %1838 = vmatprep.subr.bf16.mxu0 %v3479_v42  ;;  %1793 = vmatprep.subr.bf16.mxu1 %v3588_v17  ;;  %v3620_v42 = vld [vmem:[%s4385_s27 + $0xc0] ss:$8 sps:$4 sm:$0xff]  }
 0x215   : > { %1839 = vmatpush1.bf16.msra.mxu0 %v3481_v43  ;;  %1794 = vmatpush1.bf16.msra.mxu1 %v3590_v20  ;;  %v3624_v43 = vld [vmem:[%s4385_s27 + $0xd4] ss:$8 sps:$4 sm:$0xff]   ;;  %v995_v20 = vpack.c.bf16 %v4472_v1, %v4472_v1  ;;  %v3561_v1 = vld [vmem:[%s4385_s27 + $0x310] ss:$8 sps:$4 sm:$0xff]  }
 0x216   : > { %1840 = vmatprep.subr.bf16.mxu0 %v3482_v44  ;;  %1795 = vmatprep.subr.bf16.mxu1 %v3594_v21  ;;  %v3522_v44 = vld [vmem:[%s4385_s27 + $0x270] ss:$8 sps:$4 sm:$0xff]  }
 0x217   : > { %v3666_v21 = vld [vmem:[%s4393_s16 + $0xc4] ss:$16 sps:$4 sm:$0xff]  }
 0x219   : > { %1841 = vmatpush1.bf16.msra.mxu0 %v3484_v45  ;;  %1796 = vmatpush1.bf16.msra.mxu1 %v3596_v24  ;;  %v3527_v45 = vld [vmem:[%s4385_s27 + $0x284] ss:$8 sps:$4 sm:$0xff]   ;;  %v3563_v24 = vld [vmem:[%s4385_s27 + $0x314] ss:$8 sps:$4 sm:$0xff]  }
 0x21a   : > { %1842 = vmatprep.subr.bf16.mxu0 %v3485_v46  ;;  %1797 = vmatprep.subr.bf16.mxu1 %v3600_v25  ;;  %v3626_v46 = vld [vmem:[%s4385_s27 + $0xd0] ss:$8 sps:$4 sm:$0xff]   ;;  %v3664_v25 = vld [vmem:[%s4393_s16 + $0xc0] ss:$16 sps:$4 sm:$0xff]  }
 0x21d   : > { %1843 = vmatpush1.bf16.msra.mxu0 %v3487_v49  ;;  %1798 = vmatpush1.bf16.msra.mxu1 %v3602_v29  ;;  %v3530_v49 = vld [vmem:[%s4385_s27 + $0x294] ss:$8 sps:$4 sm:$0xff]  }
 0x21e   : > { %1844 = vmatprep.subr.bf16.mxu0 %v3488_v50  ;;  %1799 = vmatprep.subr.bf16.mxu1 %v3606_v30  ;;  %v3632_v50 = vld [vmem:[%s4385_s27 + $0xe0] ss:$8 sps:$4 sm:$0xff]   ;;  %v3667_v29 = vld [vmem:[%s4393_s16 + $0xe0] ss:$16 sps:$4 sm:$0xff]  }
 0x21f   : > { %v3672_v30 = vld [vmem:[%s4393_s16 + $0x104] ss:$16 sps:$4 sm:$0xff]  }
 0x221   : > { %1845 = vmatpush1.bf16.msra.mxu0 %v3490_v53  ;;  %1800 = vmatpush1.bf16.msra.mxu1 %v3608_v34  ;;  %v3533_v53 = vld [vmem:[%s4385_s27 + $0x2a4] ss:$8 sps:$4 sm:$0xff]  }
 0x222   : > { %1846 = vmatprep.subr.bf16.mxu0 %v3491_v54  ;;  %1801 = vmatprep.subr.bf16.mxu1 %v3612_v35  ;;  %v3531_v54 = vld [vmem:[%s4385_s27 + $0x2a0] ss:$8 sps:$4 sm:$0xff]   ;;  %v3670_v34 = vld [vmem:[%s4393_s16 + $0x100] ss:$16 sps:$4 sm:$0xff]  }
 0x223   : > { %v3675_v35 = vld [vmem:[%s4393_s16 + $0x124] ss:$16 sps:$4 sm:$0xff]  }
 0x225   : > { %1847 = vmatpush1.bf16.msra.mxu0 %v3493_v58  ;;  %1802 = vmatpush1.bf16.msra.mxu1 %v3614_v38  ;;  %v3646_v58 = vld [vmem:[%s4393_s16] ss:$16 sps:$4 sm:$0xff]  }
 0x226   : > { %1848 = vmatprep.subr.bf16.mxu0 %v3494_v59  ;;  %1803 = vmatprep.subr.bf16.mxu1 %v3618_v39  ;;  %v991_v59 = vpack.c.bf16 %v4467_v63, %v4467_v63  ;;  %v3652_v63 = vld [vmem:[%s4393_s16 + $0x40] ss:$16 sps:$4 sm:$0xff]   ;;  %v3678_v39 = vld [vmem:[%s4393_s16 + $0x144] ss:$16 sps:$4 sm:$0xff]  }
 0x227   : > { %v3673_v38 = vld [vmem:[%s4393_s16 + $0x120] ss:$16 sps:$4 sm:$0xff]  }
 0x229   : > { %1849 = vmatpush1.bf16.msra.mxu0 %v3496_v0  ;;  %1804 = vmatpush1.bf16.msra.mxu1 %v3620_v42  ;;  %v3539_v0 = vld [vmem:[%s4385_s27 + $0x2c4] ss:$8 sps:$4 sm:$0xff]  }
 0x22a   : > { %1850 = vmatprep.subr.bf16.mxu0 %v3497_v2  ;;  %1805 = vmatprep.subr.bf16.mxu1 %v3624_v43  ;;  %v3649_v2 = vld [vmem:[%s4393_s16 + $0x20] ss:$16 sps:$4 sm:$0xff]   ;;  %v3681_v43 = vld [vmem:[%s4393_s16 + $0x164] ss:$16 sps:$4 sm:$0xff]  }
 0x22b   : > { %v3676_v42 = vld [vmem:[%s4393_s16 + $0x140] ss:$16 sps:$4 sm:$0xff]  }
 0x22d   : > { %1851 = vmatpush1.bf16.msra.mxu0 %v3499_v7  ;;  %1806 = vmatpush1.bf16.msra.mxu1 %v3626_v46  ;;  %v3540_v7 = vld [vmem:[%s4385_s27 + $0x2d0] ss:$8 sps:$4 sm:$0xff]   ;;  %v3679_v46 = vld [vmem:[%s4393_s16 + $0x160] ss:$16 sps:$4 sm:$0xff]  }
 0x22e   : > { %1861 = vmatprep.subr.bf16.mxu0 %v3503_v9  ;;  %1807 = vmatprep.subr.bf16.mxu1 %v3630_v47  ;;  %v3545_v9 = vld [vmem:[%s4385_s27 + $0x2e4] ss:$8 sps:$4 sm:$0xff]   ;;  %v3684_v47 = vld [vmem:[%s4393_s16 + $0x184] ss:$16 sps:$4 sm:$0xff]  }
 0x230   : > { %1853 = vmatmul.mubr.bf16.vlgmr.msra.gmra.mrb[0].mxu0 %v993_v11  ;;  %v3660_v11 = vld [vmem:[%s4393_s16 + $0x84] ss:$16 sps:$4 sm:$0xff]  }
 0x231   : > { %1862 = vmatpush1.bf16.msra.mxu0 %v3501_v13  ;;  %1893 = vmatprep.mubr.bf16.mxu0 %v996_v14  ;;  %v4549_v13 = vrot.slane %v966_v8, %v4432_v31  ;;  %v3551_v14 = vld [vmem:[%s4385_s27 + $0x2f4] ss:$8 sps:$4 sm:$0xff]   ;;  %v3687_v8 = vld [vmem:[%s4393_s16 + $0x1a4] ss:$16 sps:$4 sm:$0xff]  }
 0x232   : > { %1863 = vmatprep.subr.bf16.mxu0 %v3506_v15  ;;  %1808 = vmatpush1.bf16.msra.mxu1 %v3632_v50  ;;  %v3663_v15 = vld [vmem:[%s4393_s16 + $0xa4] ss:$16 sps:$4 sm:$0xff]   ;;  %v3682_v50 = vld [vmem:[%s4393_s16 + $0x180] ss:$16 sps:$4 sm:$0xff]  }
 0x233   : > { %1809 = vmatprep.subr.bf16.mxu1 %v3636_v51  ;;  %v982_v17 = vcombine.high %v4549_v13, %v4549_v13  ;;  %v3597_v51 = vld [vmem:[%s4385_s27 + $0x370] ss:$8 sps:$4 sm:$0xff]  }
 0x235   : > { %1864 = vmatpush1.bf16.msra.mxu0 %v3504_v18  ;;  %v3557_v18 = vld [vmem:[%s4385_s27 + $0x304] ss:$8 sps:$4 sm:$0xff]  }
 0x236   : > { %1865 = vmatprep.subr.bf16.mxu0 %v3509_v19  ;;  %1810 = vmatpush1.bf16.msra.mxu1 %v3638_v55  ;;  %v3661_v19 = vld [vmem:[%s4393_s16 + $0xa0] ss:$16 sps:$4 sm:$0xff]   ;;  %v3609_v55 = vld [vmem:[%s4385_s27 + $0x390] ss:$8 sps:$4 sm:$0xff]  }
 0x237   : > { %2336 = vmatprep.subr.bf16.mxu1 %v3648_v56  ;;  %v3617_v56 = vld [vmem:[%s4385_s27 + $0x3a4] ss:$8 sps:$4 sm:$0xff]  }
 0x239   : > { %1866 = vmatpush1.bf16.msra.mxu0 %v3507_v22  ;;  %1812 = vmatmul.mubr.bf16.vlgmr.msra.gmra.mrb[0].mxu1 %v991_v59  ;;  %v3555_v22 = vld [vmem:[%s4385_s27 + $0x300] ss:$8 sps:$4 sm:$0xff]   ;;  %v3621_v59 = vld [vmem:[%s4385_s27 + $0x3b0] ss:$8 sps:$4 sm:$0xff]  }
 0x23a   : > { %1867 = vmatprep.subr.bf16.mxu0 %v3512_v23  ;;  %2337 = vmatpush1.bf16.msra.mxu1 %v3646_v58  ;;  %v998_v23 = vpack.c.bf16 %v982_v17, %v982_v17  ;;  %v3623_v58 = vld [vmem:[%s4385_s27 + $0x3b4] ss:$8 sps:$4 sm:$0xff]   ;;  %v1131_v17 = vsub.s32 0, %v4427_v28 }
 0x23b   : > { %2338 = vmatprep.subr.bf16.mxu1 %v3651_v61  ;;  %v3629_v61 = vld [vmem:[%s4385_s27 + $0x3c4] ss:$8 sps:$4 sm:$0xff]  }
 0x23d   : > { %1868 = vmatpush1.bf16.msra.mxu0 %v3510_v26  ;;  %v3669_v26 = vld [vmem:[%s4393_s16 + $0xe4] ss:$16 sps:$4 sm:$0xff]  }
 0x23e   : > { %1869 = vmatprep.subr.bf16.mxu0 %v3515_v27  ;;  %2339 = vmatpush1.bf16.msra.mxu1 %v3649_v2  ;;  %v3569_v27 = vld [vmem:[%s4385_s27 + $0x324] ss:$8 sps:$4 sm:$0xff]   ;;  %v3633_v2 = vld [vmem:[%s4385_s27 + $0x3d0] ss:$8 sps:$4 sm:$0xff]  }
 0x23f   : > { %2340 = vmatprep.subr.bf16.mxu1 %v3654_v3  ;;  %v3641_v3 = vld [vmem:[%s4385_s27 + $0x3e4] ss:$8 sps:$4 sm:$0xff]  }
 0x241   : > { %1870 = vmatpush1.bf16.msra.mxu0 %v3513_v32  ;;  %v3567_v32 = vld [vmem:[%s4385_s27 + $0x320] ss:$8 sps:$4 sm:$0xff]  }
 0x242   : > { %1871 = vmatprep.subr.bf16.mxu0 %v3518_v33  ;;  %2341 = vmatpush1.bf16.msra.mxu1 %v3652_v63  ;;  %v3575_v33 = vld [vmem:[%s4385_s27 + $0x334] ss:$8 sps:$4 sm:$0xff]   ;;  %v3642_v63 = vld [vmem:[%s4385_s27 + $0x3f0] ss:$8 sps:$4 sm:$0xff]  }
 0x243   : > { %2342 = vmatprep.subr.bf16.mxu1 %v3657_v6  ;;  %v997_v6 = vpack.c.bf16 %v4549_v13, %v4549_v13 }
 0x245   : > { %1872 = vmatpush1.bf16.msra.mxu0 %v3516_v36  ;;  %v3573_v36 = vld [vmem:[%s4385_s27 + $0x330] ss:$8 sps:$4 sm:$0xff]  }
 0x246   : > { %1873 = vmatprep.subr.bf16.mxu0 %v3521_v37  ;;  %2343 = vmatpush1.bf16.msra.mxu1 %v3655_v10  ;;  %v3581_v37 = vld [vmem:[%s4385_s27 + $0x344] ss:$8 sps:$4 sm:$0xff]  }
 0x247   : > { %2344 = vmatprep.subr.bf16.mxu1 %v3660_v11  ;;  %v3688_v10 = vld [vmem:[%s4393_s16 + $0x1c0] ss:$16 sps:$4 sm:$0xff]   ;;  %v3693_v11 = vld [vmem:[%s4393_s16 + $0x1e4] ss:$16 sps:$4 sm:$0xff]  }
 0x249   : > { %1874 = vmatpush1.bf16.msra.mxu0 %v3519_v40  ;;  %v3579_v40 = vld [vmem:[%s4385_s27 + $0x340] ss:$8 sps:$4 sm:$0xff]  }
 0x24a   : > { %1875 = vmatprep.subr.bf16.mxu0 %v3524_v41  ;;  %2345 = vmatpush1.bf16.msra.mxu1 %v3658_v60  ;;  %v3587_v41 = vld [vmem:[%s4385_s27 + $0x354] ss:$8 sps:$4 sm:$0xff]  }
 0x24b   : > { %2346 = vmatprep.subr.bf16.mxu1 %v3663_v15 }
 0x24d   : > { %1876 = vmatpush1.bf16.msra.mxu0 %v3522_v44  ;;  %v3585_v44 = vld [vmem:[%s4385_s27 + $0x350] ss:$8 sps:$4 sm:$0xff]  }
 0x24e   : > { %1877 = vmatprep.subr.bf16.mxu0 %v3527_v45  ;;  %2347 = vmatpush1.bf16.msra.mxu1 %v3661_v19  ;;  %v3593_v45 = vld [vmem:[%s4385_s27 + $0x364] ss:$8 sps:$4 sm:$0xff]   ;;  %v1135_v19 = vsub.s32 1, %v4427_v28 }
 0x24f   : > { %2348 = vmatprep.subr.bf16.mxu1 %v3666_v21 }
 0x251   : > { %1878 = vmatpush1.bf16.msra.mxu0 %v3525_v48  ;;  %v3591_v48 = vld [vmem:[%s4385_s27 + $0x360] ss:$8 sps:$4 sm:$0xff]  }
 0x252   : > { %1879 = vmatprep.subr.bf16.mxu0 %v3530_v49  ;;  %2349 = vmatpush1.bf16.msra.mxu1 %v3664_v25  ;;  %v3599_v49 = vld [vmem:[%s4385_s27 + $0x374] ss:$8 sps:$4 sm:$0xff]  }
 0x253   : > { %2350 = vmatprep.subr.bf16.mxu1 %v3669_v26 }
 0x255   : > { %1880 = vmatpush1.bf16.msra.mxu0 %v3528_v52  ;;  %v3605_v52 = vld [vmem:[%s4385_s27 + $0x384] ss:$8 sps:$4 sm:$0xff]  }
 0x256   : > { %1881 = vmatprep.subr.bf16.mxu0 %v3533_v53  ;;  %2351 = vmatpush1.bf16.msra.mxu1 %v3667_v29  ;;  %v3603_v53 = vld [vmem:[%s4385_s27 + $0x380] ss:$8 sps:$4 sm:$0xff]  }
 0x257   : > { %2352 = vmatprep.subr.bf16.mxu1 %v3672_v30 }
 0x259   : > { %1882 = vmatpush1.bf16.msra.mxu0 %v3531_v54  ;;  %v3611_v54 = vld [vmem:[%s4385_s27 + $0x394] ss:$8 sps:$4 sm:$0xff]  }
 0x25a   : > { %1883 = vmatprep.subr.bf16.mxu0 %v3536_v57  ;;  %2353 = vmatpush1.bf16.msra.mxu1 %v3670_v34  ;;  %v3615_v57 = vld [vmem:[%s4385_s27 + $0x3a0] ss:$8 sps:$4 sm:$0xff]  }
 0x25b   : > { %2354 = vmatprep.subr.bf16.mxu1 %v3675_v35 }
 0x25d   : > { %1884 = vmatpush1.bf16.msra.mxu0 %v3534_v62  ;;  %v3627_v62 = vld [vmem:[%s4385_s27 + $0x3c0] ss:$8 sps:$4 sm:$0xff]  }
 0x25e   : > { %1885 = vmatprep.subr.bf16.mxu0 %v3539_v0  ;;  %2355 = vmatpush1.bf16.msra.mxu1 %v3673_v38  ;;  %v3635_v0 = vld [vmem:[%s4385_s27 + $0x3d4] ss:$8 sps:$4 sm:$0xff]   ;;  %v3699_v38 = vld [vmem:[%s4393_s16 + $0x2c] ss:$16 sps:$4 sm:$0xff]  }
 0x25f   : > { %2356 = vmatprep.subr.bf16.mxu1 %v3678_v39  ;;  %v3697_v39 = vld [vmem:[%s4393_s16 + $0x28] ss:$16 sps:$4 sm:$0xff]  }
 0x261   : > { %1886 = vmatpush1.bf16.msra.mxu0 %v3537_v4  ;;  %v3639_v4 = vld [vmem:[%s4385_s27 + $0x3e0] ss:$8 sps:$4 sm:$0xff]  }
 0x262   : > { %1887 = vmatprep.subr.bf16.mxu0 %v3542_v5  ;;  %2357 = vmatpush1.bf16.msra.mxu1 %v3676_v42  ;;  %v3644_v5 = vld [vmem:[%s4385_s27 + $0x3f4] ss:$8 sps:$4 sm:$0xff]   ;;  %v3705_v42 = vld [vmem:[%s4393_s16 + $0x6c] ss:$16 sps:$4 sm:$0xff]  }
 0x263   : > { %2358 = vmatprep.subr.bf16.mxu1 %v3681_v43  ;;  %v3703_v43 = vld [vmem:[%s4393_s16 + $0x68] ss:$16 sps:$4 sm:$0xff]  }
 0x265   : > { %1888 = vmatpush1.bf16.msra.mxu0 %v3540_v7  ;;  %v3685_v7 = vld [vmem:[%s4393_s16 + $0x1a0] ss:$16 sps:$4 sm:$0xff]  }
 0x266   : > { %1889 = vmatprep.subr.bf16.mxu0 %v3545_v9  ;;  %2359 = vmatpush1.bf16.msra.mxu1 %v3679_v46  ;;  %v3690_v9 = vld [vmem:[%s4393_s16 + $0x1c4] ss:$16 sps:$4 sm:$0xff]   ;;  %v3711_v46 = vld [vmem:[%s4393_s16 + $0xac] ss:$16 sps:$4 sm:$0xff]  }
 0x267   : > { %2360 = vmatprep.subr.bf16.mxu1 %v3684_v47  ;;  %v3709_v47 = vld [vmem:[%s4393_s16 + $0xa8] ss:$16 sps:$4 sm:$0xff]  }
 0x269   : > { %1890 = vmatpush1.bf16.msra.mxu0 %v3543_v12  ;;  %v3691_v12 = vld [vmem:[%s4393_s16 + $0x1e0] ss:$16 sps:$4 sm:$0xff]  }
 0x26a   : > { %1891 = vmatprep.subr.bf16.mxu0 %v3551_v14  ;;  %2361 = vmatpush1.bf16.msra.mxu1 %v3682_v50  ;;  %v3696_v14 = vld [vmem:[%s4393_s16 + $0xc] ss:$16 sps:$4 sm:$0xff]  }
 0x26b   : > { %2362 = vmatprep.subr.bf16.mxu1 %v3687_v8  ;;  %v3717_v50 = vld [vmem:[%s4393_s16 + $0xec] ss:$16 sps:$4 sm:$0xff]  }
 0x26d   : > { %1892 = vmatpush1.bf16.msra.mxu0 %v3549_v16 }
 0x26e   : > { %1902 = vmatprep.subr.bf16.mxu0 %v3557_v18  ;;  %2363 = vmatpush1.bf16.msra.mxu1 %v3685_v7  ;;  %v1127_v18 = vld [vmem:[%s4391_s17] sm:$0x3] }
 0x26f   : > { %2364 = vmatprep.subr.bf16.mxu1 %v3690_v9  ;;  %v1136_v21 = vrot.slane %v1127_v18, %v1135_v19 }
 0x270   : > { %1894 = vmatmul.mubr.bf16.vlgmr.msra.gmra.mrb[0].mxu0 %v995_v20  ;;  %v1132_v20 = vrot.slane %v1127_v18, %v1131_v17  ;;  %v1949_v18 = vld [vmem:[#allocation3] sm:$0xff] }
 0x271   : > { %1903 = vmatpush1.bf16.msra.mxu0 %v3555_v22  ;;  %1934 = vmatprep.mubr.bf16.mxu0 %v998_v23 }
 0x272   : > { %1904 = vmatprep.subr.bf16.mxu0 %v3563_v24  ;;  %2365 = vmatpush1.bf16.msra.mxu1 %v3688_v10 }
 0x273   : > { %2366 = vmatprep.subr.bf16.mxu1 %v3693_v11 }
 0x275   : > { %1905 = vmatpush1.bf16.msra.mxu0 %v3561_v1 }
 0x276   : > { %1906 = vmatprep.subr.bf16.mxu0 %v3569_v27  ;;  %2367 = vmatpush1.bf16.msra.mxu1 %v3691_v12 }
 0x277   : > { %2377 = vmatprep.subr.bf16.mxu1 %v3696_v14 }
 0x279   : > { %1907 = vmatpush1.bf16.msra.mxu0 %v3567_v32 }
 0x27a   : > { %1908 = vmatprep.subr.bf16.mxu0 %v3575_v33 }
 0x27d   : > { %1909 = vmatpush1.bf16.msra.mxu0 %v3573_v36  ;;  %v3694_v36 = vld [vmem:[%s4393_s16 + $0x8] ss:$16 sps:$4 sm:$0xff]  }
 0x27e   : > { %1910 = vmatprep.subr.bf16.mxu0 %v3581_v37 }
 0x281   : > { %1911 = vmatpush1.bf16.msra.mxu0 %v3579_v40  ;;  %v3702_v40 = vld [vmem:[%s4393_s16 + $0x4c] ss:$16 sps:$4 sm:$0xff]  }
 0x282   : > { %1912 = vmatprep.subr.bf16.mxu0 %v3587_v41  ;;  %v3700_v41 = vld [vmem:[%s4393_s16 + $0x48] ss:$16 sps:$4 sm:$0xff]  }
 0x285   : > { %1913 = vmatpush1.bf16.msra.mxu0 %v3585_v44  ;;  %v3708_v44 = vld [vmem:[%s4393_s16 + $0x8c] ss:$16 sps:$4 sm:$0xff]  }
 0x286   : > { %1914 = vmatprep.subr.bf16.mxu0 %v3593_v45  ;;  %v3706_v45 = vld [vmem:[%s4393_s16 + $0x88] ss:$16 sps:$4 sm:$0xff]  }
 0x289   : > { %1915 = vmatpush1.bf16.msra.mxu0 %v3591_v48  ;;  %v3714_v48 = vld [vmem:[%s4393_s16 + $0xcc] ss:$16 sps:$4 sm:$0xff]  }
 0x28a   : > { %1916 = vmatprep.subr.bf16.mxu0 %v3599_v49  ;;  %v3712_v49 = vld [vmem:[%s4393_s16 + $0xc8] ss:$16 sps:$4 sm:$0xff]  }
 0x28d   : > { %1917 = vmatpush1.bf16.msra.mxu0 %v3597_v51  ;;  %v3715_v51 = vld [vmem:[%s4393_s16 + $0xe8] ss:$16 sps:$4 sm:$0xff]  }
 0x28e   : > { %1918 = vmatprep.subr.bf16.mxu0 %v3605_v52  ;;  %v3720_v52 = vld [vmem:[%s4393_s16 + $0x10c] ss:$16 sps:$4 sm:$0xff]  }
 0x291   : > { %1919 = vmatpush1.bf16.msra.mxu0 %v3603_v53  ;;  %v3718_v53 = vld [vmem:[%s4393_s16 + $0x108] ss:$16 sps:$4 sm:$0xff]  }
 0x292   : > { %1920 = vmatprep.subr.bf16.mxu0 %v3611_v54  ;;  %v3723_v54 = vld [vmem:[%s4393_s16 + $0x12c] ss:$16 sps:$4 sm:$0xff]  }
 0x295   : > { %1921 = vmatpush1.bf16.msra.mxu0 %v3609_v55  ;;  %v3721_v55 = vld [vmem:[%s4393_s16 + $0x128] ss:$16 sps:$4 sm:$0xff]  }
 0x296   : > { %1922 = vmatprep.subr.bf16.mxu0 %v3617_v56  ;;  %v3726_v56 = vld [vmem:[%s4393_s16 + $0x14c] ss:$16 sps:$4 sm:$0xff]  }
 0x299   : > { %1923 = vmatpush1.bf16.msra.mxu0 %v3615_v57  ;;  %v3724_v57 = vld [vmem:[%s4393_s16 + $0x148] ss:$16 sps:$4 sm:$0xff]  }
 0x29a   : > { %1924 = vmatprep.subr.bf16.mxu0 %v3623_v58  ;;  %v3729_v58 = vld [vmem:[%s4393_s16 + $0x16c] ss:$16 sps:$4 sm:$0xff]  }
 0x29d   : > { %1925 = vmatpush1.bf16.msra.mxu0 %v3621_v59  ;;  %v3727_v59 = vld [vmem:[%s4393_s16 + $0x168] ss:$16 sps:$4 sm:$0xff]  }
 0x29e   : > { %1926 = vmatprep.subr.bf16.mxu0 %v3629_v61  ;;  %v3732_v61 = vld [vmem:[%s4393_s16 + $0x18c] ss:$16 sps:$4 sm:$0xff]  }
 0x2a1   : > { %1927 = vmatpush1.bf16.msra.mxu0 %v3627_v62  ;;  %v3730_v62 = vld [vmem:[%s4393_s16 + $0x188] ss:$16 sps:$4 sm:$0xff]  }
 0x2a2   : > { %1928 = vmatprep.subr.bf16.mxu0 %v3635_v0  ;;  %v3735_v0 = vld [vmem:[%s4393_s16 + $0x1ac] ss:$16 sps:$4 sm:$0xff]  }
 0x2a5   : > { %1929 = vmatpush1.bf16.msra.mxu0 %v3633_v2  ;;  %v3733_v2 = vld [vmem:[%s4393_s16 + $0x1a8] ss:$16 sps:$4 sm:$0xff]  }
 0x2a6   : > { %1930 = vmatprep.subr.bf16.mxu0 %v3641_v3  ;;  %v3738_v3 = vld [vmem:[%s4393_s16 + $0x1cc] ss:$16 sps:$4 sm:$0xff]  }
 0x2a9   : > { %1931 = vmatpush1.bf16.msra.mxu0 %v3639_v4  ;;  %v3736_v4 = vld [vmem:[%s4393_s16 + $0x1c8] ss:$16 sps:$4 sm:$0xff]  }
 0x2aa   : > { %1932 = vmatprep.subr.bf16.mxu0 %v3644_v5  ;;  %v3741_v5 = vld [vmem:[%s4393_s16 + $0x1ec] ss:$16 sps:$4 sm:$0xff]  }
 0x2ad   : > { %1933 = vmatpush1.bf16.msra.mxu0 %v3642_v63  ;;  %v3739_v63 = vld [vmem:[%s4393_s16 + $0x1e8] ss:$16 sps:$4 sm:$0xff]  }
 0x2b0   : > { %1935 = vmatmul.mubr.bf16.vlgmr.msra.gmra.mrb[0].mxu0 %v997_v6 }
 0x30c   : > { %v1813_v60 = vpop.f32.mrb[0].mxu1 }
 0x30d   : > { %v1815_v15 = vpop.f32.mrb[1].mxu1  ;;  %v1814_v22 = vadd.f32 %v1813_v60, %v1132_v20 }
 0x30e   : > { %v1817_v13 = vpop.f32.mrb[2].mxu1  ;;  %v1816_v23 = vadd.f32 %v1815_v15, %v1136_v21 }
 0x30f   : > { %v1818_v16 = vpop.f32.mrb[3].mxu1 }
 0x383   : > { %v1936_v24 = vpop.f32.mrb[0].mxu0 }
 0x384   : > { %v3334_v25 = vadd.f32 %v1936_v24, %v1814_v22  ;;  %v1938_v26 = vpop.f32.mrb[1].mxu0  ;;  %v3742_v22 = vld [vmem:[%s4870_s11 + $0x40] sm:$0xff] (!%p3247_p4)  }
 0x385   : > { %v3336_v1 = vadd.f32 %v1938_v26, %v1816_v23  ;;  %v1940_v27 = vpop.f32.mrb[2].mxu0  ;;  %v3743_v23 = vld [vmem:[%s4871_s19 + $0xc0] sm:$0xff] (!%p3247_p4)   ;;  %3289 = vmatprep.subr.bf16.mxu0 (!%p3247_p4), %v3742_v22  ;;  %v3746_v26 = vld [vmem:[%s4871_s19 + $0x48] sm:$0xff] (!%p3247_p4)  }
 0x386   : > { %vm1943_vm9 = vcmp.gt.f32.partialorder %v3334_v25, 0.0  ;;  %v1945_v29 = vmul.f32 0.01, %v3334_v25  ;;  %v1941_v30 = vpop.f32.mrb[3].mxu0  ;;  %v3744_v24 = vld [vmem:[%s4871_s19] sm:$0xff] (!%p3247_p4)   ;;  %v3748_v27 = vld [vmem:[%s4871_s19 + $0x8] sm:$0xff] (!%p3247_p4)  }
 0x387   : > { %vm1944_vm10 = vcmp.gt.f32.partialorder %v3336_v1, 0.0  ;;  %v1946_v32 = vmul.f32 0.01, %v3336_v1  ;;  %3290 = vmatpush3.bf16.msra.mxu0 (!%p3247_p4), %v3744_v24  ;;  %v3750_v30 = vld [vmem:[%s4871_s19 + $0x50] sm:$0xff] (!%p3247_p4)  }
 0x388   : > { %v1947_v33 = vsel %vm1943_vm9, %v3334_v25, %v1945_v29  ;;  %v3745_v25 = vld [vmem:[%s4871_s19 + $0x80] sm:$0xff] (!%p3247_p4)   ;;  %3291 = vmatprep.subr.bf16.mxu0 (!%p3247_p4), %v3746_v26  ;;  %v3749_v29 = vld [vmem:[%s4871_s19 + $0x88] sm:$0xff] (!%p3247_p4)  }
 0x389   : > { %v1948_v34 = vsel %vm1944_vm10, %v3336_v1, %v1946_v32  ;;  %v4623_v37 = vpack.c.bf16 %v1947_v33, %v1947_v33  ;;  %v3747_v1 = vld [vmem:[%s4871_s19 + $0xc8] sm:$0xff] (!%p3247_p4)   ;;  %v3751_v32 = vld [vmem:[%s4871_s19 + $0xd0] sm:$0xff] (!%p3247_p4)  }
 0x38a   : > { %v1951_v35 = vpack.c.bf16 %v1948_v34, %v1948_v34  ;;  %v3752_v33 = vld [vmem:[%s4871_s19 + $0x10] sm:$0xff] (!%p3247_p4)  }
 0x38b   : > { %3292 = vmatpush3.bf16.msra.mxu0 (!%p3247_p4), %v3748_v27  ;;  %v3753_v34 = vld [vmem:[%s4871_s19 + $0x90] sm:$0xff] (!%p3247_p4)  }
 0x38c   : > { %2368 = vmatprep.mubr.bf16.mxu1 %v1951_v35  ;;  %3293 = vmatprep.subr.bf16.mxu0 (!%p3247_p4), %v3750_v30 }
 0x38d   : > { %2369 = vmatmul.mubr.bf16.vlgmr.msra.gmra.mrb[4].mxu1 %v4623_v37 }
 0x38e   : > { %2378 = vmatpush1.bf16.msra.mxu1 %v3694_v36  ;;  %2409 = vmatprep.mubr.bf16.mxu1 %v1951_v35  ;;  %v3754_v35 = vld [vmem:[%s4871_s19 + $0x58] sm:$0xff] (!%p3247_p4)  }
 0x38f   : > { %2379 = vmatprep.subr.bf16.mxu1 %v3699_v38  ;;  %3294 = vmatpush3.bf16.msra.mxu0 (!%p3247_p4), %v3752_v33  ;;  %v3755_v36 = vld [vmem:[%s4871_s19 + $0xd8] sm:$0xff] (!%p3247_p4)  }
 0x390   : > { %3295 = vmatprep.subr.bf16.mxu0 (!%p3247_p4), %v3754_v35  ;;  %v3757_v38 = vld [vmem:[%s4871_s19 + $0x98] sm:$0xff] (!%p3247_p4)  }
 0x392   : > { %2380 = vmatpush1.bf16.msra.mxu1 %v3697_v39  ;;  %v3758_v39 = vld [vmem:[%s4871_s19 + $0x60] sm:$0xff] (!%p3247_p4)  }
 0x393   : > { %2381 = vmatprep.subr.bf16.mxu1 %v3702_v40  ;;  %v3759_v40 = vld [vmem:[%s4871_s19 + $0xe0] sm:$0xff] (!%p3247_p4)  }
 0x396   : > { %2382 = vmatpush1.bf16.msra.mxu1 %v3700_v41  ;;  %v3760_v41 = vld [vmem:[%s4871_s19 + $0x20] sm:$0xff] (!%p3247_p4)  }
 0x397   : > { %2383 = vmatprep.subr.bf16.mxu1 %v3705_v42  ;;  %v3761_v42 = vld [vmem:[%s4871_s19 + $0xa0] sm:$0xff] (!%p3247_p4)  }
 0x39a   : > { %2384 = vmatpush1.bf16.msra.mxu1 %v3703_v43  ;;  %v3762_v43 = vld [vmem:[%s4871_s19 + $0x68] sm:$0xff] (!%p3247_p4)  }
 0x39b   : > { %2385 = vmatprep.subr.bf16.mxu1 %v3708_v44  ;;  %v3763_v44 = vld [vmem:[%s4871_s19 + $0xe8] sm:$0xff] (!%p3247_p4)  }
 0x39e   : > { %2386 = vmatpush1.bf16.msra.mxu1 %v3706_v45  ;;  %v3764_v45 = vld [vmem:[%s4871_s19 + $0x28] sm:$0xff] (!%p3247_p4)  }
 0x39f   : > { %2387 = vmatprep.subr.bf16.mxu1 %v3711_v46  ;;  %v3765_v46 = vld [vmem:[%s4871_s19 + $0xa8] sm:$0xff] (!%p3247_p4)  }
 0x3a2   : > { %2388 = vmatpush1.bf16.msra.mxu1 %v3709_v47  ;;  %v3766_v47 = vld [vmem:[%s4871_s19 + $0x70] sm:$0xff] (!%p3247_p4)  }
 0x3a3   : > { %2389 = vmatprep.subr.bf16.mxu1 %v3714_v48  ;;  %v3767_v48 = vld [vmem:[%s4871_s19 + $0xf0] sm:$0xff] (!%p3247_p4)  }
 0x3a6   : > { %2390 = vmatpush1.bf16.msra.mxu1 %v3712_v49  ;;  %v3768_v49 = vld [vmem:[%s4871_s19 + $0x30] sm:$0xff] (!%p3247_p4)  }
 0x3a7   : > { %2391 = vmatprep.subr.bf16.mxu1 %v3717_v50  ;;  %v3769_v50 = vld [vmem:[%s4871_s19 + $0xb0] sm:$0xff] (!%p3247_p4)  }
 0x3aa   : > { %2392 = vmatpush1.bf16.msra.mxu1 %v3715_v51  ;;  %v3770_v51 = vld [vmem:[%s4871_s19 + $0x78] sm:$0xff] (!%p3247_p4)  }
 0x3ab   : > { %2393 = vmatprep.subr.bf16.mxu1 %v3720_v52  ;;  %v2459_v52 = vsub.s32 (!%p3247_p4), 2, %v4427_v28 }
 0x3ae   : > { %2394 = vmatpush1.bf16.msra.mxu1 %v3718_v53  ;;  %v3771_v53 = vld [vmem:[%s4871_s19 + $0xf8] sm:$0xff] (!%p3247_p4)  }
 0x3af   : > { %2395 = vmatprep.subr.bf16.mxu1 %v3723_v54  ;;  %v2463_v54 = vsub.s32 (!%p3247_p4), 3, %v4427_v28 }
 0x3b2   : > { %2396 = vmatpush1.bf16.msra.mxu1 %v3721_v55  ;;  %v3772_v55 = vld [vmem:[%s4871_s19 + $0x38] sm:$0xff] (!%p3247_p4)  }
 0x3b3   : > { %2397 = vmatprep.subr.bf16.mxu1 %v3726_v56  ;;  %v3773_v56 = vld [vmem:[%s4871_s19 + $0xb8] sm:$0xff] (!%p3247_p4)  }
 0x3b6   : > { %2398 = vmatpush1.bf16.msra.mxu1 %v3724_v57  ;;  %v2447_v57 = vld [vmem:[#allocation12] sm:$0xf] (!%p3247_p4) }
 0x3b7   : > { %2399 = vmatprep.subr.bf16.mxu1 %v3729_v58  ;;  %v2452_v58 = vrot.slane (!%p3247_p4), %v2447_v57, %v1131_v17 }
 0x3ba   : > { %2400 = vmatpush1.bf16.msra.mxu1 %v3727_v59  ;;  %v2456_v59 = vrot.slane (!%p3247_p4), %v2447_v57, %v1135_v19 }
 0x3bb   : > { %2401 = vmatprep.subr.bf16.mxu1 %v3732_v61  ;;  %v2460_v61 = vrot.slane (!%p3247_p4), %v2447_v57, %v2459_v52 }
 0x3be   : > { %2402 = vmatpush1.bf16.msra.mxu1 %v3730_v62  ;;  %v2464_v62 = vrot.slane (!%p3247_p4), %v2447_v57, %v2463_v54 }
 0x3bf   : > { %2403 = vmatprep.subr.bf16.mxu1 %v3735_v0  ;;  %v2465_v0 = vcombine.low (!%p3247_p4), %v2452_v58, %v2456_v59 }
 0x3c2   : > { %2404 = vmatpush1.bf16.msra.mxu1 %v3733_v2  ;;  %v2466_v2 = vcombine.low (!%p3247_p4), %v2460_v61, %v2464_v62 }
 0x3c3   : > { %2405 = vmatprep.subr.bf16.mxu1 %v3738_v3  ;;  %v2473_v3 = vrot.slane (!%p3247_p4), %v2465_v0, %v4432_v31 }
 0x3c6   : > { %2406 = vmatpush1.bf16.msra.mxu1 %v3736_v4  ;;  %v2480_v4 = vrot.slane (!%p3247_p4), %v2466_v2, %v4432_v31 }
 0x3c7   : > { %2407 = vmatprep.subr.bf16.mxu1 %v3741_v5 }
 0x3ca   : > { %2408 = vmatpush1.bf16.msra.mxu1 %v3739_v63  ;;  %v2481_v63 = vcombine.low (!%p3247_p4), %v2473_v3, %v2480_v4 }
 0x3cb   : > { %3311 = vmatprep.subr.bf16.mxu1 (!%p3247_p4), %v3743_v23 }
 0x3cd   : > { %2410 = vmatmul.mubr.bf16.vlgmr.msra.gmra.mrb[8].mxu1 %v4623_v37  ;;  %v3756_v37 = vld [vmem:[%s4871_s19 + $0x18] sm:$0xff] (!%p3247_p4)  }
 0x3ce   : > { %3312 = vmatpush3.bf16.msra.mxu1 (!%p3247_p4), %v3745_v25  ;;  %3296 = vmatpush3.bf16.msra.mxu0 (!%p3247_p4), %v3756_v37 }
 0x3cf   : > { %3313 = vmatprep.subr.bf16.mxu1 (!%p3247_p4), %v3747_v1  ;;  %3297 = vmatprep.subr.bf16.mxu0 (!%p3247_p4), %v3758_v39 }
 0x3d2   : > { %3314 = vmatpush3.bf16.msra.mxu1 (!%p3247_p4), %v3749_v29  ;;  %3298 = vmatpush3.bf16.msra.mxu0 (!%p3247_p4), %v3760_v41 }
 0x3d3   : > { %3315 = vmatprep.subr.bf16.mxu1 (!%p3247_p4), %v3751_v32  ;;  %3299 = vmatprep.subr.bf16.mxu0 (!%p3247_p4), %v3762_v43 }
 0x3d6   : > { %3316 = vmatpush3.bf16.msra.mxu1 (!%p3247_p4), %v3753_v34  ;;  %3300 = vmatpush3.bf16.msra.mxu0 (!%p3247_p4), %v3764_v45 }
 0x3d7   : > { %3317 = vmatprep.subr.bf16.mxu1 (!%p3247_p4), %v3755_v36  ;;  %3301 = vmatprep.subr.bf16.mxu0 (!%p3247_p4), %v3766_v47 }
 0x3da   : > { %3318 = vmatpush3.bf16.msra.mxu1 (!%p3247_p4), %v3757_v38  ;;  %3302 = vmatpush3.bf16.msra.mxu0 (!%p3247_p4), %v3768_v49 }
 0x3db   : > { %3319 = vmatprep.subr.bf16.mxu1 (!%p3247_p4), %v3759_v40  ;;  %3303 = vmatprep.subr.bf16.mxu0 (!%p3247_p4), %v3770_v51 }
 0x3de   : > { %3320 = vmatpush3.bf16.msra.mxu1 (!%p3247_p4), %v3761_v42  ;;  %3304 = vmatpush3.bf16.msra.mxu0 (!%p3247_p4), %v3772_v55 }
 0x3df   : > { %3321 = vmatprep.subr.bf16.mxu1 (!%p3247_p4), %v3763_v44 }
 0x3e2   : > { %3322 = vmatpush3.bf16.msra.mxu1 (!%p3247_p4), %v3765_v46 }
 0x3e3   : > { %3323 = vmatprep.subr.bf16.mxu1 (!%p3247_p4), %v3767_v48 }
 0x3e6   : > { %3324 = vmatpush3.bf16.msra.mxu1 (!%p3247_p4), %v3769_v50 }
 0x3e7   : > { %3325 = vmatprep.subr.bf16.mxu1 (!%p3247_p4), %v3771_v53 }
 0x3ea   : > { %3326 = vmatpush3.bf16.msra.mxu1 (!%p3247_p4), %v3773_v56 }
 0x460   : > { %v2370_v6 = vpop.f32.mrb[4].mxu1 }
 0x461   : > { %v2372_v7 = vpop.f32.mrb[5].mxu1 }
 0x462   : > { %v2422_v8 = vcombine.low %v2370_v6, %v2372_v7  ;;  %v2374_v9 = vpop.f32.mrb[6].mxu1 }
 0x463   : > { %v2375_v10 = vpop.f32.mrb[7].mxu1 }
 0x464   : > { %v2430_v13 = vrot.slane %v2422_v8, %v4432_v31 }
 0x4a0   : > { %v2411_v11 = vpop.f32.mrb[8].mxu1 }
 0x4a1   : > { %v2413_v12 = vpop.f32.mrb[9].mxu1 }
 0x4a2   : > { %v2423_v14 = vcombine.low %v2411_v11, %v2413_v12  ;;  %v2415_v60 = vpop.f32.mrb[10].mxu1 }
 0x4a3   : > { %v2416_v15 = vpop.f32.mrb[11].mxu1 }
 0x4a4   : > { %v2437_v16 = vrot.slane %v2423_v14, %v4432_v31  ;;  %2445 = sbr.rel (%p3247_p4) target bundleno = 1434 (0x59a), region = 92 }
 0x4a6   : > { %v2438_v20 = vcombine.low %v2430_v13, %v2437_v16  ;;  %v3248_v13 = vld [vmem:[#allocation13] ss:$0 sm:$0xff] (!%p3247_p4) }
 0x4a8   : > { %v2440_v21 = vadd.f32 %v2438_v20, %v1949_v18 }
 0x4aa   : > { %2441 = vst [vmem:[#allocation3] sm:$0xff] %v2440_v21 }
 0x4b1   : > { %v2446_v5 = vld [vmem:[#allocation3] sm:$0xff] }
 0x4b2   : > { %v2483_v6 = vadd.f32 %v2481_v63, %v2446_v5 }
 0x4b4   : > { %vm2484_vm11 = vcmp.gt.f32.partialorder %v2483_v6, 0.0  ;;  %v2485_v7 = vmul.f32 0.01, %v2483_v6 }
 0x4b6   : > { %v2486_v8 = vsel %vm2484_vm11, %v2483_v6, %v2485_v7 }
 0x4b7   : > { %v2495_v9 = vrot.slane %v2486_v8, %v4432_v31  ;;  %v2488_v17 = vcombine.high %v2486_v8, %v2486_v8 }
 0x4b9   : > { %v2503_v10 = vcombine.high %v2495_v9, %v2495_v9  ;;  %v2502_v28 = vrot.slane %v2488_v17, %v4432_v31  ;;  %v2509_v19 = vpack.c.bf16 %v2495_v9, %v2495_v9 }
 0x4bb   : > { %v2510_v11 = vpack.c.bf16 %v2503_v10, %v2503_v10  ;;  %v2504_v12 = vcombine.high %v2502_v28, %v2502_v28  ;;  %v2511_v14 = vpack.c.bf16 %v2502_v28, %v2502_v28 }
 0x4bd   : > { %2808 = vmatprep.mubr.bf16.mxu0 %v2510_v11  ;;  %v2512_v60 = vpack.c.bf16 %v2504_v12, %v2504_v12 }
 0x4be   : > { %2809 = vmatmul.mubr.bf16.vlgmr.msra.gmra.mrb[0].mxu0 %v2509_v19 }
 0x4bf   : > { %2848 = vmatprep.mubr.bf16.mxu1 %v2512_v60 }
 0x4c0   : > { %2849 = vmatmul.mubr.bf16.vlgmr.msra.gmra.mrb[0].mxu1 %v2511_v14 }
 0x591   : > { %v3305_v15 = vpop.f32.mrb[0].mxu0 }
 0x592   : > { %v3306_v16 = vpop.f32.mrb[1].mxu0 }
 0x593   : > { %v3327_v18 = vpop.f32.mrb[0].mxu1  ;;  %v3307_v20 = vadd.f32 %v3306_v16, %v3305_v15  ;;  %v3308_v21 = vpop.f32.mrb[2].mxu0 }
 0x594   : > { %v3328_v22 = vpop.f32.mrb[1].mxu1  ;;  %v3309_v23 = vpop.f32.mrb[3].mxu0 }
 0x595   : > { %v2811_v24 = vadd.f32 %v3307_v20, %v3248_v13  ;;  %v3329_v25 = vadd.f32 %v3328_v22, %v3327_v18  ;;  %v3330_v31 = vpop.f32.mrb[2].mxu1 }
 0x596   : > { %v3331_v26 = vpop.f32.mrb[3].mxu1 }
 0x597   : > { %v2851_v1 = vadd.f32 %v3329_v25, %v2811_v24 }
 0x599   : > { %2857 = vst.msk [vmem:[#allocation15] sm:$0x3] %vm2856_vm12, %v2851_v1 }
 0x59a PF: > { %p3403_p2 = scmp.eq.s32.totalorder %s4145_s13, 3  ;;  %s4075_s16 = smov [#allocation15]  }
 0x59b   : > { %s2865_s15 = sshll.u32 %s4075_s16, 4  ;;  %s2866_s15 = int_to_ptr.vmem [resolvable:$true] %s2865_s15 }
 0x59c   : > { %s3976_s1 = scalar_lea.vmem %s2866_s15, 32  ;;  %p3983_p13 = scmp.lt.s32.totalorder %s2866_s15, %s2866_s15 }
 0x59d   : > { %p3977_p7 = scmp.ne.s32.totalorder %s2866_s15, %s3976_s1  ;;  %p3984_p5 = scmp.lt.s32.totalorder %s3976_s1, %s3976_s1 }
 0x59f   : > { %p3978_p12 = pnand %p3977_p7, %p3403_p2  ;;  %p3985_p10 = por %p3984_p5, %p3983_p13 }
 0x5a1   : > { %p3979_p11 = pneg %p3978_p12 }
 0x5a3   : > { %p3986_p1 = pnand %p3985_p10, %p3979_p11 }
 0x5a5   : > { %3989 = shalt.err (!%p3986_p1)
}
 0x5a6   : > { %s4872_s12 = sld [smem:[#allocation30_spill]] }
 0x5ac   : > { %s4873_s29 = smov %s4872_s12  ;;  %s3990_s11 = scalar_lea.hbm %s4872_s12, 32 }
 0x5ad   : > { %p3991_p3 = scmp.ne.s32.totalorder %s4873_s29, %s3990_s11  ;;  %p3996_p6 = scmp.lt.u32.totalorder %s3990_s11, %s4873_s29 }
 0x5af   : > { %p3992_p8 = pnand %p3991_p3, %p3403_p2 }
 0x5b1   : > { %p3993_p0 = pneg %p3992_p8 }
 0x5b3   : > { %p3998_p9 = pnand %p3996_p6, %p3993_p0 }
 0x5b5   : > { %4001 = shalt.err (!%p3998_p9)
}
 0x5b6   : > { %3368 = dma.vmem_to_hbm [thread:$0]  (%p3403_p2), %s2866_s15, 32, %s4873_s29, [#allocation6]  }
 0x5b7   : > { %4039 = dma.done.wait (%p3403_p2), [#allocation6], 32  }
 0x5b8   : > { %4041 = vsyncadd (%p3403_p2), [#allocation6], 4294967264 }
 0x5b9 PF: > { %s4874_s12 = sld [smem:[#allocation23_spill]]  ;;  %s4875_s22 = sld [smem:[#allocation22_spill]] }
 0x5ba   : > { %s4876_s11 = sld [smem:[#allocation24_spill]]  ;;  %s4877_s30 = smov %s4048_s10 }
 0x5bf   : > { %p20_p4 = scmp.ge.s32.totalorder %s4874_s12, 6   ;;  %s4878_s10 = smov %s4875_s22 }
 0x5c1   :  { %22 = sbr.rel (!%p20_p4) target bundleno = 11 (0xb), region = 138 }
 0x5c8   :  { %2878 = vsyncpa [#allocation5], 1 }
 0x5c9   :  { %2880 = vsyncpa [#allocation5 + $0x1], 1 }
 0x5ca   :  { %2881 = vsyncpa [#allocation8], 1 }
 0x5cb   :  { %2882 = vsyncpa [#allocation14], 1 }
 0x5cc   :  { %2883 = vsyncpa [#allocation6], 1 }
 0x5cd   :  { %2885 = vsyncpa [#allocation6 + $0x1], 1 }

// kernel: eadtn_forward.2
= control target key start
LH: loop header
LB: loop body
LE: loop exit
PB: predicated region body
PF: predicated region fallthrough
CT: control target
= control target key end

     0   :  { %s6132_s0 = inlined_call_operand.vmem [shape: s32[2,32,1], index: 0, kind: input, shape index: {}]   ;;  %s6133_s1 = inlined_call_operand.vmem [shape: s32[2,48,1], index: 1, kind: input, shape index: {}]   ;;  %s6134_s2 = inlined_call_operand.vmem [shape: f32[65,16], index: 2, kind: input, shape index: {}]   ;;  %s6135_s3 = inlined_call_operand.vmem [shape: f32[26,16], index: 3, kind: input, shape index: {}]   ;;  %s6136_s4 = inlined_call_operand.vmem [shape: f32[3,16,8], index: 4, kind: input, shape index: {}]   ;;  %s6137_s5 = inlined_call_operand.hbm [shape: f32[1,8], index: 5, kind: input, shape index: {}]   ;;  %s6138_s6 = inlined_call_operand.hbm [shape: f32[3,8,16], index: 6, kind: input, shape index: {}]   ;;  %s6139_s7 = inlined_call_operand.hbm [shape: f32[1,16], index: 7, kind: input, shape index: {}]   ;;  %s6140_s8 = inlined_call_operand.hbm [shape: f32[3,16,32], index: 8, kind: input, shape index: {}]   ;;  %s6141_s9 = inlined_call_operand.hbm [shape: f32[1,32], index: 9, kind: input, shape index: {}]   ;;  %s6142_s10 = inlined_call_operand.hbm [shape: f32[8,26], index: 10, kind: input, shape index: {}]   ;;  %s6143_s11 = inlined_call_operand.vmem [shape: f32[26,8], index: 11, kind: input, shape index: {}]   ;;  %s6144_s12 = inlined_call_operand.vmem [shape: f32[3,16,8], index: 12, kind: input, shape index: {}]   ;;  %s6145_s13 = inlined_call_operand.hbm [shape: f32[1,8], index: 13, kind: input, shape index: {}]   ;;  %s6146_s14 = inlined_call_operand.hbm [shape: f32[3,8,16], index: 14, kind: input, shape index: {}]   ;;  %s6147_s15 = inlined_call_operand.hbm [shape: f32[1,16], index: 15, kind: input, shape index: {}]   ;;  %s6148_s16 = inlined_call_operand.hbm [shape: f32[3,16,32], index: 16, kind: input, shape index: {}]   ;;  %s6149_s17 = inlined_call_operand.hbm [shape: f32[1,32], index: 17, kind: input, shape index: {}]   ;;  %s6150_s18 = inlined_call_operand.hbm [shape: f32[14,42], index: 18, kind: input, shape index: {}]   ;;  %s6151_s19 = inlined_call_operand.vmem [shape: f32[42,14], index: 19, kind: input, shape index: {}]   ;;  %s6152_s20 = inlined_call_operand.vmem [shape: f32[2,1,64], index: 20, kind: output, shape index: {}]  }
   0x1   :  { %6162 = sst [smem:[#allocation29_spill]] %s6132_s0 }
   0x2   :  { %6163 = sst [smem:[#allocation30_spill]] %s6133_s1 }
   0x3   :  { %6164 = sst [smem:[#allocation31_spill]] %s6134_s2 }
   0x4   :  { %6165 = sst [smem:[#allocation32_spill]] %s6135_s3 }
   0x5   :  { %6166 = sst [smem:[#allocation33_spill]] %s6136_s4 }
   0x6   :  { %6167 = sst [smem:[#allocation34_spill]] %s6143_s11 }
   0x7   :  { %6168 = sst [smem:[#allocation35_spill]] %s6144_s12 }
   0x8   :  { %6169 = sst [smem:[#allocation36_spill]] %s6151_s19 }
   0x9   :  { %6170 = sst [smem:[#allocation37_spill]] %s6152_s20 }
   0xa   :  { %25 = vsyncpa [#allocation3], 0 }
   0xb   :  { %26 = vsyncpa [#allocation5], 0 }
   0xc   :  { %27 = vsyncpa [#allocation8], 0 }
   0xd   :  { %28 = vsyncpa [#allocation11], 0 }
   0xe   :  { %29 = vsyncpa [#allocation14], 0 }
   0xf   :  { %30 = vsyncpa [#allocation17], 0 }
  0x10   :  { %31 = vsyncpa [#allocation20], 0  ;;  %s5404_s1 = smov 0  }
  0x11 LB: > { %6171 = sst [smem:[#allocation28_spill]] %s5277_s1  ;;  %s5279_s22 = smov [#allocation4]   ;;  %s5277_s1 = sphi %s5404_s1, %s37_s1  }
  0x12   : > { %s530_s23 = sshll.u32 %s5279_s22, 4  ;;  %s5410_s24 = sadd.s32 4294967295, %s5277_s1   ;;  %s5415_s23 = int_to_ptr.vmem [resolvable:$true] %s530_s23 }
  0x13   : > { %p3979_p0 = scmp.ge.s32.totalorder %s5277_s1, 1  ;;  %p498_p1 = scmp.lt.s32.totalorder %s5277_s1, 3 }
  0x14   : > { %p6160_p2 = scmp.eq.s32.totalorder %s5410_s24, 0  ;;  %s5280_s25 = smov [#allocation7]  }
  0x15   : > { %p5417_p3 = pnand %p3979_p0, %p498_p1  ;;  %s554_s3 = sshll.u32 %s5280_s25, 4  ;;  %s5423_s3 = int_to_ptr.vmem [resolvable:$true] %s554_s3 }
  0x16   : > { %s5281_s27 = smov [#allocation10]   ;;  %s5282_s4 = smov [#allocation13]  }
  0x17   : > { %s6172_s2 = scalar_select %p5417_p3, 1, 0 }
  0x18   : > { %p4816_p4 = pneg %p5417_p3  ;;  %s579_s28 = sshll.u32 %s5281_s27, 4  ;;  %s5431_s28 = int_to_ptr.vmem [resolvable:$true] %s579_s28 }
  0x19   : > { %s5433_s29 = sshll.u32 %s5282_s4, 4  ;;  %s4907_s21 = scalar_lea.hbm %s6138_s6, 384  ;;  %s607_s29 = int_to_ptr.vmem [resolvable:$true] %s5433_s29 }
  0x1a   : > { %p5427_p5 = pnand %p6160_p2, %p4816_p4  ;;  %p4908_p6 = scmp.ne.s32.totalorder %s6138_s6, %s4907_s21 }
  0x1b   : > { %p4914_p10 = scmp.lt.u32.totalorder %s4907_s21, %s6138_s6 }
  0x1c   : > { %p5443_p7 = pneg %p5427_p5 }
  0x1e   : > { %p4910_p8 = pnand %p5443_p7, %p4908_p6 }
  0x20   : > { %p4911_p9 = pneg %p4910_p8 }
  0x22   : > { %p4916_p11 = pnand %p4914_p10, %p4911_p9 }
  0x24   : > { %4919 = shalt.err (!%p4916_p11)
}
  0x25   : > { %s4920_s30 = scalar_lea.vmem %s5415_s23, 384  ;;  %p4928_p1 = scmp.lt.s32.totalorder %s5415_s23, %s5415_s23 }
  0x26   : > { %p4921_p12 = scmp.ne.s32.totalorder %s5415_s23, %s4920_s30  ;;  %p4929_p4 = scmp.lt.s32.totalorder %s4920_s30, %s4920_s30 }
  0x28   : > { %p4923_p13 = pnand %p4921_p12, %p5443_p7  ;;  %p4930_p6 = por %p4929_p4, %p4928_p1 }
  0x2a   : > { %p4924_p0 = pneg %p4923_p13 }
  0x2c   : > { %p4931_p8 = pnand %p4930_p6, %p4924_p0 }
  0x2e   : > { %4934 = shalt.err (!%p4931_p8)
}
  0x2f   : > { %s5283_s0 = smov 128   ;;  %s5284_s21 = smov 8  }
  0x30   : > { %4822 = dma.hbm_to_vmem [thread:$0]  (!%p5427_p5), %s6138_s6, 384, %s5415_s23, [#allocation5], %s5283_s0, %s5283_s0, %s5284_s21  }
  0x31   : > { %s4935_s30 = scalar_lea.hbm %s6140_s8, 768 }
  0x32   : > { %p4936_p9 = scmp.ne.s32.totalorder %s6140_s8, %s4935_s30  ;;  %p4942_p12 = scmp.lt.u32.totalorder %s4935_s30, %s6140_s8 }
  0x34   : > { %p4938_p10 = pnand %p4936_p9, %p5443_p7 }
  0x36   : > { %p4939_p11 = pneg %p4938_p10 }
  0x38   : > { %p4944_p13 = pnand %p4942_p12, %p4939_p11 }
  0x3a   : > { %4947 = shalt.err (!%p4944_p13)
}
  0x3b   : > { %s4948_s23 = scalar_lea.vmem %s5423_s3, 768  ;;  %p4956_p6 = scmp.lt.s32.totalorder %s5423_s3, %s5423_s3 }
  0x3c   : > { %p4949_p0 = scmp.ne.s32.totalorder %s5423_s3, %s4948_s23  ;;  %p4957_p8 = scmp.lt.s32.totalorder %s4948_s23, %s4948_s23 }
  0x3e   : > { %p4951_p1 = pnand %p4949_p0, %p5443_p7  ;;  %p4958_p9 = por %p4957_p8, %p4956_p6 }
  0x40   : > { %p4952_p4 = pneg %p4951_p1 }
  0x42   : > { %p4959_p10 = pnand %p4958_p9, %p4952_p4 }
  0x44   : > { %4962 = shalt.err (!%p4959_p10)
}
  0x45   : > { %4828 = dma.hbm_to_vmem [thread:$0]  (!%p5427_p5), %s6140_s8, 768, %s5423_s3, [#allocation8], %s5283_s0, %s5283_s0, %s5284_s21  }
  0x46   : > { %s4963_s22 = scalar_lea.hbm %s6142_s10, 128 }
  0x47   : > { %p4964_p11 = scmp.ne.s32.totalorder %s6142_s10, %s4963_s22  ;;  %p4970_p0 = scmp.lt.u32.totalorder %s4963_s22, %s6142_s10 }
  0x49   : > { %p4966_p12 = pnand %p4964_p11, %p5443_p7 }
  0x4b   : > { %p4967_p13 = pneg %p4966_p12 }
  0x4d   : > { %p4972_p1 = pnand %p4970_p0, %p4967_p13 }
  0x4f   : > { %4975 = shalt.err (!%p4972_p1)
}
  0x50   : > { %s4976_s3 = scalar_lea.vmem %s5431_s28, 128  ;;  %p4984_p9 = scmp.lt.s32.totalorder %s5431_s28, %s5431_s28 }
  0x51   : > { %p4977_p4 = scmp.ne.s32.totalorder %s5431_s28, %s4976_s3  ;;  %p4985_p10 = scmp.lt.s32.totalorder %s4976_s3, %s4976_s3 }
  0x53   : > { %p4979_p6 = pnand %p4977_p4, %p5443_p7  ;;  %p4986_p11 = por %p4985_p10, %p4984_p9 }
  0x55   : > { %p4980_p8 = pneg %p4979_p6 }
  0x57   : > { %p4987_p12 = pnand %p4986_p11, %p4980_p8 }
  0x59   : > { %4990 = shalt.err (!%p4987_p12)
}
  0x5a   : > { %4834 = dma.hbm_to_vmem [thread:$0]  (!%p5427_p5), %s6142_s10, 128, %s5431_s28, [#allocation11]  }
  0x5b   : > { %s4991_s20 = scalar_lea.hbm %s6146_s14, 384 }
  0x5c   : > { %p4992_p13 = scmp.ne.s32.totalorder %s6146_s14, %s4991_s20  ;;  %p4998_p4 = scmp.lt.u32.totalorder %s4991_s20, %s6146_s14 }
  0x5e   : > { %p4994_p0 = pnand %p4992_p13, %p5443_p7 }
  0x60   : > { %p4995_p1 = pneg %p4994_p0 }
  0x62   : > { %p5000_p6 = pnand %p4998_p4, %p4995_p1 }
  0x64   : > { %5003 = shalt.err (!%p5000_p6)
}
  0x65   : > { %s5004_s30 = scalar_lea.vmem %s607_s29, 384  ;;  %p5012_p11 = scmp.lt.s32.totalorder %s607_s29, %s607_s29 }
  0x66   : > { %p5005_p8 = scmp.ne.s32.totalorder %s607_s29, %s5004_s30  ;;  %p5013_p12 = scmp.lt.s32.totalorder %s5004_s30, %s5004_s30 }
  0x68   : > { %p5007_p9 = pnand %p5005_p8, %p5443_p7  ;;  %p5014_p2 = por %p5013_p12, %p5012_p11 }
  0x6a   : > { %p5008_p10 = pneg %p5007_p9 }
  0x6c   : > { %p5015_p3 = pnand %p5014_p2, %p5008_p10 }
  0x6e   : > { %5018 = shalt.err (!%p5015_p3)
}
  0x6f   : > { %4840 = dma.hbm_to_vmem [thread:$0]  (!%p5427_p5), %s6146_s14, 384, %s607_s29, [#allocation14], %s5283_s0, %s5283_s0, %s5284_s21  }
  0x70   : > { %s5285_s23 = smov [#allocation16]   ;;  %s5286_s12 = smov [#allocation2]  }
  0x71   : > { %s630_s11 = sshll.u32 %s5285_s23, 4  ;;  %s520_s19 = sshll.u32 %s5286_s12, 4  ;;  %s631_s11 = int_to_ptr.vmem [resolvable:$true] %s630_s11  ;;  %s521_s19 = int_to_ptr.vmem [resolvable:$true] %s520_s19 }
  0x72   : > { %s5019_s25 = scalar_lea.hbm %s6148_s16, 768 }
  0x73   : > { %p5020_p2 = scmp.ne.s32.totalorder %s6148_s16, %s5019_s25  ;;  %p5026_p0 = scmp.lt.u32.totalorder %s5019_s25, %s6148_s16 }
  0x75   : > { %p5022_p3 = pnand %p5020_p2, %p5443_p7 }
  0x77   : > { %p5023_p13 = pneg %p5022_p3 }
  0x79   : > { %p5028_p1 = pnand %p5026_p0, %p5023_p13 }
  0x7b   : > { %5031 = shalt.err (!%p5028_p1)
}
  0x7c   : > { %s5032_s29 = scalar_lea.vmem %s631_s11, 768  ;;  %p5040_p9 = scmp.lt.s32.totalorder %s631_s11, %s631_s11 }
  0x7d   : > { %p5033_p4 = scmp.ne.s32.totalorder %s631_s11, %s5032_s29  ;;  %p5041_p10 = scmp.lt.s32.totalorder %s5032_s29, %s5032_s29 }
  0x7f   : > { %p5035_p6 = pnand %p5033_p4, %p5443_p7  ;;  %p5042_p11 = por %p5041_p10, %p5040_p9 }
  0x81   : > { %p5036_p8 = pneg %p5035_p6 }
  0x83   : > { %p5043_p12 = pnand %p5042_p11, %p5036_p8 }
  0x85   : > { %5046 = shalt.err (!%p5043_p12)
}
  0x86   : > { %4846 = dma.hbm_to_vmem [thread:$0]  (!%p5427_p5), %s6148_s16, 768, %s631_s11, [#allocation17], %s5283_s0, %s5283_s0, %s5284_s21  }
  0x87   : > { %s5047_s22 = scalar_lea.hbm %s6137_s5, 16 }
  0x88   : > { %p5048_p2 = scmp.ne.s32.totalorder %s6137_s5, %s5047_s22  ;;  %p5054_p0 = scmp.lt.u32.totalorder %s5047_s22, %s6137_s5 }
  0x8a   : > { %p5050_p3 = pnand %p5048_p2, %p5443_p7 }
  0x8c   : > { %p5051_p13 = pneg %p5050_p3 }
  0x8e   : > { %p5056_p1 = pnand %p5054_p0, %p5051_p13 }
  0x90   : > { %5059 = shalt.err (!%p5056_p1)
}
  0x91   : > { %s5060_s28 = scalar_lea.vmem %s521_s19, 16  ;;  %s5067_s11 = scalar_lea.vmem %s521_s19, 32 }
  0x92   : > { %p5061_p4 = scmp.ne.s32.totalorder %s521_s19, %s5060_s28  ;;  %p5068_p9 = scmp.lt.s32.totalorder %s521_s19, %s521_s19 }
  0x93   : > { %p5069_p10 = scmp.lt.s32.totalorder %s5067_s11, %s5060_s28 }
  0x94   : > { %p5063_p6 = pnand %p5061_p4, %p5443_p7 }
  0x95   : > { %p5070_p11 = por %p5069_p10, %p5068_p9 }
  0x96   : > { %p5064_p8 = pneg %p5063_p6 }
  0x98   : > { %p5071_p12 = pnand %p5070_p11, %p5064_p8 }
  0x9a   : > { %5074 = shalt.err (!%p5071_p12)
}
  0x9b   : > { %4819 = dma.hbm_to_vmem [thread:$0]  (!%p5427_p5), %s6137_s5, 16, %s521_s19, [#allocation3]  }
  0x9c   : > { %s5287_s23 = smov [#allocation6]   ;;  %s5288_s20 = smov [#allocation9]  }
  0x9d   : > { %s544_s12 = sshll.u32 %s5287_s23, 4  ;;  %s568_s22 = sshll.u32 %s5288_s20, 4  ;;  %s545_s12 = int_to_ptr.vmem [resolvable:$true] %s544_s12  ;;  %s569_s22 = int_to_ptr.vmem [resolvable:$true] %s568_s22 }
  0x9e   : > { %s5075_s4 = scalar_lea.hbm %s6139_s7, 16 }
  0x9f   : > { %p5076_p2 = scmp.ne.s32.totalorder %s6139_s7, %s5075_s4  ;;  %p5082_p0 = scmp.lt.u32.totalorder %s5075_s4, %s6139_s7 }
  0xa1   : > { %p5078_p3 = pnand %p5076_p2, %p5443_p7 }
  0xa3   : > { %p5079_p13 = pneg %p5078_p3 }
  0xa5   : > { %p5084_p1 = pnand %p5082_p0, %p5079_p13 }
  0xa7   : > { %5087 = shalt.err (!%p5084_p1)
}
  0xa8   : > { %s5088_s19 = scalar_lea.vmem %s545_s12, 16  ;;  %s5095_s3 = scalar_lea.vmem %s545_s12, 32 }
  0xa9   : > { %p5089_p4 = scmp.ne.s32.totalorder %s545_s12, %s5088_s19  ;;  %p5096_p9 = scmp.lt.s32.totalorder %s545_s12, %s545_s12 }
  0xaa   : > { %p5097_p10 = scmp.lt.s32.totalorder %s5095_s3, %s5088_s19 }
  0xab   : > { %p5091_p6 = pnand %p5089_p4, %p5443_p7 }
  0xac   : > { %p5098_p11 = por %p5097_p10, %p5096_p9 }
  0xad   : > { %p5092_p8 = pneg %p5091_p6 }
  0xaf   : > { %p5099_p12 = pnand %p5098_p11, %p5092_p8 }
  0xb1   : > { %5102 = shalt.err (!%p5099_p12)
}
  0xb2   : > { %4825 = dma.hbm_to_vmem [thread:$0]  (!%p5427_p5), %s6139_s7, 16, %s545_s12, [#allocation5]  }
  0xb3   : > { %s5103_s4 = scalar_lea.hbm %s6141_s9, 16 }
  0xb4   : > { %p5104_p2 = scmp.ne.s32.totalorder %s6141_s9, %s5103_s4  ;;  %p5110_p0 = scmp.lt.u32.totalorder %s5103_s4, %s6141_s9 }
  0xb6   : > { %p5106_p3 = pnand %p5104_p2, %p5443_p7 }
  0xb8   : > { %p5107_p13 = pneg %p5106_p3 }
  0xba   : > { %p5112_p1 = pnand %p5110_p0, %p5107_p13 }
  0xbc   : > { %5115 = shalt.err (!%p5112_p1)
}
  0xbd   : > { %s5116_s19 = scalar_lea.vmem %s569_s22, 16  ;;  %s5123_s12 = scalar_lea.vmem %s569_s22, 32 }
  0xbe   : > { %p5117_p4 = scmp.ne.s32.totalorder %s569_s22, %s5116_s19  ;;  %p5124_p9 = scmp.lt.s32.totalorder %s569_s22, %s569_s22 }
  0xbf   : > { %p5125_p10 = scmp.lt.s32.totalorder %s5123_s12, %s5116_s19 }
  0xc0   : > { %p5119_p6 = pnand %p5117_p4, %p5443_p7 }
  0xc1   : > { %p5126_p11 = por %p5125_p10, %p5124_p9 }
  0xc2   : > { %p5120_p8 = pneg %p5119_p6 }
  0xc4   : > { %p5127_p12 = pnand %p5126_p11, %p5120_p8 }
  0xc6   : > { %5130 = shalt.err (!%p5127_p12)
}
  0xc7   : > { %4831 = dma.hbm_to_vmem [thread:$0]  (!%p5427_p5), %s6141_s9, 16, %s569_s22, [#allocation8]  }
  0xc8   : > { %s5289_s20 = smov [#allocation12]   ;;  %s5290_s27 = smov [#allocation15]  }
  0xc9   : > { %s596_s25 = sshll.u32 %s5289_s20, 4  ;;  %s620_s4 = sshll.u32 %s5290_s27, 4  ;;  %s597_s25 = int_to_ptr.vmem [resolvable:$true] %s596_s25  ;;  %s621_s4 = int_to_ptr.vmem [resolvable:$true] %s620_s4 }
  0xca   : > { %s5131_s11 = scalar_lea.hbm %s6145_s13, 16 }
  0xcb   : > { %p5132_p2 = scmp.ne.s32.totalorder %s6145_s13, %s5131_s11  ;;  %p5138_p0 = scmp.lt.u32.totalorder %s5131_s11, %s6145_s13 }
  0xcd   : > { %p5134_p3 = pnand %p5132_p2, %p5443_p7 }
  0xcf   : > { %p5135_p13 = pneg %p5134_p3 }
  0xd1   : > { %p5140_p1 = pnand %p5138_p0, %p5135_p13 }
  0xd3   : > { %5143 = shalt.err (!%p5140_p1)
}
  0xd4   : > { %s5144_s22 = scalar_lea.vmem %s597_s25, 16  ;;  %s5151_s23 = scalar_lea.vmem %s597_s25, 32 }
  0xd5   : > { %p5145_p4 = scmp.ne.s32.totalorder %s597_s25, %s5144_s22  ;;  %p5152_p9 = scmp.lt.s32.totalorder %s597_s25, %s597_s25 }
  0xd6   : > { %p5153_p10 = scmp.lt.s32.totalorder %s5151_s23, %s5144_s22 }
  0xd7   : > { %p5147_p6 = pnand %p5145_p4, %p5443_p7 }
  0xd8   : > { %p5154_p11 = por %p5153_p10, %p5152_p9 }
  0xd9   : > { %p5148_p8 = pneg %p5147_p6 }
  0xdb   : > { %p5155_p12 = pnand %p5154_p11, %p5148_p8 }
  0xdd   : > { %5158 = shalt.err (!%p5155_p12)
}
  0xde   : > { %4837 = dma.hbm_to_vmem [thread:$0]  (!%p5427_p5), %s6145_s13, 16, %s597_s25, [#allocation11]  }
  0xdf   : > { %s5159_s11 = scalar_lea.hbm %s6147_s15, 16 }
  0xe0   : > { %p5160_p2 = scmp.ne.s32.totalorder %s6147_s15, %s5159_s11  ;;  %p5166_p0 = scmp.lt.u32.totalorder %s5159_s11, %s6147_s15 }
  0xe2   : > { %p5162_p3 = pnand %p5160_p2, %p5443_p7 }
  0xe4   : > { %p5163_p13 = pneg %p5162_p3 }
  0xe6   : > { %p5168_p1 = pnand %p5166_p0, %p5163_p13 }
  0xe8   : > { %5171 = shalt.err (!%p5168_p1)
}
  0xe9   : > { %s5172_s22 = scalar_lea.vmem %s621_s4, 16  ;;  %s5179_s25 = scalar_lea.vmem %s621_s4, 32 }
  0xea   : > { %p5173_p4 = scmp.ne.s32.totalorder %s621_s4, %s5172_s22  ;;  %p5180_p9 = scmp.lt.s32.totalorder %s621_s4, %s621_s4 }
  0xeb   : > { %p5181_p10 = scmp.lt.s32.totalorder %s5179_s25, %s5172_s22 }
  0xec   : > { %p5175_p6 = pnand %p5173_p4, %p5443_p7 }
  0xed   : > { %p5182_p11 = por %p5181_p10, %p5180_p9 }
  0xee   : > { %p5176_p8 = pneg %p5175_p6 }
  0xf0   : > { %p5183_p12 = pnand %p5182_p11, %p5176_p8 }
  0xf2   : > { %5186 = shalt.err (!%p5183_p12)
}
  0xf3   : > { %4843 = dma.hbm_to_vmem [thread:$0]  (!%p5427_p5), %s6147_s15, 16, %s621_s4, [#allocation14]  }
  0xf4   : > { %s5291_s27 = smov [#allocation18]   ;;  %s5292_s28 = smov [#allocation19]  }
  0xf5   : > { %s644_s30 = sshll.u32 %s5291_s27, 4  ;;  %s654_s11 = sshll.u32 %s5292_s28, 4  ;;  %s645_s30 = int_to_ptr.vmem [resolvable:$true] %s644_s30  ;;  %s655_s11 = int_to_ptr.vmem [resolvable:$true] %s654_s11 }
  0xf6   : > { %s5187_s12 = scalar_lea.hbm %s6149_s17, 16 }
  0xf7   : > { %p5188_p2 = scmp.ne.s32.totalorder %s6149_s17, %s5187_s12  ;;  %p5194_p0 = scmp.lt.u32.totalorder %s5187_s12, %s6149_s17 }
  0xf9   : > { %p5190_p3 = pnand %p5188_p2, %p5443_p7 }
  0xfb   : > { %p5191_p13 = pneg %p5190_p3 }
  0xfd   : > { %p5196_p1 = pnand %p5194_p0, %p5191_p13 }
  0xff   : > { %5199 = shalt.err (!%p5196_p1)
}
 0x100   : > { %s5200_s4 = scalar_lea.vmem %s645_s30, 16  ;;  %s5207_s20 = scalar_lea.vmem %s645_s30, 32 }
 0x101   : > { %p5201_p4 = scmp.ne.s32.totalorder %s645_s30, %s5200_s4  ;;  %p5208_p9 = scmp.lt.s32.totalorder %s645_s30, %s645_s30 }
 0x102   : > { %p5209_p10 = scmp.lt.s32.totalorder %s5207_s20, %s5200_s4 }
 0x103   : > { %p5203_p6 = pnand %p5201_p4, %p5443_p7 }
 0x104   : > { %p5210_p11 = por %p5209_p10, %p5208_p9 }
 0x105   : > { %p5204_p8 = pneg %p5203_p6 }
 0x107   : > { %p5211_p12 = pnand %p5210_p11, %p5204_p8 }
 0x109   : > { %5214 = shalt.err (!%p5211_p12)
}
 0x10a   : > { %4849 = dma.hbm_to_vmem [thread:$0]  (!%p5427_p5), %s6149_s17, 16, %s645_s30, [#allocation17]  }
 0x10b   : > { %s5215_s12 = scalar_lea.hbm %s6150_s18, 256 }
 0x10c   : > { %p5216_p2 = scmp.ne.s32.totalorder %s6150_s18, %s5215_s12  ;;  %p5222_p0 = scmp.lt.u32.totalorder %s5215_s12, %s6150_s18 }
 0x10e   : > { %p5218_p3 = pnand %p5216_p2, %p5443_p7 }
 0x110   : > { %p5219_p13 = pneg %p5218_p3 }
 0x112   : > { %p5224_p1 = pnand %p5222_p0, %p5219_p13 }
 0x114   : > { %5227 = shalt.err (!%p5224_p1)
}
 0x115   : > { %s5228_s4 = scalar_lea.vmem %s655_s11, 256  ;;  %p5236_p9 = scmp.lt.s32.totalorder %s655_s11, %s655_s11 }
 0x116   : > { %p5229_p4 = scmp.ne.s32.totalorder %s655_s11, %s5228_s4  ;;  %p5237_p10 = scmp.lt.s32.totalorder %s5228_s4, %s5228_s4 }
 0x118   : > { %p5231_p6 = pnand %p5229_p4, %p5443_p7  ;;  %p5238_p11 = por %p5237_p10, %p5236_p9 }
 0x11a   : > { %p5232_p8 = pneg %p5231_p6 }
 0x11c   : > { %p5239_p12 = pnand %p5238_p11, %p5232_p8 }
 0x11e   : > { %5242 = shalt.err (!%p5239_p12)
}
 0x11f   : > { %4852 = dma.hbm_to_vmem [thread:$0]  (!%p5427_p5), %s6150_s18, 256, %s655_s11, [#allocation20], %s5283_s0, %s5283_s0, %s5284_s21  }
 0x120   : > { %p6175_p2 = scmp.ne.s32.totalorder %s6172_s2, 0 }
 0x121   : > { %p6176_p7 = scmp.eq.s32.totalorder (!%p6175_p2), %s5410_s24, 0 }
 0x122   : > { %689 = sbr.rel (%p6175_p2) target bundleno = 3611 (0xe1b), region = 100 }
 0x129   : > { %5248 = dma.done.wait (%p6176_p7), [#allocation3], 16   ;;  %p6177_p3 = pmov %p6176_p7 }
 0x12b   : > { %5250 = vsyncadd (%p6177_p3), [#allocation3], 4294967280  ;;  %p6178_p13 = pmov %p6177_p3 }
 0x12c   : > { %p6179_p0 = pmov %p6177_p3 }
 0x12d   : > { %5252 = dma.done.wait (%p6178_p13), [#allocation5], 400  }
 0x12e   : > { %5254 = vsyncadd (%p6179_p0), [#allocation5], 4294966896  ;;  %p6180_p1 = pmov %p6179_p0 }
 0x12f   : > { %p6181_p5 = pmov %p6179_p0 }
 0x130   : > { %5256 = dma.done.wait (%p6180_p1), [#allocation8], 784  }
 0x131   : > { %5258 = vsyncadd (%p6181_p5), [#allocation8], 4294966512  ;;  %p6182_p4 = pmov %p6179_p0 }
 0x132   : > { %p6183_p6 = pmov %p6179_p0 }
 0x133   : > { %5260 = dma.done.wait (%p6182_p4), [#allocation11], 144  }
 0x134   : > { %5262 = vsyncadd (%p6183_p6), [#allocation11], 4294967152  ;;  %p6184_p8 = pmov %p6179_p0 }
 0x135   : > { %p6185_p9 = pmov %p6179_p0 }
 0x136   : > { %5264 = dma.done.wait (%p6184_p8), [#allocation14], 400  }
 0x137   : > { %5266 = vsyncadd (%p6185_p9), [#allocation14], 4294966896  ;;  %p6186_p10 = pmov %p6179_p0 }
 0x138   : > { %p6187_p11 = pmov %p6179_p0 }
 0x139   : > { %5268 = dma.done.wait (%p6186_p10), [#allocation17], 784  }
 0x13a   : > { %5270 = vsyncadd (%p6187_p11), [#allocation17], 4294966512  ;;  %p6188_p12 = pmov %p6179_p0 }
 0x13b   : > { %p6189_p2 = pmov %p6179_p0 }
 0x13c   : > { %5272 = dma.done.wait (%p6188_p12), [#allocation20], 256  }
 0x13d   : > { %5274 = vsyncadd (%p6189_p2), [#allocation20], 4294967040  ;;  %p794_p7 = scmp.lt.s32.totalorder %s5410_s24, 1  ;;  %v5293_v0 = vmov 0   ;;  %s6190_s0 = sld [smem:[#allocation29_spill]]  ;;  %vm859_vm0 = vcmask 1040384   ;;  %v811_v18 = vlaneseq }
 0x13e   : > { %4906 = vset.pattern.permute.xlu1 %v5293_v0  ;;  %4905 = vset.pattern.permute.xlu0 %v5293_v0  ;;  %s6191_s28 = sld [smem:[#allocation31_spill]]  ;;  %vm846_vm1 = vcmask 531456   ;;  %v5294_v22 = vmov 0.0   ;;  %s6192_s19 = sld [smem:[#allocation33_spill]]  ;;  %vm1155_vm6 = vcmask 1045504   ;;  %vm957_vm7 = vcmask 1046528  }
 0x13f   : > { %s6203_s24 = smov (!%p794_p7, %s5410_s24), 1  ;;  %v5753_v19 = vand.u32 127, %v811_v18  ;;  %vm965_vm8 = vcmask 130048   ;;  %v1277_v56 = vld [vmem:[#allocation4 + $0x8] sm:$0xff]  ;;  %v1275_v57 = vld [vmem:[#allocation4] sm:$0xff]  ;;  %vm1289_vm9 = vcmask 64512  }
 0x140   : > { %s4153_s1 = sshll.u32 %s6203_s24, 5  ;;  %v4034_v58 = vld [vmem:[#allocation2] ss:$0 sm:$0xff]  ;;  %vm1921_vm10 = vcmask 261120   ;;  %vm1931_vm11 = vcmask 254976   ;;  %s4767_s26 = smul.u32 48, %s6203_s24 }
 0x141   : > { %s6193_s11 = sld [smem:[#allocation30_spill]]  ;;  %vm5296_vm12 = vmmov 0   ;;  %vm1945_vm13 = vcmask 1041408   ;;  %vm5297_vm14 = vmmov 1   ;;  %s6196_s3 = sld [smem:[#allocation34_spill]] }
 0x142   : > { %vm5857_vm15 = vmpackc.low %vm1945_vm13, %vm5297_vm14  ;;  %s6197_s23 = sld [smem:[#allocation32_spill]]  ;;  %s6198_s4 = sld [smem:[#allocation35_spill]] }
 0x143   : > { %s798_s21 = scalar_lea.vmem %s6190_s0, %s4153_s1  ;;  %s6199_s25 = sld [smem:[#allocation36_spill]] }
 0x144   : > { %v809_v1 = vld [vmem:[%s798_s21 + $0x10] sm:$0xff]  ;;  %v807_v2 = vld [vmem:[%s798_s21] sm:$0xff]  ;;  %v810_v3 = vld [vmem:[%s798_s21 + $0x18] sm:$0xff]  ;;  %s5298_s12 = smov 32   ;;  %s6200_s20 = sld [smem:[#allocation37_spill]] }
 0x145   : > { %820 = vperm.xlu1 %4906, %v809_v1   ;;  %814 = vperm.xlu0 %4905, %v807_v2   ;;  %v837_v4 = vld [vmem:[%s6191_s28] sm:$0xff]  ;;  %v838_v5 = vld [vmem:[%s6191_s28 + $0x8] sm:$0xff]  ;;  %v839_v8 = vld [vmem:[%s6191_s28 + $0x10] sm:$0xff] }
 0x146   : > { %v808_v6 = vld [vmem:[%s798_s21 + $0x8] sm:$0xff]  ;;  %v4606_v7 = vpack.c.bf16 %v838_v5, %v837_v4  ;;  %v840_v9 = vld [vmem:[%s6191_s28 + $0x18] sm:$0xff]  ;;  %v841_v11 = vld [vmem:[%s6191_s28 + $0x20] sm:$0xff] }
 0x147   : > { %v4610_v10 = vpack.c.bf16 %v840_v9, %v839_v8  ;;  %v842_v12 = vld [vmem:[%s6191_s28 + $0x28] sm:$0xff]  ;;  %v843_v14 = vld [vmem:[%s6191_s28 + $0x30] sm:$0xff]  ;;  %v844_v15 = vld [vmem:[%s6191_s28 + $0x38] sm:$0xff]  ;;  %s803_s27 = scalar_lea.vmem %s6193_s11, %s4767_s26 }
 0x148   : > { %4607 = vmatprep.subr.bf16.mxu0 %v4606_v7  ;;  %v4614_v13 = vpack.c.bf16 %v842_v12, %v841_v11  ;;  %v4618_v16 = vpack.c.bf16 %v844_v15, %v843_v14  ;;  %v845_v17 = vld [vmem:[%s6191_s28 + $0x40] sm:$0x1]  ;;  %v4018_v29 = vld [vmem:[%s6192_s19 + $0x10] sm:$0xff]  ;;  %v4019_v30 = vld [vmem:[%s6192_s19 + $0x18] sm:$0xff] }
 0x149   : > { %823 = vperm.xlu1 %4906, %v810_v3   ;;  %817 = vperm.xlu0 %4905, %v808_v6   ;;  %v4622_v31 = vpack.c.bf16 %v4019_v30, %v4018_v29  ;;  %v948_v32 = vld [vmem:[%s6192_s19] sm:$0xff]  ;;  %v949_v33 = vld [vmem:[%s6192_s19 + $0x8] sm:$0xff]  ;;  %v4047_v30 = vld [vmem:[#allocation6] ss:$0 sm:$0xff] }
 0x14a   : > { %4609 = vmatpush3.bf16.msra.mxu0 %v4606_v7  ;;  %v4626_v34 = vpack.c.bf16 %v949_v33, %v948_v32  ;;  %v4028_v43 = vld [vmem:[%s6192_s19 + $0x20] sm:$0xff]  ;;  %v4029_v44 = vld [vmem:[%s6192_s19 + $0x28] sm:$0xff]  ;;  %s806_s1 = scalar_lea.vmem %s6200_s20, %s6203_s24 }
 0x14b   : > { %4611 = vmatprep.subr.bf16.mxu0 %v4610_v10  ;;  %4623 = vmatprep.subr.bf16.mxu1 %v4622_v31  ;;  %v4630_v51 = vpack.c.bf16 %v4029_v44, %v4028_v43 }
 0x14c   : > { %4625 = vmatpush3.bf16.msra.mxu1 %v4622_v31 }
 0x14d   : > { %4627 = vmatprep.subr.bf16.mxu1 %v4626_v34 }
 0x14e   : > { %4613 = vmatpush3.bf16.msra.mxu0 %v4610_v10 }
 0x14f   : > { %4615 = vmatprep.subr.bf16.mxu0 %v4614_v13 }
 0x152   : > { %4617 = vmatpush3.bf16.msra.mxu0 %v4614_v13 }
 0x153   : > { %4619 = vmatprep.subr.bf16.mxu0 %v4618_v16 }
 0x156   : > { %4621 = vmatpush3.bf16.msra.mxu0 %v4618_v16 }
 0x157   : > { %4339 = vmatprep.subr.msk.mxu0 %vm859_vm0, %v845_v17 }
 0x15a   : > { %4340 = vmatpush3.msk.msra.mxu0 %vm859_vm0, %v845_v17  ;;  %vm1941_vm0 = vcmask 211968  }
 0x15b   : > { %4377 = vmatprep.subr.mxu0 %v1277_v56 }
 0x1c4   : > { %v821_v20 = vpop.permute.xlu1 %820  ;;  %v815_v21 = vpop.permute.xlu0 %814 }
 0x1c5   : > { %vm825_vm2 = vcmp.eq.s32.totalorder %v815_v21, %v5753_v19  ;;  %vm827_vm3 = vcmp.eq.s32.totalorder %v821_v20, %v5753_v19  ;;  %v1477_v20 = vld [vmem:[#allocation4 + $0x10] sm:$0xff] }
 0x1c6   : > { %v4009_v23 = vsel %vm825_vm2, 1.0, %v5294_v22  ;;  %v4011_v26 = vsel %vm827_vm3, 1.0, %v5294_v22 }
 0x1c7   : > { %4341 = vmatprep.mubr.msk.f32.mxu0 %vm846_vm1, %v4009_v23 }
 0x1c8   : > { %v824_v24 = vpop.permute.xlu1 %823  ;;  %v818_v25 = vpop.permute.xlu0 %817 }
 0x1c9   : > { %vm826_vm4 = vcmp.eq.s32.totalorder %v818_v25, %v5753_v19  ;;  %vm828_vm5 = vcmp.eq.s32.totalorder %v824_v24, %v5753_v19  ;;  %v1600_v24 = vld [vmem:[#allocation7 + $0x10] sm:$0xff]  ;;  %v1601_v25 = vld [vmem:[#allocation7 + $0x18] sm:$0xff] }
 0x1ca   : > { %v4010_v27 = vsel %vm826_vm4, 1.0, %v5294_v22  ;;  %v4012_v28 = vsel %vm828_vm5, 1.0, %v5294_v22 }
 0x1cb   : > { %4342 = vmatmul.mubr.msk.f32.vlgmr.msra.gmra.mrb[0].mxu0 %vm846_vm1, %v4010_v27  ;;  %v1597_v27 = vld [vmem:[#allocation7] sm:$0xff] }
 0x1cc   : > { %4344 = vmatprep.mubr.msk.f32.mxu0 %vm846_vm1, %v4011_v26  ;;  %4378 = vmatpush3.msra.mxu0 %v1277_v56  ;;  %v4634_v26 = vpack.c.bf16 %v1601_v25, %v1600_v24 }
 0x1cd   : > { %4385 = vmatprep.subr.mxu0 %v1275_v57 }
 0x1cf   : > { %4345 = vmatmul.mubr.msk.f32.gmra.mrb[2].mxu0 %vm846_vm1, %v4012_v28  ;;  %v1598_v28 = vld [vmem:[#allocation7 + $0x8] sm:$0xff] }
 0x1d0   : > { %v4638_v29 = vpack.c.bf16 %v1598_v28, %v1597_v27 }
 0x29e   : > { %v4343_v35 = vpop.f32.mrb[0].mxu0 }
 0x29f   : > { %v959_v36 = vrot.slane %v4343_v35, 1  ;;  %v1157_v37 = vrot.slane %v4343_v35, 2  ;;  %v929_v38 = vpop.f32.mrb[1].mxu0 }
 0x2a0   : > { %v958_v39 = vrot.slane %v929_v38, 1  ;;  %v1156_v40 = vrot.slane %v929_v38, 2 }
 0x2a2   : > { %v4346_v41 = vpop.f32.mrb[2].mxu0  ;;  %v960_v42 = vsel %vm957_vm7, %v958_v39, %v959_v36  ;;  %v1158_v45 = vsel %vm1155_vm6, %v1156_v40, %v1157_v37 }
 0x2a3   : > { %v963_v46 = vrot.slane %v4346_v41, 1  ;;  %v1161_v47 = vrot.slane %v4346_v41, 2  ;;  %v939_v48 = vpop.f32.mrb[3].mxu0  ;;  %4351 = vmatprep.mubr.msk.f32.mxu1 %vm965_vm8, %v960_v42 }
 0x2a4   : > { %v961_v49 = vrot.slane %v939_v48, 1  ;;  %v1159_v50 = vrot.slane %v939_v48, 2 }
 0x2a6   : > { %v1160_v52 = vsel %vm1155_vm6, %v1157_v37, %v1159_v50  ;;  %v962_v53 = vsel %vm957_vm7, %v959_v36, %v961_v49  ;;  %v964_v54 = vsel %vm957_vm7, %v961_v49, %v963_v46  ;;  %v1162_v55 = vsel %vm1155_vm6, %v1159_v50, %v1161_v47  ;;  %v1801_v49 = vld [vmem:[#allocation7 + $0x28] sm:$0xff] }
 0x2a7   : > { %4352 = vmatmul.mubr.msk.f32.vlgmr.msra.gmra.mrb[0].mxu1 %vm965_vm8, %v962_v53 }
 0x2a8   : > { %4354 = vmatprep.mubr.msk.f32.mxu1 %vm965_vm8, %v964_v54  ;;  %4629 = vmatpush3.bf16.msra.mxu1 %v4626_v34 }
 0x2a9   : > { %4631 = vmatprep.subr.bf16.mxu1 %v4630_v51 }
 0x2ab   : > { %4355 = vmatmul.mubr.msk.f32.gmra.mrb[2].mxu1 %vm965_vm8, %v963_v46 }
 0x2ac   : > { %4361 = vmatprep.mubr.msk.f32.mxu1 %vm965_vm8, %v929_v38 }
 0x2af   : > { %4362 = vmatmul.mubr.msk.f32.vlgmr.msra.gmra.mrb[0].mxu1 %vm965_vm8, %v4343_v35 }
 0x2b0   : > { %4364 = vmatprep.mubr.msk.f32.mxu1 %vm965_vm8, %v939_v48  ;;  %4633 = vmatpush3.bf16.msra.mxu1 %v4630_v51  ;;  %v1800_v48 = vld [vmem:[#allocation7 + $0x20] sm:$0xff] }
 0x2b1   : > { %4635 = vmatprep.subr.bf16.mxu1 %v4634_v26 }
 0x2b3   : > { %4365 = vmatmul.mubr.msk.f32.gmra.mrb[2].mxu1 %vm965_vm8, %v4346_v41 }
 0x2b4   : > { %4371 = vmatprep.mubr.msk.f32.mxu1 %vm965_vm8, %v1158_v45 }
 0x2b7   : > { %4372 = vmatmul.mubr.msk.f32.vlgmr.msra.gmra.mrb[0].mxu1 %vm965_vm8, %v1160_v52 }
 0x2b8   : > { %4374 = vmatprep.mubr.msk.f32.mxu1 %vm965_vm8, %v1162_v55  ;;  %4637 = vmatpush3.bf16.msra.mxu1 %v4634_v26  ;;  %v4642_v55 = vpack.c.bf16 %v1801_v49, %v1800_v48  ;;  %v2023_v49 = vld [vmem:[%s6196_s3 + $0x18] sm:$0x3] }
 0x2b9   : > { %4639 = vmatprep.subr.bf16.mxu1 %v4638_v29 }
 0x2bb   : > { %4375 = vmatmul.mubr.msk.f32.gmra.mrb[2].mxu1 %vm965_vm8, %v1161_v47 }
 0x38a   : > { %v4373_v59 = vpop.f32.mrb[0].mxu1 }
 0x38b   : > { %v1268_v60 = vadd.f32 %v4373_v59, %v4034_v58  ;;  %v1237_v61 = vpop.f32.mrb[1].mxu1 }
 0x38c   : > { %v1267_v62 = vadd.f32 %v4034_v58, %v1237_v61 }
 0x38d   : > { %v1272_v63 = vmax.f32 %v1268_v60, 0.0  ;;  %v4060_v60 = vld [vmem:[#allocation9] ss:$0 sm:$0xff] }
 0x38e   : > { %v1271_v0 = vmax.f32 %v1267_v62, 0.0  ;;  %v4376_v1 = vpop.f32.mrb[2].mxu1 }
 0x38f   : > { %v1283_v2 = vrot.slane %v1272_v63, 1  ;;  %v1479_v3 = vrot.slane %v1272_v63, 2  ;;  %v1270_v4 = vadd.f32 %v4376_v1, %v4034_v58  ;;  %v1247_v5 = vpop.f32.mrb[3].mxu1 }
 0x390   : > { %v1282_v6 = vrot.slane %v1271_v0, 1  ;;  %v1478_v7 = vrot.slane %v1271_v0, 2  ;;  %v1269_v8 = vadd.f32 %v4034_v58, %v1247_v5 }
 0x391   : > { %v1274_v9 = vmax.f32 %v1270_v4, 0.0 }
 0x392   : > { %v1273_v10 = vmax.f32 %v1269_v8, 0.0  ;;  %v1284_v11 = vsel %vm957_vm7, %v1282_v6, %v1283_v2  ;;  %v1480_v12 = vsel %vm1155_vm6, %v1478_v7, %v1479_v3 }
 0x393   : > { %v1287_v13 = vrot.slane %v1274_v9, 1  ;;  %v1483_v14 = vrot.slane %v1274_v9, 2  ;;  %4379 = vmatprep.mubr.msk.f32.mxu0 %vm1289_vm9, %v1284_v11 }
 0x394   : > { %v1285_v15 = vrot.slane %v1273_v10, 1  ;;  %v1481_v16 = vrot.slane %v1273_v10, 2 }
 0x396   : > { %v1286_v17 = vsel %vm957_vm7, %v1283_v2, %v1285_v15  ;;  %v1288_v18 = vsel %vm957_vm7, %v1285_v15, %v1287_v13  ;;  %v1482_v21 = vsel %vm1155_vm6, %v1479_v3, %v1481_v16  ;;  %v1484_v23 = vsel %vm1155_vm6, %v1481_v16, %v1483_v14  ;;  %v2179_v16 = vld [vmem:[%s803_s27 + $0x18] sm:$0xff] }
 0x397   : > { %4380 = vmatmul.mubr.msk.f32.vlgmr.msra.gmra.mrb[4].mxu0 %vm1289_vm9, %v1286_v17  ;;  %v5295_v15 = vmov 0.0|0.0   ;;  %v2181_v17 = vld [vmem:[%s803_s27 + $0x28] sm:$0xff] }
 0x398   : > { %4382 = vmatprep.mubr.msk.f32.mxu0 %vm1289_vm9, %v1288_v18  ;;  %4386 = vmatpush3.msra.mxu0 %v1275_v57  ;;  %v2177_v18 = vld [vmem:[%s803_s27 + $0x8] sm:$0xff] }
 0x399   : > { %4393 = vmatprep.subr.mxu0 %v1477_v20 }
 0x39b   : > { %4383 = vmatmul.mubr.msk.f32.gmra.mrb[6].mxu0 %vm1289_vm9, %v1287_v13  ;;  %v2176_v13 = vld [vmem:[%s803_s27] sm:$0xff] }
 0x39c   : > { %4387 = vmatprep.mubr.msk.f32.mxu0 %vm1289_vm9, %v1271_v0 }
 0x39f   : > { %4388 = vmatmul.mubr.msk.f32.vlgmr.msra.gmra.mrb[4].mxu0 %vm1289_vm9, %v1272_v63 }
 0x3a0   : > { %4390 = vmatprep.mubr.msk.f32.mxu0 %vm1289_vm9, %v1273_v10  ;;  %4394 = vmatpush3.msra.mxu0 %v1477_v20  ;;  %v2180_v20 = vld [vmem:[%s803_s27 + $0x20] sm:$0xff] }
 0x3a1   : > { %4646 = vmatprep.subr.bf16.mxu0 %v5295_v15 }
 0x3a3   : > { %4391 = vmatmul.mubr.msk.f32.gmra.mrb[6].mxu0 %vm1289_vm9, %v1274_v9 }
 0x3a4   : > { %4395 = vmatprep.mubr.msk.f32.mxu0 %vm1289_vm9, %v1480_v12 }
 0x3a7   : > { %4396 = vmatmul.mubr.msk.f32.vlgmr.msra.gmra.mrb[4].mxu0 %vm1289_vm9, %v1482_v21 }
 0x3a8   : > { %4398 = vmatprep.mubr.msk.f32.mxu0 %vm1289_vm9, %v1484_v23 }
 0x3ab   : > { %4399 = vmatmul.mubr.msk.f32.gmra.mrb[6].mxu0 %vm1289_vm9, %v1483_v14  ;;  %v2178_v14 = vld [vmem:[%s803_s27 + $0x10] sm:$0xff] }
 0x3ac   : > { %4439 = vmatprep.mubr.msk.f32.mxu0 %vm5296_vm12, %v5294_v22 }
 0x47a   : > { %v4397_v31 = vpop.f32.mrb[4].mxu0 }
 0x47b   : > { %v1590_v32 = vadd.f32 %v4397_v31, %v4047_v30  ;;  %v1559_v33 = vpop.f32.mrb[5].mxu0  ;;  %v3595_v31 = vld [vmem:[%s6199_s25 + $0x8] sm:$0xff] }
 0x47c   : > { %v1589_v34 = vadd.f32 %v4047_v30, %v1559_v33  ;;  %v1940_v33 = vld [vmem:[#allocation10] sm:$0xff] }
 0x47d   : > { %v1594_v35 = vmax.f32 %v1590_v32, 0.0 }
 0x47e   : > { %v1593_v36 = vmax.f32 %v1589_v34, 0.0  ;;  %v4400_v37 = vpop.f32.mrb[6].mxu0  ;;  %v2020_v34 = vld [vmem:[%s6196_s3] sm:$0xff] }
 0x47f   : > { %v1607_v38 = vrot.slane %v1594_v35, 1  ;;  %v1803_v39 = vrot.slane %v1594_v35, 2  ;;  %v1592_v40 = vadd.f32 %v4400_v37, %v4047_v30  ;;  %v1569_v41 = vpop.f32.mrb[7].mxu0  ;;  %v2219_v37 = vld [vmem:[%s6197_s23 + $0x8] sm:$0xff] }
 0x480   : > { %v1606_v42 = vrot.slane %v1593_v36, 1  ;;  %v1802_v43 = vrot.slane %v1593_v36, 2  ;;  %v1591_v44 = vadd.f32 %v4047_v30, %v1569_v41 }
 0x481   : > { %v1596_v45 = vmax.f32 %v1592_v40, 0.0  ;;  %v2221_v40 = vld [vmem:[%s6197_s23 + $0x18] sm:$0x3] }
 0x482   : > { %v1595_v46 = vmax.f32 %v1591_v44, 0.0  ;;  %v1608_v47 = vsel %vm957_vm7, %v1606_v42, %v1607_v38  ;;  %v1804_v50 = vsel %vm1155_vm6, %v1802_v43, %v1803_v39 }
 0x483   : > { %v1611_v51 = vrot.slane %v1596_v45, 1  ;;  %v1807_v52 = vrot.slane %v1596_v45, 2  ;;  %4405 = vmatprep.mubr.msk.f32.mxu1 %vm965_vm8, %v1608_v47 }
 0x484   : > { %v1609_v53 = vrot.slane %v1595_v46, 1  ;;  %v1805_v54 = vrot.slane %v1595_v46, 2 }
 0x486   : > { %v1610_v56 = vsel %vm957_vm7, %v1607_v38, %v1609_v53  ;;  %v1612_v57 = vsel %vm957_vm7, %v1609_v53, %v1611_v51  ;;  %v1806_v58 = vsel %vm1155_vm6, %v1803_v39, %v1805_v54  ;;  %v1808_v59 = vsel %vm1155_vm6, %v1805_v54, %v1807_v52  ;;  %v2220_v39 = vld [vmem:[%s6197_s23 + $0x10] sm:$0xff] }
 0x487   : > { %4406 = vmatmul.mubr.msk.f32.vlgmr.msra.gmra.mrb[4].mxu1 %vm965_vm8, %v1610_v56  ;;  %v4657_v47 = vpack.c.bf16 %v2221_v40, %v2220_v39 }
 0x488   : > { %4408 = vmatprep.mubr.msk.f32.mxu1 %vm965_vm8, %v1612_v57  ;;  %4641 = vmatpush3.bf16.msra.mxu1 %v4638_v29 }
 0x489   : > { %4643 = vmatprep.subr.bf16.mxu1 %v4642_v55 }
 0x48b   : > { %4409 = vmatmul.mubr.msk.f32.gmra.mrb[6].mxu1 %vm965_vm8, %v1611_v51 }
 0x48c   : > { %4415 = vmatprep.mubr.msk.f32.mxu1 %vm965_vm8, %v1593_v36  ;;  %v2218_v36 = vld [vmem:[%s6197_s23] sm:$0xff] }
 0x48d   : > { %v4653_v43 = vpack.c.bf16 %v2219_v37, %v2218_v36 }
 0x48f   : > { %4416 = vmatmul.mubr.msk.f32.vlgmr.msra.gmra.mrb[4].mxu1 %vm965_vm8, %v1594_v35 }
 0x490   : > { %4418 = vmatprep.mubr.msk.f32.mxu1 %vm965_vm8, %v1595_v46  ;;  %4645 = vmatpush3.bf16.msra.mxu1 %v4642_v55  ;;  %v2022_v46 = vld [vmem:[%s6196_s3 + $0x10] sm:$0xff] }
 0x493   : > { %4419 = vmatmul.mubr.msk.f32.gmra.mrb[6].mxu1 %vm965_vm8, %v1596_v45  ;;  %v2021_v45 = vld [vmem:[%s6196_s3 + $0x8] sm:$0xff] }
 0x494   : > { %4425 = vmatprep.mubr.msk.f32.mxu1 %vm965_vm8, %v1804_v50 }
 0x497   : > { %4426 = vmatmul.mubr.msk.f32.vlgmr.msra.gmra.mrb[4].mxu1 %vm965_vm8, %v1806_v58 }
 0x498   : > { %4428 = vmatprep.mubr.msk.f32.mxu1 %vm965_vm8, %v1808_v59  ;;  %v4080_v59 = vld [vmem:[%s6198_s4 + $0x10] sm:$0xff] }
 0x49b   : > { %4429 = vmatmul.mubr.msk.f32.gmra.mrb[6].mxu1 %vm965_vm8, %v1807_v52 }
 0x56a   : > { %v4427_v61 = vpop.f32.mrb[4].mxu1 }
 0x56b   : > { %v1914_v62 = vadd.f32 %v4427_v61, %v4060_v60  ;;  %v1883_v63 = vpop.f32.mrb[5].mxu1 }
 0x56c   : > { %v1913_v0 = vadd.f32 %v4060_v60, %v1883_v63 }
 0x56d   : > { %v5835_v1 = vmax.f32 %v1914_v62, 0.0 }
 0x56e   : > { %v5837_v2 = vmax.f32 %v1913_v0, 0.0  ;;  %v4430_v3 = vpop.f32.mrb[6].mxu1 }
 0x56f   : > { %v1893_v4 = vpop.f32.mrb[7].mxu1  ;;  %v1925_v5 = vsel %vm1921_vm10, %v5835_v1, 0.0  ;;  %v1916_v6 = vadd.f32 %v4430_v3, %v4060_v60 }
 0x570   : > { %v1915_v7 = vadd.f32 %v4060_v60, %v1893_v4  ;;  %1926 = vadd.xlane.f32.xlu1 %v1925_v5  ;;  %v1922_v8 = vsel %vm1921_vm10, %v5837_v2, 0.0  ;;  %v4081_v60 = vld [vmem:[%s6198_s4 + $0x18] sm:$0xff] }
 0x571   : > { %1923 = vadd.xlane.f32.xlu0 %v1922_v8  ;;  %v5845_v10 = vmax.f32 %v1916_v6, 0.0  ;;  %v4663_v61 = vpack.c.bf16 %v4081_v60, %v4080_v59 }
 0x572   : > { %v5843_v9 = vmax.f32 %v1915_v7, 0.0 }
 0x573   : > { %v1932_v12 = vsel %vm1931_vm11, %v5845_v10, 0.0  ;;  %4664 = vmatprep.subr.bf16.mxu1 %v4663_v61 }
 0x574   : > { %v1928_v11 = vsel %vm1921_vm10, %v5843_v9, 0.0  ;;  %4666 = vmatpush3.bf16.msra.mxu1 %v4663_v61 }
 0x575   : > { %1929 = vadd.xlane.f32.xlu0 %v1928_v11 }
 0x579   : > { %1933 = vadd.xlane.f32.xlu0 %v1932_v12 }
 0x581   : > { %2183 = vperm.xlu1 %4906, %v2176_v13  }
 0x585   : > { %2189 = vperm.xlu1 %4906, %v2178_v14  }
 0x589   : > { %2192 = vperm.xlu1 %4906, %v2179_v16   ;;  %v4095_v16 = vld [vmem:[%s6198_s4 + $0x28] sm:$0xff] }
 0x58d   : > { %2198 = vperm.xlu1 %4906, %v2181_v17  }
 0x58f   : > { %2186 = vperm.xlu0 %4905, %v2177_v18  }
 0x593   : > { %2195 = vperm.xlu0 %4905, %v2180_v20  }
 0x5fd   : > { %v1927_v21 = vpop.xlane.xlu1 %1926 }
 0x5fe   : > { %v1937_v23 = vmul.f32 0.03125, %v1927_v21  ;;  %v1924_v24 = vpop.xlane.xlu0 %1923 }
 0x5ff   : > { %v1936_v25 = vmul.f32 0.03125, %v1924_v24 }
 0x601   : > { %v4647_v26 = vpack.c.bf16 %v1937_v23, %v1936_v25  ;;  %v2184_v35 = vpop.permute.xlu1 %2183 }
 0x602   : > { %v1930_v27 = vpop.xlane.xlu0 %1929  ;;  %vm2200_vm1 = vcmp.eq.s32.totalorder %v2184_v35, %v5753_v19 }
 0x603   : > { %4648 = vmatpush3.bf16.msra.mxu0 %v4647_v26  ;;  %v1938_v29 = vmul.f32 0.03125, %v1930_v27  ;;  %v4067_v51 = vsel %vm2200_vm1, 1.0, %v5294_v22 }
 0x604   : > { %4649 = vmatprep.subr.bf16.mxu0 %v5295_v15  ;;  %v4094_v15 = vld [vmem:[%s6198_s4 + $0x20] sm:$0xff] }
 0x605   : > { %v2190_v44 = vpop.permute.xlu1 %2189  ;;  %v4671_v25 = vpack.c.bf16 %v4095_v16, %v4094_v15  ;;  %v2955_v16 = vld [vmem:[#allocation13 + $0x10] sm:$0xff] }
 0x606   : > { %v1934_v28 = vpop.xlane.xlu0 %1933  ;;  %vm2202_vm3 = vcmp.eq.s32.totalorder %v2190_v44, %v5753_v19 }
 0x607   : > { %v1939_v30 = vmul.f32 0.03125, %v1934_v28  ;;  %v4069_v54 = vsel %vm2202_vm3, 1.0, %v5294_v22 }
 0x609   : > { %v4650_v32 = vpack.c.bf16 %v1939_v30, %v1938_v29  ;;  %v2193_v50 = vpop.permute.xlu1 %2192 }
 0x60a   : > { %vm2203_vm4 = vcmp.eq.s32.totalorder %v2193_v50, %v5753_v19 }
 0x60b   : > { %4652 = vmatpush3.bf16.msk.msra.mxu0 %vm5857_vm15, %v4650_v32  ;;  %v4070_v56 = vsel %vm2203_vm4, 1.0, %v5294_v22 }
 0x60d   : > { %v2199_v55 = vpop.permute.xlu1 %2198 }
 0x60e   : > { %4440 = vmatmul.mubr.msk.f32.vlgmr.msra.gmra.mrb[8].mxu0 %vm1941_vm0, %v1940_v33  ;;  %v2187_v48 = vpop.permute.xlu0 %2186  ;;  %vm2205_vm12 = vcmp.eq.s32.totalorder %v2199_v55, %v5753_v19 }
 0x60f   : > { %4444 = vmatprep.mubr.msk.f32.mxu0 %vm1289_vm9, %v2020_v34  ;;  %vm2201_vm2 = vcmp.eq.s32.totalorder %v2187_v48, %v5753_v19  ;;  %v4072_v58 = vsel %vm2205_vm12, 1.0, %v5294_v22 }
 0x610   : > { %v4068_v53 = vsel %vm2201_vm2, 1.0, %v5294_v22 }
 0x612   : > { %v2196_v52 = vpop.permute.xlu0 %2195 }
 0x613   : > { %vm2204_vm5 = vcmp.eq.s32.totalorder %v2196_v52, %v5753_v19  ;;  %v2338_v19 = vld [vmem:[%s6198_s4] sm:$0xff] }
 0x614   : > { %v4071_v57 = vsel %vm2204_vm5, 1.0, %v5294_v22  ;;  %v2339_v22 = vld [vmem:[%s6198_s4 + $0x8] sm:$0xff] }
 0x615   : > { %v4667_v62 = vpack.c.bf16 %v2339_v22, %v2338_v19 }
 0x617   : > { %4668 = vmatprep.subr.bf16.mxu1 %v4667_v62 }
 0x6e1   : > { %v2015_v38 = vpop.f32.mrb[8].mxu0 }
 0x6e2   : > { %v2019_v41 = vmax.f32 %v2015_v38, 0.0  ;;  %v4441_v42 = vpop.f32.mrb[9].mxu0 }
 0x6e3   : > { %v2720_v42 = vld [vmem:[#allocation13] sm:$0xff] }
 0x6e4   : > { %4442 = vmatprep.subr.mxu0 %v2019_v41 }
 0x6e5   : > { %4443 = vmatpush3.msra.mxu0 %v2019_v41  ;;  %v2722_v41 = vld [vmem:[#allocation13 + $0x8] sm:$0xff] }
 0x6e6   : > { %4445 = vmatmul.mubr.msk.f32.vlgmr.msra.gmra.mrb[10].mxu0 %vm1289_vm9, %v2021_v45  ;;  %4654 = vmatprep.subr.bf16.mxu0 %v4653_v43 }
 0x6e7   : > { %4656 = vmatpush3.bf16.msra.mxu0 %v4653_v43  ;;  %4447 = vmatprep.mubr.msk.f32.mxu0 %vm1289_vm9, %v2022_v46  ;;  %v4102_v43 = vld [vmem:[#allocation12] ss:$0 sm:$0xff] }
 0x6e8   : > { %4659 = vmatprep.subr.msk.bf16.mxu0 %vm5857_vm15, %v4657_v47 }
 0x6ea   : > { %4448 = vmatmul.mubr.msk.f32.gmra.mrb[12].mxu0 %vm1289_vm9, %v2023_v49 }
 0x6eb   : > { %4662 = vmatpush3.bf16.msk.msra.mxu0 %vm5857_vm15, %v4657_v47  ;;  %4458 = vmatprep.mubr.msk.f32.mxu0 %vm1941_vm0, %v4067_v51 }
 0x6ec   : > { %4506 = vmatprep.subr.mxu0 %v2722_v41 }
 0x6ee   : > { %4459 = vmatmul.mubr.msk.f32.vlgmr.msra.gmra.mrb[14].mxu0 %vm1941_vm0, %v4068_v53 }
 0x6ef   : > { %4461 = vmatprep.mubr.msk.f32.mxu0 %vm1941_vm0, %v4069_v54  ;;  %4507 = vmatpush3.msra.mxu0 %v2722_v41 }
 0x6f0   : > { %4517 = vmatprep.subr.mxu0 %v2720_v42 }
 0x6f2   : > { %4462 = vmatmul.mubr.msk.f32.gmra.mrb[16].mxu0 %vm1941_vm0, %v4070_v56 }
 0x6f3   : > { %4464 = vmatprep.mubr.msk.f32.mxu0 %vm1941_vm0, %v4071_v57 }
 0x6f6   : > { %4465 = vmatmul.mubr.msk.f32.gmra.mrb[18].mxu0 %vm1941_vm0, %v4072_v58 }
 0x7b9   : > { %v5926_v63 = vpop.f32.mrb[10].mxu0 }
 0x7ba   : > { %v5928_v0 = vpop.f32.mrb[11].mxu0 }
 0x7bd   : > { %v5930_v3 = vpop.f32.mrb[12].mxu0 }
 0x7be   : > { %v5932_v4 = vpop.f32.mrb[13].mxu0 }
 0x7c1   : > { %v4460_v5 = vpop.f32.mrb[14].mxu0 }
 0x7c2   : > { %v2350_v6 = vrot.slane %v4460_v5, 1  ;;  %v2578_v7 = vrot.slane %v4460_v5, 2  ;;  %v2309_v8 = vpop.f32.mrb[15].mxu0 }
 0x7c3   : > { %v2349_v11 = vrot.slane %v2309_v8, 1  ;;  %v2577_v12 = vrot.slane %v2309_v8, 2 }
 0x7c5   : > { %v4463_v13 = vpop.f32.mrb[16].mxu0  ;;  %v2351_v14 = vsel %vm957_vm7, %v2349_v11, %v2350_v6  ;;  %v2579_v17 = vsel %vm1155_vm6, %v2577_v12, %v2578_v7 }
 0x7c6   : > { %v2354_v18 = vrot.slane %v4463_v13, 1  ;;  %v2582_v20 = vrot.slane %v4463_v13, 2  ;;  %v2319_v21 = vpop.f32.mrb[17].mxu0  ;;  %4471 = vmatprep.mubr.msk.f32.mxu1 %vm965_vm8, %v2351_v14 }
 0x7c7   : > { %v2352_v23 = vrot.slane %v2319_v21, 1  ;;  %v2580_v24 = vrot.slane %v2319_v21, 2 }
 0x7c9   : > { %v2353_v26 = vsel %vm957_vm7, %v2350_v6, %v2352_v23  ;;  %v2581_v27 = vsel %vm1155_vm6, %v2578_v7, %v2580_v24  ;;  %v4466_v28 = vpop.f32.mrb[18].mxu0  ;;  %v2355_v29 = vsel %vm957_vm7, %v2352_v23, %v2354_v18  ;;  %v2583_v30 = vsel %vm1155_vm6, %v2580_v24, %v2582_v20 }
 0x7ca   : > { %v2358_v32 = vrot.slane %v4466_v28, 1  ;;  %v2586_v33 = vrot.slane %v4466_v28, 2  ;;  %v2329_v34 = vpop.f32.mrb[19].mxu0  ;;  %4472 = vmatmul.mubr.msk.f32.vlgmr.msra.gmra.mrb[8].mxu1 %vm965_vm8, %v2353_v26 }
 0x7cb   : > { %v2356_v35 = vrot.slane %v2329_v34, 1  ;;  %v2584_v36 = vrot.slane %v2329_v34, 2  ;;  %4474 = vmatprep.mubr.msk.f32.mxu1 %vm965_vm8, %v2355_v29  ;;  %4670 = vmatpush3.bf16.msra.mxu1 %v4667_v62  ;;  %v3102_v29 = vld [vmem:[#allocation16 + $0x10] sm:$0xff] }
 0x7cc   : > { %4672 = vmatprep.subr.bf16.mxu1 %v4671_v25 }
 0x7cd   : > { %v2357_v37 = vsel %vm957_vm7, %v2354_v18, %v2356_v35  ;;  %v2359_v38 = vsel %vm957_vm7, %v2356_v35, %v2358_v32  ;;  %v2585_v39 = vsel %vm1155_vm6, %v2582_v20, %v2584_v36  ;;  %v2587_v40 = vsel %vm1155_vm6, %v2584_v36, %v2586_v33  ;;  %v4121_v36 = vld [vmem:[#allocation15] ss:$0 sm:$0xff] }
 0x7ce   : > { %4475 = vmatmul.mubr.msk.f32.gmra.mrb[10].mxu1 %vm965_vm8, %v2357_v37 }
 0x7cf   : > { %4477 = vmatprep.mubr.msk.f32.mxu1 %vm965_vm8, %v2359_v38 }
 0x7d2   : > { %4478 = vmatmul.mubr.msk.f32.gmra.mrb[12].mxu1 %vm965_vm8, %v2358_v32 }
 0x7d3   : > { %4484 = vmatprep.mubr.msk.f32.mxu1 %vm965_vm8, %v2309_v8 }
 0x7d6   : > { %4485 = vmatmul.mubr.msk.f32.vlgmr.msra.gmra.mrb[8].mxu1 %vm965_vm8, %v4460_v5 }
 0x7d7   : > { %4487 = vmatprep.mubr.msk.f32.mxu1 %vm965_vm8, %v2319_v21  ;;  %4674 = vmatpush3.bf16.msra.mxu1 %v4671_v25 }
 0x7da   : > { %4488 = vmatmul.mubr.msk.f32.gmra.mrb[10].mxu1 %vm965_vm8, %v4463_v13 }
 0x7db   : > { %4490 = vmatprep.mubr.msk.f32.mxu1 %vm965_vm8, %v2329_v34  ;;  %v3100_v34 = vld [vmem:[#allocation16 + $0x8] sm:$0xff] }
 0x7de   : > { %4491 = vmatmul.mubr.msk.f32.gmra.mrb[12].mxu1 %vm965_vm8, %v4466_v28 }
 0x7df   : > { %4497 = vmatprep.mubr.msk.f32.mxu1 %vm965_vm8, %v2579_v17 }
 0x7e2   : > { %4498 = vmatmul.mubr.msk.f32.vlgmr.msra.gmra.mrb[8].mxu1 %vm965_vm8, %v2581_v27 }
 0x7e3   : > { %4500 = vmatprep.mubr.msk.f32.mxu1 %vm965_vm8, %v2583_v30  ;;  %v3103_v30 = vld [vmem:[#allocation16 + $0x18] sm:$0xff] }
 0x7e4   : > { %v4675_v32 = vpack.c.bf16 %v3103_v30, %v3102_v29 }
 0x7e6   : > { %4501 = vmatmul.mubr.msk.f32.gmra.mrb[10].mxu1 %vm965_vm8, %v2585_v39  ;;  %4676 = vmatprep.subr.bf16.mxu1 %v4675_v32 }
 0x7e7   : > { %4503 = vmatprep.mubr.msk.f32.mxu1 %vm965_vm8, %v2587_v40  ;;  %4678 = vmatpush3.bf16.msra.mxu1 %v4675_v32 }
 0x7ea   : > { %4504 = vmatmul.mubr.msk.f32.gmra.mrb[12].mxu1 %vm965_vm8, %v2586_v33  ;;  %v3099_v33 = vld [vmem:[#allocation16] sm:$0xff] }
 0x7eb   : > { %v4679_v35 = vpack.c.bf16 %v3100_v34, %v3099_v33 }
 0x7ed   : > { %4680 = vmatprep.subr.bf16.mxu1 %v4679_v35 }
 0x8b5   : > { %v4499_v44 = vpop.f32.mrb[8].mxu1 }
 0x8b6   : > { %v2709_v45 = vadd.f32 %v4499_v44, %v4102_v43  ;;  %v2666_v46 = vpop.f32.mrb[9].mxu1 }
 0x8b7   : > { %v2708_v47 = vadd.f32 %v4102_v43, %v2666_v46 }
 0x8b8   : > { %v2715_v48 = vmax.f32 %v2709_v45, 0.0 }
 0x8b9   : > { %v2714_v49 = vmax.f32 %v2708_v47, 0.0  ;;  %v4502_v50 = vpop.f32.mrb[10].mxu1 }
 0x8ba   : > { %v2730_v51 = vrot.slane %v2715_v48, 1  ;;  %v2957_v52 = vrot.slane %v2715_v48, 2  ;;  %v2711_v53 = vadd.f32 %v4502_v50, %v4102_v43  ;;  %v2676_v54 = vpop.f32.mrb[11].mxu1 }
 0x8bb   : > { %v2729_v55 = vrot.slane %v2714_v49, 1  ;;  %v2956_v56 = vrot.slane %v2714_v49, 2  ;;  %v2710_v57 = vadd.f32 %v4102_v43, %v2676_v54 }
 0x8bc   : > { %v2717_v58 = vmax.f32 %v2711_v53, 0.0 }
 0x8bd   : > { %v2716_v59 = vmax.f32 %v2710_v57, 0.0  ;;  %v4505_v60 = vpop.f32.mrb[12].mxu1  ;;  %v2731_v61 = vsel %vm957_vm7, %v2729_v55, %v2730_v51  ;;  %v2958_v19 = vsel %vm1155_vm6, %v2956_v56, %v2957_v52  ;;  %v3336_v55 = vld [vmem:[#allocation16 + $0x20] sm:$0xff]  ;;  %v3337_v56 = vld [vmem:[#allocation16 + $0x28] sm:$0xff] }
 0x8be   : > { %v2734_v22 = vrot.slane %v2717_v58, 1  ;;  %v2961_v62 = vrot.slane %v2717_v58, 2  ;;  %v2713_v5 = vadd.f32 %v4505_v60, %v4102_v43  ;;  %v2686_v6 = vpop.f32.mrb[13].mxu1  ;;  %4508 = vmatprep.mubr.msk.f32.mxu0 %vm1289_vm9, %v2731_v61 }
 0x8bf   : > { %v2732_v7 = vrot.slane %v2716_v59, 1  ;;  %v2959_v8 = vrot.slane %v2716_v59, 2  ;;  %v2712_v11 = vadd.f32 %v4102_v43, %v2686_v6  ;;  %v4683_v6 = vpack.c.bf16 %v3337_v56, %v3336_v55 }
 0x8c0   : > { %v2719_v12 = vmax.f32 %v2713_v5, 0.0 }
 0x8c1   : > { %v2718_v13 = vmax.f32 %v2712_v11, 0.0  ;;  %v2733_v14 = vsel %vm957_vm7, %v2730_v51, %v2732_v7  ;;  %v2735_v15 = vsel %vm957_vm7, %v2732_v7, %v2734_v22  ;;  %v2960_v17 = vsel %vm1155_vm6, %v2957_v52, %v2959_v8 }
 0x8c2   : > { %v2738_v18 = vrot.slane %v2719_v12, 1  ;;  %v2965_v20 = vrot.slane %v2719_v12, 2  ;;  %4509 = vmatmul.mubr.msk.f32.vlgmr.msra.gmra.mrb[20].mxu0 %vm1289_vm9, %v2733_v14  ;;  %v2962_v21 = vsel %vm1155_vm6, %v2959_v8, %v2961_v62 }
 0x8c3   : > { %v2736_v23 = vrot.slane %v2718_v13, 1  ;;  %v2963_v24 = vrot.slane %v2718_v13, 2  ;;  %4511 = vmatprep.mubr.msk.f32.mxu0 %vm1289_vm9, %v2735_v15  ;;  %4518 = vmatpush3.msra.mxu0 %v2720_v42 }
 0x8c4   : > { %4528 = vmatprep.subr.mxu0 %v2955_v16 }
 0x8c5   : > { %v2737_v25 = vsel %vm957_vm7, %v2734_v22, %v2736_v23  ;;  %v2739_v26 = vsel %vm957_vm7, %v2736_v23, %v2738_v18  ;;  %v2964_v27 = vsel %vm1155_vm6, %v2961_v62, %v2963_v24  ;;  %v2966_v28 = vsel %vm1155_vm6, %v2963_v24, %v2965_v20  ;;  %v4140_v24 = vld [vmem:[#allocation18] ss:$0 sm:$0xff] }
 0x8c6   : > { %4512 = vmatmul.mubr.msk.f32.gmra.mrb[22].mxu0 %vm1289_vm9, %v2737_v25 }
 0x8c7   : > { %4514 = vmatprep.mubr.msk.f32.mxu0 %vm1289_vm9, %v2739_v26 }
 0x8ca   : > { %4515 = vmatmul.mubr.msk.f32.gmra.mrb[24].mxu0 %vm1289_vm9, %v2738_v18 }
 0x8cb   : > { %4519 = vmatprep.mubr.msk.f32.mxu0 %vm1289_vm9, %v2714_v49 }
 0x8ce   : > { %4520 = vmatmul.mubr.msk.f32.vlgmr.msra.gmra.mrb[20].mxu0 %vm1289_vm9, %v2715_v48 }
 0x8cf   : > { %4522 = vmatprep.mubr.msk.f32.mxu0 %vm1289_vm9, %v2716_v59  ;;  %4529 = vmatpush3.msra.mxu0 %v2955_v16 }
 0x8d2   : > { %4523 = vmatmul.mubr.msk.f32.gmra.mrb[22].mxu0 %vm1289_vm9, %v2717_v58 }
 0x8d3   : > { %4525 = vmatprep.mubr.msk.f32.mxu0 %vm1289_vm9, %v2718_v13 }
 0x8d6   : > { %4526 = vmatmul.mubr.msk.f32.gmra.mrb[24].mxu0 %vm1289_vm9, %v2719_v12 }
 0x8d7   : > { %4530 = vmatprep.mubr.msk.f32.mxu0 %vm1289_vm9, %v2958_v19 }
 0x8da   : > { %4531 = vmatmul.mubr.msk.f32.vlgmr.msra.gmra.mrb[20].mxu0 %vm1289_vm9, %v2960_v17 }
 0x8db   : > { %4533 = vmatprep.mubr.msk.f32.mxu0 %vm1289_vm9, %v2962_v21 }
 0x8de   : > { %4534 = vmatmul.mubr.msk.f32.gmra.mrb[22].mxu0 %vm1289_vm9, %v2964_v27 }
 0x8df   : > { %4536 = vmatprep.mubr.msk.f32.mxu0 %vm1289_vm9, %v2966_v28 }
 0x8e2   : > { %4537 = vmatmul.mubr.msk.f32.gmra.mrb[24].mxu0 %vm1289_vm9, %v2965_v20  ;;  %vm4702_vm9 = vmpackc.low %vm1155_vm6, %vm5297_vm14 }
 0x9ad   : > { %v4532_v37 = vpop.f32.mrb[20].mxu0 }
 0x9ae   : > { %v3088_v38 = vadd.f32 %v4532_v37, %v4121_v36  ;;  %v3045_v39 = vpop.f32.mrb[21].mxu0 }
 0x9af   : > { %v3087_v40 = vadd.f32 %v4121_v36, %v3045_v39 }
 0x9b0   : > { %v3094_v41 = vmax.f32 %v3088_v38, 0.0 }
 0x9b1   : > { %v3093_v42 = vmax.f32 %v3087_v40, 0.0  ;;  %v4535_v43 = vpop.f32.mrb[22].mxu0 }
 0x9b2   : > { %v3111_v44 = vrot.slane %v3094_v41, 1  ;;  %v3339_v45 = vrot.slane %v3094_v41, 2  ;;  %v3090_v46 = vadd.f32 %v4535_v43, %v4121_v36  ;;  %v3055_v47 = vpop.f32.mrb[23].mxu0 }
 0x9b3   : > { %v3110_v48 = vrot.slane %v3093_v42, 1  ;;  %v3338_v49 = vrot.slane %v3093_v42, 2  ;;  %v3089_v50 = vadd.f32 %v4121_v36, %v3055_v47 }
 0x9b4   : > { %v3096_v51 = vmax.f32 %v3090_v46, 0.0 }
 0x9b5   : > { %v3095_v52 = vmax.f32 %v3089_v50, 0.0  ;;  %v4538_v53 = vpop.f32.mrb[24].mxu0  ;;  %v3112_v54 = vsel %vm957_vm7, %v3110_v48, %v3111_v44  ;;  %v3340_v57 = vsel %vm1155_vm6, %v3338_v49, %v3339_v45  ;;  %v3505_v50 = vld [vmem:[#allocation19] sm:$0xff] }
 0x9b6   : > { %v3115_v58 = vrot.slane %v3096_v51, 1  ;;  %v3343_v59 = vrot.slane %v3096_v51, 2  ;;  %v3092_v60 = vadd.f32 %v4538_v53, %v4121_v36  ;;  %v3065_v61 = vpop.f32.mrb[25].mxu0  ;;  %4543 = vmatprep.mubr.msk.f32.mxu1 %vm965_vm8, %v3112_v54 }
 0x9b7   : > { %v3113_v19 = vrot.slane %v3095_v52, 1  ;;  %v3341_v22 = vrot.slane %v3095_v52, 2  ;;  %v3091_v62 = vadd.f32 %v4121_v36, %v3065_v61 }
 0x9b8   : > { %v3098_v5 = vmax.f32 %v3092_v60, 0.0 }
 0x9b9   : > { %v3097_v7 = vmax.f32 %v3091_v62, 0.0  ;;  %v3114_v8 = vsel %vm957_vm7, %v3111_v44, %v3113_v19  ;;  %v3116_v11 = vsel %vm957_vm7, %v3113_v19, %v3115_v58  ;;  %v3342_v12 = vsel %vm1155_vm6, %v3339_v45, %v3341_v22 }
 0x9ba   : > { %v3119_v13 = vrot.slane %v3098_v5, 1  ;;  %v3347_v14 = vrot.slane %v3098_v5, 2  ;;  %4544 = vmatmul.mubr.msk.f32.vlgmr.msra.gmra.mrb[14].mxu1 %vm965_vm8, %v3114_v8  ;;  %v3344_v15 = vsel %vm1155_vm6, %v3341_v22, %v3343_v59 }
 0x9bb   : > { %v3117_v16 = vrot.slane %v3097_v7, 1  ;;  %v3345_v17 = vrot.slane %v3097_v7, 2  ;;  %4546 = vmatprep.mubr.msk.f32.mxu1 %vm965_vm8, %v3116_v11  ;;  %4682 = vmatpush3.bf16.msra.mxu1 %v4679_v35 }
 0x9bc   : > { %4684 = vmatprep.subr.bf16.mxu1 %v4683_v6 }
 0x9bd   : > { %v3118_v18 = vsel %vm957_vm7, %v3115_v58, %v3117_v16  ;;  %v3120_v20 = vsel %vm957_vm7, %v3117_v16, %v3119_v13  ;;  %v3346_v21 = vsel %vm1155_vm6, %v3343_v59, %v3345_v17  ;;  %v3348_v23 = vsel %vm1155_vm6, %v3345_v17, %v3347_v14  ;;  %v3597_v16 = vld [vmem:[%s6199_s25 + $0x18] sm:$0xff]  ;;  %v3598_v17 = vld [vmem:[%s6199_s25 + $0x20] sm:$0xff] }
 0x9be   : > { %4547 = vmatmul.mubr.msk.f32.gmra.mrb[16].mxu1 %vm965_vm8, %v3118_v18  ;;  %vm3507_vm7 = vcmask 343040   ;;  %v3599_v18 = vld [vmem:[%s6199_s25 + $0x28] sm:$0x3]  ;;  %vm3799_vm6 = vcmask 516096  }
 0x9bf   : > { %4549 = vmatprep.mubr.msk.f32.mxu1 %vm965_vm8, %v3120_v20  ;;  %4590 = vmatprep.mubr.msk.f32.mxu0 %vm3507_vm7, %v3505_v50 }
 0x9c2   : > { %4550 = vmatmul.mubr.msk.f32.gmra.mrb[18].mxu1 %vm965_vm8, %v3119_v13 }
 0x9c3   : > { %4556 = vmatprep.mubr.msk.f32.mxu1 %vm965_vm8, %v3093_v42 }
 0x9c6   : > { %4557 = vmatmul.mubr.msk.f32.vlgmr.msra.gmra.mrb[14].mxu1 %vm965_vm8, %v3094_v41 }
 0x9c7   : > { %4559 = vmatprep.mubr.msk.f32.mxu1 %vm965_vm8, %v3095_v52  ;;  %4686 = vmatpush3.bf16.msra.mxu1 %v4683_v6  ;;  %v3506_v6 = vld [vmem:[#allocation19 + $0x8] sm:$0x3f] }
 0x9ca   : > { %4560 = vmatmul.mubr.msk.f32.gmra.mrb[16].mxu1 %vm965_vm8, %v3096_v51 }
 0x9cb   : > { %4562 = vmatprep.mubr.msk.f32.mxu1 %vm965_vm8, %v3097_v7  ;;  %v3594_v7 = vld [vmem:[%s6199_s25] sm:$0xff] }
 0x9ce   : > { %4563 = vmatmul.mubr.msk.f32.gmra.mrb[18].mxu1 %vm965_vm8, %v3098_v5 }
 0x9cf   : > { %4569 = vmatprep.mubr.msk.f32.mxu1 %vm965_vm8, %v3340_v57 }
 0x9d2   : > { %4570 = vmatmul.mubr.msk.f32.vlgmr.msra.gmra.mrb[14].mxu1 %vm965_vm8, %v3342_v12 }
 0x9d3   : > { %4572 = vmatprep.mubr.msk.f32.mxu1 %vm965_vm8, %v3344_v15  ;;  %v3596_v15 = vld [vmem:[%s6199_s25 + $0x10] sm:$0xff] }
 0x9d6   : > { %4573 = vmatmul.mubr.msk.f32.gmra.mrb[16].mxu1 %vm965_vm8, %v3346_v21 }
 0x9d7   : > { %4575 = vmatprep.mubr.msk.f32.mxu1 %vm965_vm8, %v3348_v23 }
 0x9da   : > { %4576 = vmatmul.mubr.msk.f32.gmra.mrb[18].mxu1 %vm965_vm8, %v3347_v14  ;;  %vm3600_vm8 = vcmask 113664  }
 0xaa5   : > { %v4571_v25 = vpop.f32.mrb[14].mxu1 }
 0xaa6   : > { %v3470_v26 = vadd.f32 %v4571_v25, %v4140_v24  ;;  %v3427_v27 = vpop.f32.mrb[15].mxu1 }
 0xaa7   : > { %v3469_v28 = vadd.f32 %v4140_v24, %v3427_v27 }
 0xaa8   : > { %v6024_v29 = vmax.f32 %v3470_v26, 0.0 }
 0xaa9   : > { %v6026_v30 = vmax.f32 %v3469_v28, 0.0  ;;  %v4574_v32 = vpop.f32.mrb[16].mxu1 }
 0xaaa   : > { %v3472_v33 = vadd.f32 %v4574_v32, %v4140_v24  ;;  %v3437_v34 = vpop.f32.mrb[17].mxu1  ;;  %v3484_v35 = vsel %vm1921_vm10, %v6024_v29, 0.0 }
 0xaab   : > { %v3471_v36 = vadd.f32 %v4140_v24, %v3437_v34  ;;  %3485 = vadd.xlane.f32.xlu1 %v3484_v35  ;;  %v3481_v37 = vsel %vm1921_vm10, %v6026_v30, 0.0  ;;  %v2121_v34 = vmax.f32 %v5928_v0, 0.0 }
 0xaac   : > { %v6032_v38 = vmax.f32 %v3472_v33, 0.0  ;;  %3482 = vadd.xlane.f32.xlu0 %v3481_v37 }
 0xaad   : > { %v4577_v39 = vpop.f32.mrb[18].mxu1  ;;  %v6036_v42 = vmax.f32 %v3471_v36, 0.0  ;;  %v2123_v36 = vmax.f32 %v5932_v4, 0.0  ;;  %v3723_v4 = vsel %vm1921_vm10, %v6026_v30, -inf }
 0xaae   : > { %v3447_v40 = vpop.f32.mrb[19].mxu1  ;;  %v3490_v41 = vsel %vm1921_vm10, %v6032_v38, 0.0  ;;  %v3474_v43 = vadd.f32 %v4577_v39, %v4140_v24  ;;  %v2122_v39 = vmax.f32 %v5926_v63, 0.0  ;;  %v3726_v63 = vsel %vm1921_vm10, %v6032_v38, -inf }
 0xaaf   : > { %v3473_v44 = vadd.f32 %v4140_v24, %v3447_v40  ;;  %v3487_v47 = vsel %vm1921_vm10, %v6036_v42, 0.0  ;;  %v2124_v40 = vmax.f32 %v5930_v3, 0.0  ;;  %v3725_v3 = vsel %vm1921_vm10, %v6036_v42, -inf }
 0xab0   : > { %3491 = vadd.xlane.f32.xlu0 %v3490_v41  ;;  %v6040_v46 = vmax.f32 %v3474_v43, 0.0  ;;  %v3724_v43 = vsel %vm1921_vm10, %v6024_v29, -inf }
 0xab1   : > { %v6038_v45 = vmax.f32 %v3473_v44, 0.0 }
 0xab2   : > { %v3496_v49 = vsel %vm1931_vm11, %v6040_v46, 0.0  ;;  %v3729_v41 = vsel %vm1931_vm11, %v6040_v46, -inf }
 0xab3   : > { %v3493_v48 = vsel %vm1921_vm10, %v6038_v45, 0.0  ;;  %v3727_v0 = vsel %vm1921_vm10, %v6038_v45, -inf  ;;  %v3730_v44 = vmax.f32 %v3724_v43, %v3729_v41  ;;  %v2125_v43 = vsel %vm1921_vm10, %v5837_v2, -inf }
 0xab4   : > { %3488 = vadd.xlane.f32.xlu0 %v3487_v47  ;;  %3494 = vadd.xlane.f32.xlu1 %v3493_v48  ;;  %v3728_v47 = vmax.f32 %v3723_v4, %v3727_v0  ;;  %v2126_v0 = vsel %vm1921_vm10, %v5835_v1, -inf }
 0xab8   : > { %3497 = vadd.xlane.f32.xlu0 %v3496_v49  ;;  %v3731_v49 = vmax.f32 %v3728_v47, %v3730_v44 }
 0xb38   : > { %v3486_v51 = vpop.xlane.xlu1 %3485 }
 0xb39   : > { %v3500_v52 = vmul.f32 0.03125, %v3486_v51  ;;  %v3483_v53 = vpop.xlane.xlu0 %3482  ;;  %v3732_v51 = vmax.f32 %v3725_v3, %v3726_v63 }
 0xb3a   : > { %v3499_v54 = vmul.f32 0.03125, %v3483_v53 }
 0xb3b   : > { %v3733_v53 = vmax.f32 %v3731_v49, %v3732_v51 }
 0xb3c   : > { %v4687_v55 = vpack.c.bf16 %v3500_v52, %v3499_v54 }
 0xb3d   : > { %v3492_v56 = vpop.xlane.xlu0 %3491 }
 0xb3e   : > { %4688 = vmatprep.subr.bf16.mxu0 %v4687_v55  ;;  %v3502_v58 = vmul.f32 0.03125, %v3492_v56 }
 0xb3f   : > { %4690 = vmatpush3.bf16.msra.mxu0 %v4687_v55 }
 0xb41   : > { %v3489_v57 = vpop.xlane.xlu0 %3488  ;;  %v3495_v60 = vpop.xlane.xlu1 %3494 }
 0xb42   : > { %v3501_v59 = vmul.f32 0.03125, %v3489_v57  ;;  %v3503_v22 = vmul.f32 0.03125, %v3495_v60  ;;  %v3734_v60 = vrot.slane %v3733_v53, 4 }
 0xb44   : > { %v4691_v61 = vpack.c.bf16 %v3502_v58, %v3501_v59 }
 0xb45   : > { %v3498_v19 = vpop.xlane.xlu0 %3497 }
 0xb46   : > { %v3504_v62 = vmul.f32 0.03125, %v3498_v19  ;;  %4692 = vmatprep.subr.bf16.mxu0 %v4691_v61 }
 0xb47   : > { %4694 = vmatpush3.bf16.msra.mxu0 %v4691_v61 }
 0xb48   : > { %v4695_v5 = vpack.c.bf16 %v3504_v62, %v3503_v22 }
 0xb4a   : > { %4697 = vmatprep.subr.msk.bf16.mxu0 %vm5857_vm15, %v4695_v5 }
 0xb4b   : > { %4700 = vmatpush3.bf16.msk.msra.mxu0 %vm5857_vm15, %v4695_v5 }
 0xb4e   : > { %4591 = vmatmul.mubr.msk.f32.vlgmr.msra.gmra.mrb[26].mxu0 %vm3507_vm7, %v3506_v6 }
 0xb4f   : > { %4597 = vmatprep.mubr.msk.f32.mxu0 %vm3600_vm8, %v3594_v7 }
 0xc21   : > { %v4592_v8 = vpop.f32.mrb[26].mxu0 }
 0xc22   : > { %v3593_v11 = vmax.f32 %v4592_v8, 0.0  ;;  %v3583_v12 = vpop.f32.mrb[27].mxu0  ;;  %v3735_v8 = vmax.f32 %v3733_v53, %v3734_v60 }
 0xc23   : > { %v3592_v13 = vmax.f32 %v3583_v12, 0.0 }
 0xc25   : > { %v4701_v14 = vpack.c.bf16 %v3593_v11, %v3592_v13 }
 0xc27   : > { %4703 = vmatprep.subr.msk.bf16.mxu0 %vm4702_vm9, %v4701_v14 }
 0xc28   : > { %4706 = vmatpush3.bf16.msk.msra.mxu0 %vm4702_vm9, %v4701_v14 }
 0xc2b   : > { %4598 = vmatmul.mubr.msk.f32.vlgmr.msra.gmra.mrb[28].mxu0 %vm3600_vm8, %v3595_v31 }
 0xc2c   : > { %4600 = vmatprep.mubr.msk.f32.mxu0 %vm3600_vm8, %v3596_v15 }
 0xc2f   : > { %4601 = vmatmul.mubr.msk.f32.gmra.mrb[30].mxu0 %vm3600_vm8, %v3597_v16 }
 0xc30   : > { %4603 = vmatprep.mubr.msk.f32.mxu0 %vm3600_vm8, %v3598_v17 }
 0xc33   : > { %4604 = vmatmul.mubr.msk.f32.gmra.mrb[32].mxu0 %vm3600_vm8, %v3599_v18 }
 0xcfe   : > { %v4599_v20 = vpop.f32.mrb[28].mxu0 }
 0xcff   : > { %v3718_v21 = vmax.f32 %v4599_v20, 0.0  ;;  %v3688_v23 = vpop.f32.mrb[29].mxu0 }
 0xd00   : > { %v3717_v24 = vmax.f32 %v3688_v23, 0.0 }
 0xd01   : > { %3747 = vperm.xlu0 %4905, %v3718_v21  }
 0xd02   : > { %3742 = vperm.xlu1 %4906, %v3717_v24   ;;  %v4602_v25 = vpop.f32.mrb[30].mxu0 }
 0xd03   : > { %v3698_v26 = vpop.f32.mrb[31].mxu0  ;;  %v3720_v37 = vmax.f32 %v4602_v25, 0.0 }
 0xd04   : > { %v3719_v27 = vmax.f32 %v3698_v26, 0.0 }
 0xd06   : > { %3752 = vperm.xlu0 %4905, %v3719_v27   ;;  %v4605_v28 = vpop.f32.mrb[32].mxu0 }
 0xd07   : > { %v3722_v32 = vmax.f32 %v4605_v28, 0.0  ;;  %v3708_v33 = vpop.f32.mrb[33].mxu0 }
 0xd08   : > { %v3721_v35 = vmax.f32 %v3708_v33, 0.0 }
 0xd09   : > { %3767 = vperm.xlu1 %4906, %v3722_v32  }
 0xd0a   : > { %2140 = vperm.xlu0 %4905, %v2121_v34  }
 0xd0d   : > { %3762 = vperm.xlu1 %4906, %v3721_v35  }
 0xd0e   : > { %2150 = vperm.xlu0 %4905, %v2123_v36   ;;  %v2128_v36 = vsel %vm1931_vm11, %v5845_v10, -inf }
 0xd11   : > { %3757 = vperm.xlu1 %4906, %v3720_v37   ;;  %v2127_v37 = vsel %vm1921_vm10, %v5843_v9, -inf }
 0xd12   : > { %v2130_v44 = vmax.f32 %v2127_v37, %v2128_v36 }
 0xd15   : > { %2145 = vperm.xlu1 %4906, %v2122_v39  }
 0xd19   : > { %2155 = vperm.xlu1 %4906, %v2124_v40  }
 0xd80   : > { %v3748_v50 = vpop.permute.xlu0 %3747 }
 0xd81   : > { %v3743_v48 = vpop.permute.xlu1 %3742  ;;  %v3771_v58 = vmul.f32 %v3748_v50, %v6024_v29 }
 0xd82   : > { %v3770_v54 = vmul.f32 %v3743_v48, %v6026_v30 }
 0xd83   : > { %v3777_v30 = vsel %vm1921_vm10, %v3771_v58, -inf }
 0xd84   : > { %v3776_v61 = vsel %vm1921_vm10, %v3770_v54, -inf }
 0xd85   : > { %v3753_v56 = vpop.permute.xlu0 %3752 }
 0xd86   : > { %v3772_v19 = vmul.f32 %v3753_v56, %v6036_v42  ;;  %v3736_v42 = vrot.slane %v3735_v8, 2 }
 0xd88   : > { %v3768_v52 = vpop.permute.xlu1 %3767  ;;  %v3778_v29 = vsel %vm1921_vm10, %v3772_v19, -inf  ;;  %v3737_v15 = vmax.f32 %v3735_v8, %v3736_v42 }
 0xd89   : > { %v3775_v55 = vmul.f32 %v3768_v52, %v6040_v46  ;;  %v2141_v25 = vpop.permute.xlu0 %2140 }
 0xd8a   : > { %v3738_v17 = vrot.slane %v3737_v15, 1  ;;  %v2158_v34 = vmul.f32 %v2141_v25, %v5837_v2 }
 0xd8b   : > { %v3782_v22 = vsel %vm1931_vm11, %v3775_v55, -inf }
 0xd8c   : > { %v3763_v57 = vpop.permute.xlu1 %3762  ;;  %v3783_v7 = vmax.f32 %v3777_v30, %v3782_v22  ;;  %v3739_v21 = vmax.f32 %v3737_v15, %v3738_v17  ;;  %v2162_v4 = vsel %vm1921_vm10, %v2158_v34, -inf }
 0xd8d   : > { %v3774_v59 = vmul.f32 %v3763_v57, %v6038_v45  ;;  %v2151_v27 = vpop.permute.xlu0 %2150 }
 0xd8e   : > { %v2160_v32 = vmul.f32 %v2151_v27, %v5843_v9 }
 0xd8f   : > { %v3780_v62 = vsel %vm1921_vm10, %v3774_v59, -inf }
 0xd90   : > { %v3781_v5 = vmax.f32 %v3776_v61, %v3780_v62  ;;  %v3758_v6 = vpop.permute.xlu1 %3757  ;;  %v2164_v39 = vsel %vm1921_vm10, %v2160_v32, -inf }
 0xd91   : > { %v3773_v46 = vmul.f32 %v3758_v6, %v6032_v38 }
 0xd92   : > { %v3784_v11 = vmax.f32 %v3781_v5, %v3783_v7 }
 0xd93   : > { %v3779_v45 = vsel %vm1921_vm10, %v3773_v46, -inf }
 0xd94   : > { %v3785_v12 = vmax.f32 %v3778_v29, %v3779_v45  ;;  %v2146_v24 = vpop.permute.xlu1 %2145 }
 0xd95   : > { %v2159_v33 = vmul.f32 %v2146_v24, %v5835_v1 }
 0xd96   : > { %v3786_v13 = vmax.f32 %v3784_v11, %v3785_v12 }
 0xd97   : > { %v2163_v40 = vsel %vm1921_vm10, %v2159_v33, -inf }
 0xd98   : > { %v3787_v14 = vrot.slane %v3786_v13, 4  ;;  %v2156_v26 = vpop.permute.xlu1 %2155  ;;  %v2166_v47 = vmax.f32 %v2162_v4, %v2163_v40 }
 0xd99   : > { %v2161_v28 = vmul.f32 %v2156_v26, %v5845_v10  ;;  %v2129_v10 = vmax.f32 %v2125_v43, %v2126_v0 }
 0xd9a   : > { %v3788_v31 = vmax.f32 %v3786_v13, %v3787_v14 }
 0xd9b   : > { %v2165_v35 = vsel %vm1931_vm11, %v2161_v28, -inf  ;;  %v2131_v63 = vmax.f32 %v2129_v10, %v2130_v44 }
 0xd9c   : > { %v3789_v16 = vrot.slane %v3788_v31, 2  ;;  %v2167_v41 = vmax.f32 %v2164_v39, %v2165_v35 }
 0xd9d   : > { %v2132_v3 = vrot.slane %v2131_v63, 4 }
 0xd9e   : > { %v3790_v18 = vmax.f32 %v3788_v31, %v3789_v16  ;;  %v2168_v48 = vmax.f32 %v2166_v47, %v2167_v41 }
 0xd9f   : > { %v2133_v50 = vmax.f32 %v2131_v63, %v2132_v3 }
 0xda0   : > { %v3791_v20 = vrot.slane %v3790_v18, 1  ;;  %v2169_v9 = vrot.slane %v2168_v48, 4 }
 0xda1   : > { %v2134_v52 = vrot.slane %v2133_v50, 2 }
 0xda2   : > { %v3792_v23 = vmax.f32 %v3790_v18, %v3791_v20  ;;  %v2170_v49 = vmax.f32 %v2168_v48, %v2169_v9 }
 0xda3   : > { %v2135_v54 = vmax.f32 %v2133_v50, %v2134_v52 }
 0xda4   : > { %v3793_v38 = vadd.f32 %v3792_v23, %v3739_v21  ;;  %v2171_v51 = vrot.slane %v2170_v49, 2 }
 0xda5   : > { %v2136_v55 = vrot.slane %v2135_v54, 1 }
 0xda6   : > { %3795 = vrot.lane.b32.xlu0 %v3793_v38, %s5298_s12  ;;  %v2172_v53 = vmax.f32 %v2170_v49, %v2171_v51 }
 0xda7   : > { %v2137_v2 = vmax.f32 %v2135_v54, %v2136_v55 }
 0xda8   : > { %v2173_v1 = vrot.slane %v2172_v53, 1 }
 0xdaa   : > { %v2174_v56 = vmax.f32 %v2172_v53, %v2173_v1 }
 0xdac   : > { %v2175_v57 = vadd.f32 %v2174_v56, %v2137_v2 }
 0xe18   : > { %v3796_v58 = vpop.permute.xlu0 %3795 }
 0xe19   : > { %v3798_v59 = vsel %vm1921_vm10, %v2175_v57, %v3796_v58 }
 0xe1a   : > { %3800 = vst.msk [vmem:[%s806_s1] sm:$0x1] %vm3799_vm6, %v3798_v59 }
 0xe1b PF: > { %s6201_s2 = sld [smem:[#allocation28_spill]] }
 0xe21   : > { %s37_s1 = sadd.s32 1, %s6201_s2  }
 0xe22   : > { %p34_p3 = scmp.ge.s32.totalorder %s37_s1, 4  }
 0xe24   :  { %36 = sbr.rel (!%p34_p3) target bundleno = 17 (0x11), region = 194 }
 0xe2b   :  { %3818 = vsyncpa [#allocation3], 1 }
 0xe2c   :  { %3820 = vsyncpa [#allocation3 + $0x1], 1 }
 0xe2d   :  { %3821 = vsyncpa [#allocation5], 1 }
 0xe2e   :  { %3822 = vsyncpa [#allocation8], 1 }
 0xe2f   :  { %3823 = vsyncpa [#allocation11], 1 }
 0xe30   :  { %3824 = vsyncpa [#allocation14], 1 }
 0xe31   :  { %3825 = vsyncpa [#allocation17], 1 }
 0xe32   :  { %3826 = vsyncpa [#allocation20], 1 }

</bundles_post_ra>
